<compile_context>
chip_gen: v5e
topology: v5e:2x2
jax: 0.10.0
libtpu: 0.0.40
codegen_flags: <defaults>
</compile_context>

<pallas_src>
import functools

import jax
import jax.numpy as jnp
from jax.experimental import pallas as pl
from jax.experimental.pallas import tpu as pltpu


# ----------------------------- in-kernel GraphModule core ---------------------------------

def _graph_body(x, qx, kx, gcn_w_ref, ln_w_ref, ln_b_ref):
    """GraphModule core for one graph.

    x, qx, kx : (K, F) values (node features and their Wq/Wk projections).
    Returns the (1, F) mean over nodes after the GCN stack.
    """
    # dots = qx @ kx^T without an explicit transpose (contract on the feature axis).
    dots = jax.lax.dot_general(qx, kx, (((1,), (1,)), ((), ())),
                               preferred_element_type=jnp.float32)           # (K, K)
    sq = dots * dots
    denom = jnp.maximum(jnp.sum(sq, axis=-1, keepdims=True), 1e-12)          # F.normalize eps
    adj = sq * pl.reciprocal(denom, approx=True)   # row-L1 normalize; row scale cancels in LN

    num_layers = gcn_w_ref.shape[0]
    for l in range(num_layers):                                              # static unroll, L tiny
        h = jnp.dot(x, gcn_w_ref[l], preferred_element_type=jnp.float32)     # (K, F)
        h = jnp.dot(adj, h, preferred_element_type=jnp.float32)              # (K, F)
        # LayerNorm over features (torch default: biased variance, eps=1e-5).
        mu = jnp.mean(h, axis=-1, keepdims=True)
        hc = h - mu
        var = jnp.mean(hc * hc, axis=-1, keepdims=True)
        h = hc * jax.lax.rsqrt(var + 1e-5) * ln_w_ref[l] + ln_b_ref[l]
        x = jnp.maximum(h, 0.0)                                              # ReLU
    return jnp.mean(x, axis=0, keepdims=True)                                # (1, F)


# ----------------------------- fused forward kernel ---------------------------------------

def _fused_kernel(feats_ref, fg_ref,
                  gwq_w_ref, gwq_b_ref, gwk_w_ref, gwk_b_ref,
                  ggcn_w_ref, gln_w_ref, gln_b_ref,
                  owq_w_ref, owq_b_ref, owk_w_ref, owk_b_ref,
                  ogcn_w_ref, oln_w_ref, oln_b_ref,
                  w1a_ref, w1b_ref, b1_ref, w2_ref, b2_ref,
                  out_ref,
                  qx_scr, kx_scr, x1_scr, xs_scr, ys_scr,
                  *, N, FR, B, M):
    # ---------------- Stage 1: `graph` over the N*FR object graphs (B nodes each) ----------
    # qx / kx for every node of every graph in two large (N*FR*B, F)@(F, F) matmuls, staged
    # through VMEM scratch so the per-graph windows below are simple ref slices.
    X = feats_ref[...]                                                       # (N*FR*B, F)
    qx_scr[...] = (jnp.dot(X, gwq_w_ref[...], preferred_element_type=jnp.float32)
                   + gwq_b_ref[...])
    kx_scr[...] = (jnp.dot(X, gwk_w_ref[...], preferred_element_type=jnp.float32)
                   + gwk_b_ref[...])

    for g in range(N * FR):                                                  # static unroll
        rows = pl.ds(g * B, B)
        x1_scr[pl.ds(g, 1), :] = _graph_body(
            feats_ref[rows, :], qx_scr[rows, :], kx_scr[rows, :],
            ggcn_w_ref, gln_w_ref, gln_b_ref)

    # ------------- Stages 2 & 3: `graph_omega` (shared weights) on frame / global tokens ----
    owq_w = owq_w_ref[...]
    owq_b = owq_b_ref[...]
    owk_w = owk_w_ref[...]
    owk_b = owk_b_ref[...]
    for n in range(N):                                                       # static unroll
        xf = x1_scr[pl.ds(n * FR, FR), :]                                    # (FR, F) frame tokens
        qxf = jnp.dot(xf, owq_w, preferred_element_type=jnp.float32) + owq_b
        kxf = jnp.dot(xf, owk_w, preferred_element_type=jnp.float32) + owk_b
        xs_scr[pl.ds(n, 1), :] = _graph_body(xf, qxf, kxf,
                                             ogcn_w_ref, oln_w_ref, oln_b_ref)

        xg = fg_ref[pl.ds(n * M, M), :]                                      # (M, F) global tokens
        qxg = jnp.dot(xg, owq_w, preferred_element_type=jnp.float32) + owq_b
        kxg = jnp.dot(xg, owk_w, preferred_element_type=jnp.float32) + owk_b
        ys_scr[pl.ds(n, 1), :] = _graph_body(xg, qxg, kxg,
                                             ogcn_w_ref, oln_w_ref, oln_b_ref)

    # ---------------- Stage 4: classifier epilogue (fc1 split across the concat) ------------
    # h = ReLU(cat([x, y], -1) @ W1 + b1) computed WITHOUT the lane-axis concat:
    # W1 is pre-split into W1a (rows acting on x) and W1b (rows acting on y).
    # TODO(synk): nn.Dropout is identity in eval mode; training-mode dropout not implemented.
    h = jnp.dot(xs_scr[...], w1a_ref[...], preferred_element_type=jnp.float32)
    h = h + jnp.dot(ys_scr[...], w1b_ref[...], preferred_element_type=jnp.float32)
    h = jnp.maximum(h + b1_ref[...], 0.0)
    out_ref[...] = (jnp.dot(h, w2_ref[...], preferred_element_type=jnp.float32)
                    + b2_ref[...])


# ----------------------------- wrapper ------------------------------------------------------

def tokengraph_forward(feats, feats_global, params):
    """feats: (N, FR, B, NF); feats_global: (N, M, NF).  Returns (N, num_class)."""
    N, FR, B, NF = feats.shape
    M = feats_global.shape[1]
    g, o, c = params["graph"], params["graph_omega"], params["cls"]
    L = int(g["gcn_w"].shape[0])
    C = int(c["w2"].shape[1])

    # Free host-side views (contiguous reshapes): node axis flattened so the kernel can do one
    # big qx/kx matmul and slice per-graph windows out of VMEM scratch.
    feats2d = feats.reshape(N * FR * B, NF)
    fg2d = feats_global.reshape(N * M, NF)

    def gm_flops(ng, k):
        return ng * (4 * k * NF * NF + 2 * k * k * NF
                     + L * (2 * k * NF * NF + 2 * k * k * NF))

    flops = (gm_flops(N * FR, B) + gm_flops(N, FR) + gm_flops(N, M)
             + 4 * N * NF * NF + 2 * N * NF * C)
    transcendentals = (N * FR) * B * (L + 1) + N * (FR + M) * (L + 1)
    n_param = (sum(int(p.size) for gp in (g, o) for p in gp.values())
               + sum(int(p.size) for p in c.values()))
    bytes_accessed = 4 * (int(feats2d.size) + int(fg2d.size) + n_param + N * C)

    vmem = pl.BlockSpec(memory_space=pltpu.MemorySpace.VMEM)
    kernel = functools.partial(_fused_kernel, N=N, FR=FR, B=B, M=M)

    return pl.pallas_call(
        kernel,
        out_shape=jax.ShapeDtypeStruct((N, C), jnp.float32),
        in_specs=[vmem] * 21,
        out_specs=vmem,
        scratch_shapes=[
            pltpu.VMEM((N * FR * B, NF), jnp.float32),   # qx for all stage-1 nodes
            pltpu.VMEM((N * FR * B, NF), jnp.float32),   # kx for all stage-1 nodes
            pltpu.VMEM((N * FR, NF), jnp.float32),       # stage-1 per-graph means
            pltpu.VMEM((N, NF), jnp.float32),            # stage-2 means (x branch)
            pltpu.VMEM((N, NF), jnp.float32),            # stage-3 means (y branch)
        ],
        cost_estimate=pl.CostEstimate(flops=flops,
                                      transcendentals=transcendentals,
                                      bytes_accessed=bytes_accessed),
    )(feats2d, fg2d,
      g["wq_w"], g["wq_b"], g["wk_w"], g["wk_b"], g["gcn_w"], g["ln_w"], g["ln_b"],
      o["wq_w"], o["wq_b"], o["wk_w"], o["wk_b"], o["gcn_w"], o["ln_w"], o["ln_b"],
      c["w1a"], c["w1b"], c["b1"], c["w2"], c["b2"])


# ----------------------------- pure-JAX reference -------------------------------------------

def _graph_module_ref(x, p):
    hp = jax.lax.Precision.HIGHEST
    qx = jnp.einsum("gkf,fh->gkh", x, p["wq_w"], precision=hp) + p["wq_b"]
    kx = jnp.einsum("gkf,fh->gkh", x, p["wk_w"], precision=hp) + p["wk_b"]
    dots = jnp.einsum("gkf,glf->gkl", qx, kx, precision=hp)
    sq = dots * dots
    adj = sq / jnp.maximum(jnp.sum(sq, axis=-1, keepdims=True), 1e-12)
    for l in range(p["gcn_w"].shape[0]):
        h = jnp.einsum("gkf,fh->gkh", x, p["gcn_w"][l], precision=hp)
        h = jnp.einsum("gkl,glh->gkh", adj, h, precision=hp)
        mu = jnp.mean(h, axis=-1, keepdims=True)
        var = jnp.mean((h - mu) ** 2, axis=-1, keepdims=True)
        h = (h - mu) / jnp.sqrt(var + 1e-5) * p["ln_w"][l] + p["ln_b"][l]
        x = jnp.maximum(h, 0.0)
    return jnp.mean(x, axis=-2)


def _forward_ref(feats, feats_global, params):
    hp = jax.lax.Precision.HIGHEST
    N, FR, B, NF = feats.shape
    x = _graph_module_ref(feats.reshape(N * FR, B, NF), params["graph"])
    x = _graph_module_ref(x.reshape(N, FR, NF), params["graph_omega"])
    y = _graph_module_ref(feats_global, params["graph_omega"])
    c = params["cls"]
    h = jnp.maximum(jnp.dot(x, c["w1a"], precision=hp)
                    + jnp.dot(y, c["w1b"], precision=hp) + c["b1"], 0.0)
    return jnp.dot(h, c["w2"], precision=hp) + c["b2"]


if __name__ == "__main__":
    # Small shapes consistent with the module:
    #   feats: (N, FR, B, NF) = (2, 3, 5, 32); feats_global: (N, M, NF) = (2, 4, 32)
    N, FR, B, M = 2, 3, 5, 4
    NF = 32          # num_feats
    C = 8            # num_class
    L = 2            # gcn_layers

    key = jax.random.PRNGKey(0)
    k = iter(jax.random.split(key, 24))

    def graph_params():
        return dict(
            wq_w=0.1 * jax.random.normal(next(k), (NF, NF), jnp.float32),
            wq_b=0.1 * jax.random.normal(next(k), (1, NF), jnp.float32),
            wk_w=0.1 * jax.random.normal(next(k), (NF, NF), jnp.float32),
            wk_b=0.1 * jax.random.normal(next(k), (1, NF), jnp.float32),
            gcn_w=0.2 * jax.random.normal(next(k), (L, NF, NF), jnp.float32),
            ln_w=1.0 + 0.1 * jax.random.normal(next(k), (L, 1, NF), jnp.float32),
            ln_b=0.1 * jax.random.normal(next(k), (L, 1, NF), jnp.float32),
        )

    params = dict(
        graph=graph_params(),
        graph_omega=graph_params(),
        cls=dict(
            # torch fc1.weight is (NF, 2NF); we store its transpose split in halves:
            # W1a acts on x (first NF inputs), W1b on y (second NF inputs).
            w1a=0.1 * jax.random.normal(next(k), (NF, NF), jnp.float32),
            w1b=0.1 * jax.random.normal(next(k), (NF, NF), jnp.float32),
            b1=0.1 * jax.random.normal(next(k), (1, NF), jnp.float32),
            w2=0.1 * jax.random.normal(next(k), (NF, C), jnp.float32),
            b2=0.1 * jax.random.normal(next(k), (1, C), jnp.float32),
        ),
    )

    feats = jax.random.normal(next(k), (N, FR, B, NF), jnp.float32)
    feats_global = jax.random.normal(next(k), (N, M, NF), jnp.float32)

    fwd = jax.jit(tokengraph_forward)
    out = jax.block_until_ready(fwd(feats, feats_global, params))

    ref = jax.block_until_ready(_forward_ref(feats, feats_global, params))

    assert out.shape == (N, C)
    assert jnp.allclose(out, ref, atol=2e-3, rtol=2e-3), (
        f"mismatch vs reference: max abs diff {jnp.max(jnp.abs(out - ref))}")
    print("KERNEL_OK")
</pallas_src>

<mosaic_0001>
module attributes {stable_mosaic.version = 11 : i64} {
  func.func @_fused_kernel(%arg0: memref<30x32xf32, #tpu.memory_space<vmem>>, %arg1: memref<8x32xf32, #tpu.memory_space<vmem>>, %arg2: memref<32x32xf32, #tpu.memory_space<vmem>>, %arg3: memref<1x32xf32, #tpu.memory_space<vmem>>, %arg4: memref<32x32xf32, #tpu.memory_space<vmem>>, %arg5: memref<1x32xf32, #tpu.memory_space<vmem>>, %arg6: memref<2x32x32xf32, #tpu.memory_space<vmem>>, %arg7: memref<2x1x32xf32, #tpu.memory_space<vmem>>, %arg8: memref<2x1x32xf32, #tpu.memory_space<vmem>>, %arg9: memref<32x32xf32, #tpu.memory_space<vmem>>, %arg10: memref<1x32xf32, #tpu.memory_space<vmem>>, %arg11: memref<32x32xf32, #tpu.memory_space<vmem>>, %arg12: memref<1x32xf32, #tpu.memory_space<vmem>>, %arg13: memref<2x32x32xf32, #tpu.memory_space<vmem>>, %arg14: memref<2x1x32xf32, #tpu.memory_space<vmem>>, %arg15: memref<2x1x32xf32, #tpu.memory_space<vmem>>, %arg16: memref<32x32xf32, #tpu.memory_space<vmem>>, %arg17: memref<32x32xf32, #tpu.memory_space<vmem>>, %arg18: memref<1x32xf32, #tpu.memory_space<vmem>>, %arg19: memref<32x8xf32, #tpu.memory_space<vmem>>, %arg20: memref<1x8xf32, #tpu.memory_space<vmem>>, %arg21: memref<2x8xf32, #tpu.memory_space<vmem>>, %arg22: memref<30x32xf32, #tpu.memory_space<vmem>>, %arg23: memref<30x32xf32, #tpu.memory_space<vmem>>, %arg24: memref<6x32xf32, #tpu.memory_space<vmem>>, %arg25: memref<2x32xf32, #tpu.memory_space<vmem>>, %arg26: memref<2x32xf32, #tpu.memory_space<vmem>>) attributes {dimension_semantics = [], scalar_prefetch = 0 : i64, scratch_operands = 5 : i64, tpu.core_type = #tpu.core_type<tc>} {
    %c0 = arith.constant 0 : index
    %c0_0 = arith.constant 0 : index
    %0 = vector.load %arg0[%c0, %c0_0] : memref<30x32xf32, #tpu.memory_space<vmem>>, vector<30x32xf32>
    %c0_1 = arith.constant 0 : index
    %c0_2 = arith.constant 0 : index
    %1 = vector.load %arg2[%c0_1, %c0_2] : memref<32x32xf32, #tpu.memory_space<vmem>>, vector<32x32xf32>
    %cst = arith.constant dense<0.000000e+00> : vector<30x32xf32>
    %2 = tpu.matmul %0, %1, %cst {dimension_numbers = #tpu.dot_dimension_numbers<[1], [0], [0], [1], [0, 0, 1, 1], [], []>} : vector<30x32xf32>, vector<32x32xf32>, vector<30x32xf32> -> vector<30x32xf32>
    %c0_3 = arith.constant 0 : index
    %c0_4 = arith.constant 0 : index
    %3 = vector.load %arg3[%c0_3, %c0_4] : memref<1x32xf32, #tpu.memory_space<vmem>>, vector<1x32xf32>
    %4 = vector.broadcast %3 : vector<1x32xf32> to vector<30x32xf32>
    %5 = arith.addf %2, %4 : vector<30x32xf32>
    %c0_5 = arith.constant 0 : index
    %c0_6 = arith.constant 0 : index
    %6 = vector.load %arg22[%c0_5, %c0_6] : memref<30x32xf32, #tpu.memory_space<vmem>>, vector<30x32xf32>
    tpu.vector_store %arg22[%c0_5, %c0_6], %5 {strides = array<i32>} : memref<30x32xf32, #tpu.memory_space<vmem>>, vector<30x32xf32>,
    %c0_7 = arith.constant 0 : index
    %c0_8 = arith.constant 0 : index
    %7 = vector.load %arg4[%c0_7, %c0_8] : memref<32x32xf32, #tpu.memory_space<vmem>>, vector<32x32xf32>
    %cst_9 = arith.constant dense<0.000000e+00> : vector<30x32xf32>
    %8 = tpu.matmul %0, %7, %cst_9 {dimension_numbers = #tpu.dot_dimension_numbers<[1], [0], [0], [1], [0, 0, 1, 1], [], []>} : vector<30x32xf32>, vector<32x32xf32>, vector<30x32xf32> -> vector<30x32xf32>
    %c0_10 = arith.constant 0 : index
    %c0_11 = arith.constant 0 : index
    %9 = vector.load %arg5[%c0_10, %c0_11] : memref<1x32xf32, #tpu.memory_space<vmem>>, vector<1x32xf32>
    %10 = vector.broadcast %9 : vector<1x32xf32> to vector<30x32xf32>
    %11 = arith.addf %8, %10 : vector<30x32xf32>
    %c0_12 = arith.constant 0 : index
    %c0_13 = arith.constant 0 : index
    %12 = vector.load %arg23[%c0_12, %c0_13] : memref<30x32xf32, #tpu.memory_space<vmem>>, vector<30x32xf32>
    tpu.vector_store %arg23[%c0_12, %c0_13], %11 {strides = array<i32>} : memref<30x32xf32, #tpu.memory_space<vmem>>, vector<30x32xf32>,
    %c0_14 = arith.constant 0 : index
    %c0_15 = arith.constant 0 : index
    %13 = vector.load %arg0[%c0_14, %c0_15] : memref<30x32xf32, #tpu.memory_space<vmem>>, vector<5x32xf32>
    %c0_16 = arith.constant 0 : index
    %c0_17 = arith.constant 0 : index
    %14 = vector.load %arg22[%c0_16, %c0_17] : memref<30x32xf32, #tpu.memory_space<vmem>>, vector<5x32xf32>
    %c0_18 = arith.constant 0 : index
    %c0_19 = arith.constant 0 : index
    %15 = vector.load %arg23[%c0_18, %c0_19] : memref<30x32xf32, #tpu.memory_space<vmem>>, vector<5x32xf32>
    %cst_20 = arith.constant dense<0.000000e+00> : vector<5x5xf32>
    %16 = tpu.matmul %14, %15, %cst_20 {dimension_numbers = #tpu.dot_dimension_numbers<[1], [1], [0], [0], [0, 0, 1, 0], [], []>} : vector<5x32xf32>, vector<5x32xf32>, vector<5x5xf32> -> vector<5x5xf32>
    %17 = arith.mulf %16, %16 : vector<5x5xf32>
    %cst_21 = arith.constant dense<0.000000e+00> : vector<5xf32>
    %18 = vector.multi_reduction <add>, %17, %cst_21 [1] : vector<5x5xf32> to vector<5xf32>
    %19 = vector.shape_cast %18 : vector<5xf32> to vector<5x1xf32>
    %cst_22 = arith.constant 9.99999996E-13 : f32
    %20 = vector.broadcast %cst_22 : f32 to vector<5x1xf32>
    %21 = arith.maximumf %19, %20 : vector<5x1xf32>
    %22 = tpu.reciprocal %21 {approx = true} : vector<5x1xf32> -> vector<5x1xf32>
    %23 = vector.broadcast %22 : vector<5x1xf32> to vector<5x5xf32>
    %24 = arith.mulf %17, %23 : vector<5x5xf32>
    %c0_23 = arith.constant 0 : index
    %c0_24 = arith.constant 0 : index
    %c0_25 = arith.constant 0 : index
    %25 = vector.load %arg6[%c0_23, %c0_24, %c0_25] : memref<2x32x32xf32, #tpu.memory_space<vmem>>, vector<1x32x32xf32>
    %26 = vector.shape_cast %25 : vector<1x32x32xf32> to vector<32x32xf32>
    %cst_26 = arith.constant dense<0.000000e+00> : vector<5x32xf32>
    %27 = tpu.matmul %13, %26, %cst_26 {dimension_numbers = #tpu.dot_dimension_numbers<[1], [0], [0], [1], [0, 0, 1, 1], [], []>} : vector<5x32xf32>, vector<32x32xf32>, vector<5x32xf32> -> vector<5x32xf32>
    %cst_27 = arith.constant dense<0.000000e+00> : vector<5x32xf32>
    %28 = tpu.matmul %24, %27, %cst_27 {dimension_numbers = #tpu.dot_dimension_numbers<[1], [0], [0], [1], [0, 0, 1, 1], [], []>} : vector<5x5xf32>, vector<5x32xf32>, vector<5x32xf32> -> vector<5x32xf32>
    %cst_28 = arith.constant dense<0.000000e+00> : vector<5xf32>
    %29 = vector.multi_reduction <add>, %28, %cst_28 [1] : vector<5x32xf32> to vector<5xf32>
    %30 = vector.shape_cast %29 : vector<5xf32> to vector<5x1xf32>
    %cst_29 = arith.constant 3.200000e+01 : f32
    %31 = vector.broadcast %cst_29 : f32 to vector<5x1xf32>
    %32 = arith.divf %30, %31 : vector<5x1xf32>
    %33 = vector.broadcast %32 : vector<5x1xf32> to vector<5x32xf32>
    %34 = arith.subf %28, %33 : vector<5x32xf32>
    %35 = arith.mulf %34, %34 : vector<5x32xf32>
    %cst_30 = arith.constant dense<0.000000e+00> : vector<5xf32>
    %36 = vector.multi_reduction <add>, %35, %cst_30 [1] : vector<5x32xf32> to vector<5xf32>
    %37 = vector.shape_cast %36 : vector<5xf32> to vector<5x1xf32>
    %cst_31 = arith.constant 3.200000e+01 : f32
    %38 = vector.broadcast %cst_31 : f32 to vector<5x1xf32>
    %39 = arith.divf %37, %38 : vector<5x1xf32>
    %cst_32 = arith.constant 9.99999974E-6 : f32
    %40 = vector.broadcast %cst_32 : f32 to vector<5x1xf32>
    %41 = arith.addf %39, %40 : vector<5x1xf32>
    %42 = math.rsqrt %41 : vector<5x1xf32>
    %43 = vector.broadcast %42 : vector<5x1xf32> to vector<5x32xf32>
    %44 = arith.mulf %34, %43 : vector<5x32xf32>
    %c0_33 = arith.constant 0 : index
    %c0_34 = arith.constant 0 : index
    %c0_35 = arith.constant 0 : index
    %45 = vector.load %arg7[%c0_33, %c0_34, %c0_35] : memref<2x1x32xf32, #tpu.memory_space<vmem>>, vector<1x1x32xf32>
    %46 = vector.shape_cast %45 : vector<1x1x32xf32> to vector<1x32xf32>
    %47 = vector.broadcast %46 : vector<1x32xf32> to vector<5x32xf32>
    %48 = arith.mulf %44, %47 : vector<5x32xf32>
    %c0_36 = arith.constant 0 : index
    %c0_37 = arith.constant 0 : index
    %c0_38 = arith.constant 0 : index
    %49 = vector.load %arg8[%c0_36, %c0_37, %c0_38] : memref<2x1x32xf32, #tpu.memory_space<vmem>>, vector<1x1x32xf32>
    %50 = vector.shape_cast %49 : vector<1x1x32xf32> to vector<1x32xf32>
    %51 = vector.broadcast %50 : vector<1x32xf32> to vector<5x32xf32>
    %52 = arith.addf %48, %51 : vector<5x32xf32>
    %cst_39 = arith.constant 0.000000e+00 : f32
    %53 = vector.broadcast %cst_39 : f32 to vector<5x32xf32>
    %54 = arith.maximumf %52, %53 : vector<5x32xf32>
    %c1 = arith.constant 1 : index
    %c0_40 = arith.constant 0 : index
    %c0_41 = arith.constant 0 : index
    %55 = vector.load %arg6[%c1, %c0_40, %c0_41] : memref<2x32x32xf32, #tpu.memory_space<vmem>>, vector<1x32x32xf32>
    %56 = vector.shape_cast %55 : vector<1x32x32xf32> to vector<32x32xf32>
    %cst_42 = arith.constant dense<0.000000e+00> : vector<5x32xf32>
    %57 = tpu.matmul %54, %56, %cst_42 {dimension_numbers = #tpu.dot_dimension_numbers<[1], [0], [0], [1], [0, 0, 1, 1], [], []>} : vector<5x32xf32>, vector<32x32xf32>, vector<5x32xf32> -> vector<5x32xf32>
    %cst_43 = arith.constant dense<0.000000e+00> : vector<5x32xf32>
    %58 = tpu.matmul %24, %57, %cst_43 {dimension_numbers = #tpu.dot_dimension_numbers<[1], [0], [0], [1], [0, 0, 1, 1], [], []>} : vector<5x5xf32>, vector<5x32xf32>, vector<5x32xf32> -> vector<5x32xf32>
    %cst_44 = arith.constant dense<0.000000e+00> : vector<5xf32>
    %59 = vector.multi_reduction <add>, %58, %cst_44 [1] : vector<5x32xf32> to vector<5xf32>
    %60 = vector.shape_cast %59 : vector<5xf32> to vector<5x1xf32>
    %cst_45 = arith.constant 3.200000e+01 : f32
    %61 = vector.broadcast %cst_45 : f32 to vector<5x1xf32>
    %62 = arith.divf %60, %61 : vector<5x1xf32>
    %63 = vector.broadcast %62 : vector<5x1xf32> to vector<5x32xf32>
    %64 = arith.subf %58, %63 : vector<5x32xf32>
    %65 = arith.mulf %64, %64 : vector<5x32xf32>
    %cst_46 = arith.constant dense<0.000000e+00> : vector<5xf32>
    %66 = vector.multi_reduction <add>, %65, %cst_46 [1] : vector<5x32xf32> to vector<5xf32>
    %67 = vector.shape_cast %66 : vector<5xf32> to vector<5x1xf32>
    %cst_47 = arith.constant 3.200000e+01 : f32
    %68 = vector.broadcast %cst_47 : f32 to vector<5x1xf32>
    %69 = arith.divf %67, %68 : vector<5x1xf32>
    %cst_48 = arith.constant 9.99999974E-6 : f32
    %70 = vector.broadcast %cst_48 : f32 to vector<5x1xf32>
    %71 = arith.addf %69, %70 : vector<5x1xf32>
    %72 = math.rsqrt %71 : vector<5x1xf32>
    %73 = vector.broadcast %72 : vector<5x1xf32> to vector<5x32xf32>
    %74 = arith.mulf %64, %73 : vector<5x32xf32>
    %c1_49 = arith.constant 1 : index
    %c0_50 = arith.constant 0 : index
    %c0_51 = arith.constant 0 : index
    %75 = vector.load %arg7[%c1_49, %c0_50, %c0_51] : memref<2x1x32xf32, #tpu.memory_space<vmem>>, vector<1x1x32xf32>
    %76 = vector.shape_cast %75 : vector<1x1x32xf32> to vector<1x32xf32>
    %77 = vector.broadcast %76 : vector<1x32xf32> to vector<5x32xf32>
    %78 = arith.mulf %74, %77 : vector<5x32xf32>
    %c1_52 = arith.constant 1 : index
    %c0_53 = arith.constant 0 : index
    %c0_54 = arith.constant 0 : index
    %79 = vector.load %arg8[%c1_52, %c0_53, %c0_54] : memref<2x1x32xf32, #tpu.memory_space<vmem>>, vector<1x1x32xf32>
    %80 = vector.shape_cast %79 : vector<1x1x32xf32> to vector<1x32xf32>
    %81 = vector.broadcast %80 : vector<1x32xf32> to vector<5x32xf32>
    %82 = arith.addf %78, %81 : vector<5x32xf32>
    %cst_55 = arith.constant 0.000000e+00 : f32
    %83 = vector.broadcast %cst_55 : f32 to vector<5x32xf32>
    %84 = arith.maximumf %82, %83 : vector<5x32xf32>
    %cst_56 = arith.constant dense<0.000000e+00> : vector<32xf32>
    %85 = vector.multi_reduction <add>, %84, %cst_56 [0] : vector<5x32xf32> to vector<32xf32>
    %86 = vector.shape_cast %85 : vector<32xf32> to vector<1x32xf32>
    %cst_57 = arith.constant 5.000000e+00 : f32
    %87 = vector.broadcast %cst_57 : f32 to vector<1x32xf32>
    %88 = arith.divf %86, %87 : vector<1x32xf32>
    %c0_58 = arith.constant 0 : index
    %c0_59 = arith.constant 0 : index
    %89 = vector.load %arg24[%c0_58, %c0_59] : memref<6x32xf32, #tpu.memory_space<vmem>>, vector<1x32xf32>
    tpu.vector_store %arg24[%c0_58, %c0_59], %88 {strides = array<i32>} : memref<6x32xf32, #tpu.memory_space<vmem>>, vector<1x32xf32>,
    %c5 = arith.constant 5 : index
    %c0_60 = arith.constant 0 : index
    %90 = vector.load %arg0[%c5, %c0_60] : memref<30x32xf32, #tpu.memory_space<vmem>>, vector<5x32xf32>
    %c5_61 = arith.constant 5 : index
    %c0_62 = arith.constant 0 : index
    %91 = vector.load %arg22[%c5_61, %c0_62] : memref<30x32xf32, #tpu.memory_space<vmem>>, vector<5x32xf32>
    %c5_63 = arith.constant 5 : index
    %c0_64 = arith.constant 0 : index
    %92 = vector.load %arg23[%c5_63, %c0_64] : memref<30x32xf32, #tpu.memory_space<vmem>>, vector<5x32xf32>
    %cst_65 = arith.constant dense<0.000000e+00> : vector<5x5xf32>
    %93 = tpu.matmul %91, %92, %cst_65 {dimension_numbers = #tpu.dot_dimension_numbers<[1], [1], [0], [0], [0, 0, 1, 0], [], []>} : vector<5x32xf32>, vector<5x32xf32>, vector<5x5xf32> -> vector<5x5xf32>
    %94 = arith.mulf %93, %93 : vector<5x5xf32>
    %cst_66 = arith.constant dense<0.000000e+00> : vector<5xf32>
    %95 = vector.multi_reduction <add>, %94, %cst_66 [1] : vector<5x5xf32> to vector<5xf32>
    %96 = vector.shape_cast %95 : vector<5xf32> to vector<5x1xf32>
    %cst_67 = arith.constant 9.99999996E-13 : f32
    %97 = vector.broadcast %cst_67 : f32 to vector<5x1xf32>
    %98 = arith.maximumf %96, %97 : vector<5x1xf32>
    %99 = tpu.reciprocal %98 {approx = true} : vector<5x1xf32> -> vector<5x1xf32>
    %100 = vector.broadcast %99 : vector<5x1xf32> to vector<5x5xf32>
    %101 = arith.mulf %94, %100 : vector<5x5xf32>
    %c0_68 = arith.constant 0 : index
    %c0_69 = arith.constant 0 : index
    %c0_70 = arith.constant 0 : index
    %102 = vector.load %arg6[%c0_68, %c0_69, %c0_70] : memref<2x32x32xf32, #tpu.memory_space<vmem>>, vector<1x32x32xf32>
    %103 = vector.shape_cast %102 : vector<1x32x32xf32> to vector<32x32xf32>
    %cst_71 = arith.constant dense<0.000000e+00> : vector<5x32xf32>
    %104 = tpu.matmul %90, %103, %cst_71 {dimension_numbers = #tpu.dot_dimension_numbers<[1], [0], [0], [1], [0, 0, 1, 1], [], []>} : vector<5x32xf32>, vector<32x32xf32>, vector<5x32xf32> -> vector<5x32xf32>
    %cst_72 = arith.constant dense<0.000000e+00> : vector<5x32xf32>
    %105 = tpu.matmul %101, %104, %cst_72 {dimension_numbers = #tpu.dot_dimension_numbers<[1], [0], [0], [1], [0, 0, 1, 1], [], []>} : vector<5x5xf32>, vector<5x32xf32>, vector<5x32xf32> -> vector<5x32xf32>
    %cst_73 = arith.constant dense<0.000000e+00> : vector<5xf32>
    %106 = vector.multi_reduction <add>, %105, %cst_73 [1] : vector<5x32xf32> to vector<5xf32>
    %107 = vector.shape_cast %106 : vector<5xf32> to vector<5x1xf32>
    %cst_74 = arith.constant 3.200000e+01 : f32
    %108 = vector.broadcast %cst_74 : f32 to vector<5x1xf32>
    %109 = arith.divf %107, %108 : vector<5x1xf32>
    %110 = vector.broadcast %109 : vector<5x1xf32> to vector<5x32xf32>
    %111 = arith.subf %105, %110 : vector<5x32xf32>
    %112 = arith.mulf %111, %111 : vector<5x32xf32>
    %cst_75 = arith.constant dense<0.000000e+00> : vector<5xf32>
    %113 = vector.multi_reduction <add>, %112, %cst_75 [1] : vector<5x32xf32> to vector<5xf32>
    %114 = vector.shape_cast %113 : vector<5xf32> to vector<5x1xf32>
    %cst_76 = arith.constant 3.200000e+01 : f32
    %115 = vector.broadcast %cst_76 : f32 to vector<5x1xf32>
    %116 = arith.divf %114, %115 : vector<5x1xf32>
    %cst_77 = arith.constant 9.99999974E-6 : f32
    %117 = vector.broadcast %cst_77 : f32 to vector<5x1xf32>
    %118 = arith.addf %116, %117 : vector<5x1xf32>
    %119 = math.rsqrt %118 : vector<5x1xf32>
    %120 = vector.broadcast %119 : vector<5x1xf32> to vector<5x32xf32>
    %121 = arith.mulf %111, %120 : vector<5x32xf32>
    %c0_78 = arith.constant 0 : index
    %c0_79 = arith.constant 0 : index
    %c0_80 = arith.constant 0 : index
    %122 = vector.load %arg7[%c0_78, %c0_79, %c0_80] : memref<2x1x32xf32, #tpu.memory_space<vmem>>, vector<1x1x32xf32>
    %123 = vector.shape_cast %122 : vector<1x1x32xf32> to vector<1x32xf32>
    %124 = vector.broadcast %123 : vector<1x32xf32> to vector<5x32xf32>
    %125 = arith.mulf %121, %124 : vector<5x32xf32>
    %c0_81 = arith.constant 0 : index
    %c0_82 = arith.constant 0 : index
    %c0_83 = arith.constant 0 : index
    %126 = vector.load %arg8[%c0_81, %c0_82, %c0_83] : memref<2x1x32xf32, #tpu.memory_space<vmem>>, vector<1x1x32xf32>
    %127 = vector.shape_cast %126 : vector<1x1x32xf32> to vector<1x32xf32>
    %128 = vector.broadcast %127 : vector<1x32xf32> to vector<5x32xf32>
    %129 = arith.addf %125, %128 : vector<5x32xf32>
    %cst_84 = arith.constant 0.000000e+00 : f32
    %130 = vector.broadcast %cst_84 : f32 to vector<5x32xf32>
    %131 = arith.maximumf %129, %130 : vector<5x32xf32>
    %c1_85 = arith.constant 1 : index
    %c0_86 = arith.constant 0 : index
    %c0_87 = arith.constant 0 : index
    %132 = vector.load %arg6[%c1_85, %c0_86, %c0_87] : memref<2x32x32xf32, #tpu.memory_space<vmem>>, vector<1x32x32xf32>
    %133 = vector.shape_cast %132 : vector<1x32x32xf32> to vector<32x32xf32>
    %cst_88 = arith.constant dense<0.000000e+00> : vector<5x32xf32>
    %134 = tpu.matmul %131, %133, %cst_88 {dimension_numbers = #tpu.dot_dimension_numbers<[1], [0], [0], [1], [0, 0, 1, 1], [], []>} : vector<5x32xf32>, vector<32x32xf32>, vector<5x32xf32> -> vector<5x32xf32>
    %cst_89 = arith.constant dense<0.000000e+00> : vector<5x32xf32>
    %135 = tpu.matmul %101, %134, %cst_89 {dimension_numbers = #tpu.dot_dimension_numbers<[1], [0], [0], [1], [0, 0, 1, 1], [], []>} : vector<5x5xf32>, vector<5x32xf32>, vector<5x32xf32> -> vector<5x32xf32>
    %cst_90 = arith.constant dense<0.000000e+00> : vector<5xf32>
    %136 = vector.multi_reduction <add>, %135, %cst_90 [1] : vector<5x32xf32> to vector<5xf32>
    %137 = vector.shape_cast %136 : vector<5xf32> to vector<5x1xf32>
    %cst_91 = arith.constant 3.200000e+01 : f32
    %138 = vector.broadcast %cst_91 : f32 to vector<5x1xf32>
    %139 = arith.divf %137, %138 : vector<5x1xf32>
    %140 = vector.broadcast %139 : vector<5x1xf32> to vector<5x32xf32>
    %141 = arith.subf %135, %140 : vector<5x32xf32>
    %142 = arith.mulf %141, %141 : vector<5x32xf32>
    %cst_92 = arith.constant dense<0.000000e+00> : vector<5xf32>
    %143 = vector.multi_reduction <add>, %142, %cst_92 [1] : vector<5x32xf32> to vector<5xf32>
    %144 = vector.shape_cast %143 : vector<5xf32> to vector<5x1xf32>
    %cst_93 = arith.constant 3.200000e+01 : f32
    %145 = vector.broadcast %cst_93 : f32 to vector<5x1xf32>
    %146 = arith.divf %144, %145 : vector<5x1xf32>
    %cst_94 = arith.constant 9.99999974E-6 : f32
    %147 = vector.broadcast %cst_94 : f32 to vector<5x1xf32>
    %148 = arith.addf %146, %147 : vector<5x1xf32>
    %149 = math.rsqrt %148 : vector<5x1xf32>
    %150 = vector.broadcast %149 : vector<5x1xf32> to vector<5x32xf32>
    %151 = arith.mulf %141, %150 : vector<5x32xf32>
    %c1_95 = arith.constant 1 : index
    %c0_96 = arith.constant 0 : index
    %c0_97 = arith.constant 0 : index
    %152 = vector.load %arg7[%c1_95, %c0_96, %c0_97] : memref<2x1x32xf32, #tpu.memory_space<vmem>>, vector<1x1x32xf32>
    %153 = vector.shape_cast %152 : vector<1x1x32xf32> to vector<1x32xf32>
    %154 = vector.broadcast %153 : vector<1x32xf32> to vector<5x32xf32>
    %155 = arith.mulf %151, %154 : vector<5x32xf32>
    %c1_98 = arith.constant 1 : index
    %c0_99 = arith.constant 0 : index
    %c0_100 = arith.constant 0 : index
    %156 = vector.load %arg8[%c1_98, %c0_99, %c0_100] : memref<2x1x32xf32, #tpu.memory_space<vmem>>, vector<1x1x32xf32>
    %157 = vector.shape_cast %156 : vector<1x1x32xf32> to vector<1x32xf32>
    %158 = vector.broadcast %157 : vector<1x32xf32> to vector<5x32xf32>
    %159 = arith.addf %155, %158 : vector<5x32xf32>
    %cst_101 = arith.constant 0.000000e+00 : f32
    %160 = vector.broadcast %cst_101 : f32 to vector<5x32xf32>
    %161 = arith.maximumf %159, %160 : vector<5x32xf32>
    %cst_102 = arith.constant dense<0.000000e+00> : vector<32xf32>
    %162 = vector.multi_reduction <add>, %161, %cst_102 [0] : vector<5x32xf32> to vector<32xf32>
    %163 = vector.shape_cast %162 : vector<32xf32> to vector<1x32xf32>
    %cst_103 = arith.constant 5.000000e+00 : f32
    %164 = vector.broadcast %cst_103 : f32 to vector<1x32xf32>
    %165 = arith.divf %163, %164 : vector<1x32xf32>
    %c1_104 = arith.constant 1 : index
    %c0_105 = arith.constant 0 : index
    %166 = vector.load %arg24[%c1_104, %c0_105] : memref<6x32xf32, #tpu.memory_space<vmem>>, vector<1x32xf32>
    tpu.vector_store %arg24[%c1_104, %c0_105], %165 {strides = array<i32>} : memref<6x32xf32, #tpu.memory_space<vmem>>, vector<1x32xf32>,
    %c10 = arith.constant 10 : index
    %c0_106 = arith.constant 0 : index
    %167 = vector.load %arg0[%c10, %c0_106] : memref<30x32xf32, #tpu.memory_space<vmem>>, vector<5x32xf32>
    %c10_107 = arith.constant 10 : index
    %c0_108 = arith.constant 0 : index
    %168 = vector.load %arg22[%c10_107, %c0_108] : memref<30x32xf32, #tpu.memory_space<vmem>>, vector<5x32xf32>
    %c10_109 = arith.constant 10 : index
    %c0_110 = arith.constant 0 : index
    %169 = vector.load %arg23[%c10_109, %c0_110] : memref<30x32xf32, #tpu.memory_space<vmem>>, vector<5x32xf32>
    %cst_111 = arith.constant dense<0.000000e+00> : vector<5x5xf32>
    %170 = tpu.matmul %168, %169, %cst_111 {dimension_numbers = #tpu.dot_dimension_numbers<[1], [1], [0], [0], [0, 0, 1, 0], [], []>} : vector<5x32xf32>, vector<5x32xf32>, vector<5x5xf32> -> vector<5x5xf32>
    %171 = arith.mulf %170, %170 : vector<5x5xf32>
    %cst_112 = arith.constant dense<0.000000e+00> : vector<5xf32>
    %172 = vector.multi_reduction <add>, %171, %cst_112 [1] : vector<5x5xf32> to vector<5xf32>
    %173 = vector.shape_cast %172 : vector<5xf32> to vector<5x1xf32>
    %cst_113 = arith.constant 9.99999996E-13 : f32
    %174 = vector.broadcast %cst_113 : f32 to vector<5x1xf32>
    %175 = arith.maximumf %173, %174 : vector<5x1xf32>
    %176 = tpu.reciprocal %175 {approx = true} : vector<5x1xf32> -> vector<5x1xf32>
    %177 = vector.broadcast %176 : vector<5x1xf32> to vector<5x5xf32>
    %178 = arith.mulf %171, %177 : vector<5x5xf32>
    %c0_114 = arith.constant 0 : index
    %c0_115 = arith.constant 0 : index
    %c0_116 = arith.constant 0 : index
    %179 = vector.load %arg6[%c0_114, %c0_115, %c0_116] : memref<2x32x32xf32, #tpu.memory_space<vmem>>, vector<1x32x32xf32>
    %180 = vector.shape_cast %179 : vector<1x32x32xf32> to vector<32x32xf32>
    %cst_117 = arith.constant dense<0.000000e+00> : vector<5x32xf32>
    %181 = tpu.matmul %167, %180, %cst_117 {dimension_numbers = #tpu.dot_dimension_numbers<[1], [0], [0], [1], [0, 0, 1, 1], [], []>} : vector<5x32xf32>, vector<32x32xf32>, vector<5x32xf32> -> vector<5x32xf32>
    %cst_118 = arith.constant dense<0.000000e+00> : vector<5x32xf32>
    %182 = tpu.matmul %178, %181, %cst_118 {dimension_numbers = #tpu.dot_dimension_numbers<[1], [0], [0], [1], [0, 0, 1, 1], [], []>} : vector<5x5xf32>, vector<5x32xf32>, vector<5x32xf32> -> vector<5x32xf32>
    %cst_119 = arith.constant dense<0.000000e+00> : vector<5xf32>
    %183 = vector.multi_reduction <add>, %182, %cst_119 [1] : vector<5x32xf32> to vector<5xf32>
    %184 = vector.shape_cast %183 : vector<5xf32> to vector<5x1xf32>
    %cst_120 = arith.constant 3.200000e+01 : f32
    %185 = vector.broadcast %cst_120 : f32 to vector<5x1xf32>
    %186 = arith.divf %184, %185 : vector<5x1xf32>
    %187 = vector.broadcast %186 : vector<5x1xf32> to vector<5x32xf32>
    %188 = arith.subf %182, %187 : vector<5x32xf32>
    %189 = arith.mulf %188, %188 : vector<5x32xf32>
    %cst_121 = arith.constant dense<0.000000e+00> : vector<5xf32>
    %190 = vector.multi_reduction <add>, %189, %cst_121 [1] : vector<5x32xf32> to vector<5xf32>
    %191 = vector.shape_cast %190 : vector<5xf32> to vector<5x1xf32>
    %cst_122 = arith.constant 3.200000e+01 : f32
    %192 = vector.broadcast %cst_122 : f32 to vector<5x1xf32>
    %193 = arith.divf %191, %192 : vector<5x1xf32>
    %cst_123 = arith.constant 9.99999974E-6 : f32
    %194 = vector.broadcast %cst_123 : f32 to vector<5x1xf32>
    %195 = arith.addf %193, %194 : vector<5x1xf32>
    %196 = math.rsqrt %195 : vector<5x1xf32>
    %197 = vector.broadcast %196 : vector<5x1xf32> to vector<5x32xf32>
    %198 = arith.mulf %188, %197 : vector<5x32xf32>
    %c0_124 = arith.constant 0 : index
    %c0_125 = arith.constant 0 : index
    %c0_126 = arith.constant 0 : index
    %199 = vector.load %arg7[%c0_124, %c0_125, %c0_126] : memref<2x1x32xf32, #tpu.memory_space<vmem>>, vector<1x1x32xf32>
    %200 = vector.shape_cast %199 : vector<1x1x32xf32> to vector<1x32xf32>
    %201 = vector.broadcast %200 : vector<1x32xf32> to vector<5x32xf32>
    %202 = arith.mulf %198, %201 : vector<5x32xf32>
    %c0_127 = arith.constant 0 : index
    %c0_128 = arith.constant 0 : index
    %c0_129 = arith.constant 0 : index
    %203 = vector.load %arg8[%c0_127, %c0_128, %c0_129] : memref<2x1x32xf32, #tpu.memory_space<vmem>>, vector<1x1x32xf32>
    %204 = vector.shape_cast %203 : vector<1x1x32xf32> to vector<1x32xf32>
    %205 = vector.broadcast %204 : vector<1x32xf32> to vector<5x32xf32>
    %206 = arith.addf %202, %205 : vector<5x32xf32>
    %cst_130 = arith.constant 0.000000e+00 : f32
    %207 = vector.broadcast %cst_130 : f32 to vector<5x32xf32>
    %208 = arith.maximumf %206, %207 : vector<5x32xf32>
    %c1_131 = arith.constant 1 : index
    %c0_132 = arith.constant 0 : index
    %c0_133 = arith.constant 0 : index
    %209 = vector.load %arg6[%c1_131, %c0_132, %c0_133] : memref<2x32x32xf32, #tpu.memory_space<vmem>>, vector<1x32x32xf32>
    %210 = vector.shape_cast %209 : vector<1x32x32xf32> to vector<32x32xf32>
    %cst_134 = arith.constant dense<0.000000e+00> : vector<5x32xf32>
    %211 = tpu.matmul %208, %210, %cst_134 {dimension_numbers = #tpu.dot_dimension_numbers<[1], [0], [0], [1], [0, 0, 1, 1], [], []>} : vector<5x32xf32>, vector<32x32xf32>, vector<5x32xf32> -> vector<5x32xf32>
    %cst_135 = arith.constant dense<0.000000e+00> : vector<5x32xf32>
    %212 = tpu.matmul %178, %211, %cst_135 {dimension_numbers = #tpu.dot_dimension_numbers<[1], [0], [0], [1], [0, 0, 1, 1], [], []>} : vector<5x5xf32>, vector<5x32xf32>, vector<5x32xf32> -> vector<5x32xf32>
    %cst_136 = arith.constant dense<0.000000e+00> : vector<5xf32>
    %213 = vector.multi_reduction <add>, %212, %cst_136 [1] : vector<5x32xf32> to vector<5xf32>
    %214 = vector.shape_cast %213 : vector<5xf32> to vector<5x1xf32>
    %cst_137 = arith.constant 3.200000e+01 : f32
    %215 = vector.broadcast %cst_137 : f32 to vector<5x1xf32>
    %216 = arith.divf %214, %215 : vector<5x1xf32>
    %217 = vector.broadcast %216 : vector<5x1xf32> to vector<5x32xf32>
    %218 = arith.subf %212, %217 : vector<5x32xf32>
    %219 = arith.mulf %218, %218 : vector<5x32xf32>
    %cst_138 = arith.constant dense<0.000000e+00> : vector<5xf32>
    %220 = vector.multi_reduction <add>, %219, %cst_138 [1] : vector<5x32xf32> to vector<5xf32>
    %221 = vector.shape_cast %220 : vector<5xf32> to vector<5x1xf32>
    %cst_139 = arith.constant 3.200000e+01 : f32
    %222 = vector.broadcast %cst_139 : f32 to vector<5x1xf32>
    %223 = arith.divf %221, %222 : vector<5x1xf32>
    %cst_140 = arith.constant 9.99999974E-6 : f32
    %224 = vector.broadcast %cst_140 : f32 to vector<5x1xf32>
    %225 = arith.addf %223, %224 : vector<5x1xf32>
    %226 = math.rsqrt %225 : vector<5x1xf32>
    %227 = vector.broadcast %226 : vector<5x1xf32> to vector<5x32xf32>
    %228 = arith.mulf %218, %227 : vector<5x32xf32>
    %c1_141 = arith.constant 1 : index
    %c0_142 = arith.constant 0 : index
    %c0_143 = arith.constant 0 : index
    %229 = vector.load %arg7[%c1_141, %c0_142, %c0_143] : memref<2x1x32xf32, #tpu.memory_space<vmem>>, vector<1x1x32xf32>
    %230 = vector.shape_cast %229 : vector<1x1x32xf32> to vector<1x32xf32>
    %231 = vector.broadcast %230 : vector<1x32xf32> to vector<5x32xf32>
    %232 = arith.mulf %228, %231 : vector<5x32xf32>
    %c1_144 = arith.constant 1 : index
    %c0_145 = arith.constant 0 : index
    %c0_146 = arith.constant 0 : index
    %233 = vector.load %arg8[%c1_144, %c0_145, %c0_146] : memref<2x1x32xf32, #tpu.memory_space<vmem>>, vector<1x1x32xf32>
    %234 = vector.shape_cast %233 : vector<1x1x32xf32> to vector<1x32xf32>
    %235 = vector.broadcast %234 : vector<1x32xf32> to vector<5x32xf32>
    %236 = arith.addf %232, %235 : vector<5x32xf32>
    %cst_147 = arith.constant 0.000000e+00 : f32
    %237 = vector.broadcast %cst_147 : f32 to vector<5x32xf32>
    %238 = arith.maximumf %236, %237 : vector<5x32xf32>
    %cst_148 = arith.constant dense<0.000000e+00> : vector<32xf32>
    %239 = vector.multi_reduction <add>, %238, %cst_148 [0] : vector<5x32xf32> to vector<32xf32>
    %240 = vector.shape_cast %239 : vector<32xf32> to vector<1x32xf32>
    %cst_149 = arith.constant 5.000000e+00 : f32
    %241 = vector.broadcast %cst_149 : f32 to vector<1x32xf32>
    %242 = arith.divf %240, %241 : vector<1x32xf32>
    %c2 = arith.constant 2 : index
    %c0_150 = arith.constant 0 : index
    %243 = vector.load %arg24[%c2, %c0_150] : memref<6x32xf32, #tpu.memory_space<vmem>>, vector<1x32xf32>
    tpu.vector_store %arg24[%c2, %c0_150], %242 {strides = array<i32>} : memref<6x32xf32, #tpu.memory_space<vmem>>, vector<1x32xf32>,
    %c15 = arith.constant 15 : index
    %c0_151 = arith.constant 0 : index
    %244 = vector.load %arg0[%c15, %c0_151] : memref<30x32xf32, #tpu.memory_space<vmem>>, vector<5x32xf32>
    %c15_152 = arith.constant 15 : index
    %c0_153 = arith.constant 0 : index
    %245 = vector.load %arg22[%c15_152, %c0_153] : memref<30x32xf32, #tpu.memory_space<vmem>>, vector<5x32xf32>
    %c15_154 = arith.constant 15 : index
    %c0_155 = arith.constant 0 : index
    %246 = vector.load %arg23[%c15_154, %c0_155] : memref<30x32xf32, #tpu.memory_space<vmem>>, vector<5x32xf32>
    %cst_156 = arith.constant dense<0.000000e+00> : vector<5x5xf32>
    %247 = tpu.matmul %245, %246, %cst_156 {dimension_numbers = #tpu.dot_dimension_numbers<[1], [1], [0], [0], [0, 0, 1, 0], [], []>} : vector<5x32xf32>, vector<5x32xf32>, vector<5x5xf32> -> vector<5x5xf32>
    %248 = arith.mulf %247, %247 : vector<5x5xf32>
    %cst_157 = arith.constant dense<0.000000e+00> : vector<5xf32>
    %249 = vector.multi_reduction <add>, %248, %cst_157 [1] : vector<5x5xf32> to vector<5xf32>
    %250 = vector.shape_cast %249 : vector<5xf32> to vector<5x1xf32>
    %cst_158 = arith.constant 9.99999996E-13 : f32
    %251 = vector.broadcast %cst_158 : f32 to vector<5x1xf32>
    %252 = arith.maximumf %250, %251 : vector<5x1xf32>
    %253 = tpu.reciprocal %252 {approx = true} : vector<5x1xf32> -> vector<5x1xf32>
    %254 = vector.broadcast %253 : vector<5x1xf32> to vector<5x5xf32>
    %255 = arith.mulf %248, %254 : vector<5x5xf32>
    %c0_159 = arith.constant 0 : index
    %c0_160 = arith.constant 0 : index
    %c0_161 = arith.constant 0 : index
    %256 = vector.load %arg6[%c0_159, %c0_160, %c0_161] : memref<2x32x32xf32, #tpu.memory_space<vmem>>, vector<1x32x32xf32>
    %257 = vector.shape_cast %256 : vector<1x32x32xf32> to vector<32x32xf32>
    %cst_162 = arith.constant dense<0.000000e+00> : vector<5x32xf32>
    %258 = tpu.matmul %244, %257, %cst_162 {dimension_numbers = #tpu.dot_dimension_numbers<[1], [0], [0], [1], [0, 0, 1, 1], [], []>} : vector<5x32xf32>, vector<32x32xf32>, vector<5x32xf32> -> vector<5x32xf32>
    %cst_163 = arith.constant dense<0.000000e+00> : vector<5x32xf32>
    %259 = tpu.matmul %255, %258, %cst_163 {dimension_numbers = #tpu.dot_dimension_numbers<[1], [0], [0], [1], [0, 0, 1, 1], [], []>} : vector<5x5xf32>, vector<5x32xf32>, vector<5x32xf32> -> vector<5x32xf32>
    %cst_164 = arith.constant dense<0.000000e+00> : vector<5xf32>
    %260 = vector.multi_reduction <add>, %259, %cst_164 [1] : vector<5x32xf32> to vector<5xf32>
    %261 = vector.shape_cast %260 : vector<5xf32> to vector<5x1xf32>
    %cst_165 = arith.constant 3.200000e+01 : f32
    %262 = vector.broadcast %cst_165 : f32 to vector<5x1xf32>
    %263 = arith.divf %261, %262 : vector<5x1xf32>
    %264 = vector.broadcast %263 : vector<5x1xf32> to vector<5x32xf32>
    %265 = arith.subf %259, %264 : vector<5x32xf32>
    %266 = arith.mulf %265, %265 : vector<5x32xf32>
    %cst_166 = arith.constant dense<0.000000e+00> : vector<5xf32>
    %267 = vector.multi_reduction <add>, %266, %cst_166 [1] : vector<5x32xf32> to vector<5xf32>
    %268 = vector.shape_cast %267 : vector<5xf32> to vector<5x1xf32>
    %cst_167 = arith.constant 3.200000e+01 : f32
    %269 = vector.broadcast %cst_167 : f32 to vector<5x1xf32>
    %270 = arith.divf %268, %269 : vector<5x1xf32>
    %cst_168 = arith.constant 9.99999974E-6 : f32
    %271 = vector.broadcast %cst_168 : f32 to vector<5x1xf32>
    %272 = arith.addf %270, %271 : vector<5x1xf32>
    %273 = math.rsqrt %272 : vector<5x1xf32>
    %274 = vector.broadcast %273 : vector<5x1xf32> to vector<5x32xf32>
    %275 = arith.mulf %265, %274 : vector<5x32xf32>
    %c0_169 = arith.constant 0 : index
    %c0_170 = arith.constant 0 : index
    %c0_171 = arith.constant 0 : index
    %276 = vector.load %arg7[%c0_169, %c0_170, %c0_171] : memref<2x1x32xf32, #tpu.memory_space<vmem>>, vector<1x1x32xf32>
    %277 = vector.shape_cast %276 : vector<1x1x32xf32> to vector<1x32xf32>
    %278 = vector.broadcast %277 : vector<1x32xf32> to vector<5x32xf32>
    %279 = arith.mulf %275, %278 : vector<5x32xf32>
    %c0_172 = arith.constant 0 : index
    %c0_173 = arith.constant 0 : index
    %c0_174 = arith.constant 0 : index
    %280 = vector.load %arg8[%c0_172, %c0_173, %c0_174] : memref<2x1x32xf32, #tpu.memory_space<vmem>>, vector<1x1x32xf32>
    %281 = vector.shape_cast %280 : vector<1x1x32xf32> to vector<1x32xf32>
    %282 = vector.broadcast %281 : vector<1x32xf32> to vector<5x32xf32>
    %283 = arith.addf %279, %282 : vector<5x32xf32>
    %cst_175 = arith.constant 0.000000e+00 : f32
    %284 = vector.broadcast %cst_175 : f32 to vector<5x32xf32>
    %285 = arith.maximumf %283, %284 : vector<5x32xf32>
    %c1_176 = arith.constant 1 : index
    %c0_177 = arith.constant 0 : index
    %c0_178 = arith.constant 0 : index
    %286 = vector.load %arg6[%c1_176, %c0_177, %c0_178] : memref<2x32x32xf32, #tpu.memory_space<vmem>>, vector<1x32x32xf32>
    %287 = vector.shape_cast %286 : vector<1x32x32xf32> to vector<32x32xf32>
    %cst_179 = arith.constant dense<0.000000e+00> : vector<5x32xf32>
    %288 = tpu.matmul %285, %287, %cst_179 {dimension_numbers = #tpu.dot_dimension_numbers<[1], [0], [0], [1], [0, 0, 1, 1], [], []>} : vector<5x32xf32>, vector<32x32xf32>, vector<5x32xf32> -> vector<5x32xf32>
    %cst_180 = arith.constant dense<0.000000e+00> : vector<5x32xf32>
    %289 = tpu.matmul %255, %288, %cst_180 {dimension_numbers = #tpu.dot_dimension_numbers<[1], [0], [0], [1], [0, 0, 1, 1], [], []>} : vector<5x5xf32>, vector<5x32xf32>, vector<5x32xf32> -> vector<5x32xf32>
    %cst_181 = arith.constant dense<0.000000e+00> : vector<5xf32>
    %290 = vector.multi_reduction <add>, %289, %cst_181 [1] : vector<5x32xf32> to vector<5xf32>
    %291 = vector.shape_cast %290 : vector<5xf32> to vector<5x1xf32>
    %cst_182 = arith.constant 3.200000e+01 : f32
    %292 = vector.broadcast %cst_182 : f32 to vector<5x1xf32>
    %293 = arith.divf %291, %292 : vector<5x1xf32>
    %294 = vector.broadcast %293 : vector<5x1xf32> to vector<5x32xf32>
    %295 = arith.subf %289, %294 : vector<5x32xf32>
    %296 = arith.mulf %295, %295 : vector<5x32xf32>
    %cst_183 = arith.constant dense<0.000000e+00> : vector<5xf32>
    %297 = vector.multi_reduction <add>, %296, %cst_183 [1] : vector<5x32xf32> to vector<5xf32>
    %298 = vector.shape_cast %297 : vector<5xf32> to vector<5x1xf32>
    %cst_184 = arith.constant 3.200000e+01 : f32
    %299 = vector.broadcast %cst_184 : f32 to vector<5x1xf32>
    %300 = arith.divf %298, %299 : vector<5x1xf32>
    %cst_185 = arith.constant 9.99999974E-6 : f32
    %301 = vector.broadcast %cst_185 : f32 to vector<5x1xf32>
    %302 = arith.addf %300, %301 : vector<5x1xf32>
    %303 = math.rsqrt %302 : vector<5x1xf32>
    %304 = vector.broadcast %303 : vector<5x1xf32> to vector<5x32xf32>
    %305 = arith.mulf %295, %304 : vector<5x32xf32>
    %c1_186 = arith.constant 1 : index
    %c0_187 = arith.constant 0 : index
    %c0_188 = arith.constant 0 : index
    %306 = vector.load %arg7[%c1_186, %c0_187, %c0_188] : memref<2x1x32xf32, #tpu.memory_space<vmem>>, vector<1x1x32xf32>
    %307 = vector.shape_cast %306 : vector<1x1x32xf32> to vector<1x32xf32>
    %308 = vector.broadcast %307 : vector<1x32xf32> to vector<5x32xf32>
    %309 = arith.mulf %305, %308 : vector<5x32xf32>
    %c1_189 = arith.constant 1 : index
    %c0_190 = arith.constant 0 : index
    %c0_191 = arith.constant 0 : index
    %310 = vector.load %arg8[%c1_189, %c0_190, %c0_191] : memref<2x1x32xf32, #tpu.memory_space<vmem>>, vector<1x1x32xf32>
    %311 = vector.shape_cast %310 : vector<1x1x32xf32> to vector<1x32xf32>
    %312 = vector.broadcast %311 : vector<1x32xf32> to vector<5x32xf32>
    %313 = arith.addf %309, %312 : vector<5x32xf32>
    %cst_192 = arith.constant 0.000000e+00 : f32
    %314 = vector.broadcast %cst_192 : f32 to vector<5x32xf32>
    %315 = arith.maximumf %313, %314 : vector<5x32xf32>
    %cst_193 = arith.constant dense<0.000000e+00> : vector<32xf32>
    %316 = vector.multi_reduction <add>, %315, %cst_193 [0] : vector<5x32xf32> to vector<32xf32>
    %317 = vector.shape_cast %316 : vector<32xf32> to vector<1x32xf32>
    %cst_194 = arith.constant 5.000000e+00 : f32
    %318 = vector.broadcast %cst_194 : f32 to vector<1x32xf32>
    %319 = arith.divf %317, %318 : vector<1x32xf32>
    %c3 = arith.constant 3 : index
    %c0_195 = arith.constant 0 : index
    %320 = vector.load %arg24[%c3, %c0_195] : memref<6x32xf32, #tpu.memory_space<vmem>>, vector<1x32xf32>
    tpu.vector_store %arg24[%c3, %c0_195], %319 {strides = array<i32>} : memref<6x32xf32, #tpu.memory_space<vmem>>, vector<1x32xf32>,
    %c20 = arith.constant 20 : index
    %c0_196 = arith.constant 0 : index
    %321 = vector.load %arg0[%c20, %c0_196] : memref<30x32xf32, #tpu.memory_space<vmem>>, vector<5x32xf32>
    %c20_197 = arith.constant 20 : index
    %c0_198 = arith.constant 0 : index
    %322 = vector.load %arg22[%c20_197, %c0_198] : memref<30x32xf32, #tpu.memory_space<vmem>>, vector<5x32xf32>
    %c20_199 = arith.constant 20 : index
    %c0_200 = arith.constant 0 : index
    %323 = vector.load %arg23[%c20_199, %c0_200] : memref<30x32xf32, #tpu.memory_space<vmem>>, vector<5x32xf32>
    %cst_201 = arith.constant dense<0.000000e+00> : vector<5x5xf32>
    %324 = tpu.matmul %322, %323, %cst_201 {dimension_numbers = #tpu.dot_dimension_numbers<[1], [1], [0], [0], [0, 0, 1, 0], [], []>} : vector<5x32xf32>, vector<5x32xf32>, vector<5x5xf32> -> vector<5x5xf32>
    %325 = arith.mulf %324, %324 : vector<5x5xf32>
    %cst_202 = arith.constant dense<0.000000e+00> : vector<5xf32>
    %326 = vector.multi_reduction <add>, %325, %cst_202 [1] : vector<5x5xf32> to vector<5xf32>
    %327 = vector.shape_cast %326 : vector<5xf32> to vector<5x1xf32>
    %cst_203 = arith.constant 9.99999996E-13 : f32
    %328 = vector.broadcast %cst_203 : f32 to vector<5x1xf32>
    %329 = arith.maximumf %327, %328 : vector<5x1xf32>
    %330 = tpu.reciprocal %329 {approx = true} : vector<5x1xf32> -> vector<5x1xf32>
    %331 = vector.broadcast %330 : vector<5x1xf32> to vector<5x5xf32>
    %332 = arith.mulf %325, %331 : vector<5x5xf32>
    %c0_204 = arith.constant 0 : index
    %c0_205 = arith.constant 0 : index
    %c0_206 = arith.constant 0 : index
    %333 = vector.load %arg6[%c0_204, %c0_205, %c0_206] : memref<2x32x32xf32, #tpu.memory_space<vmem>>, vector<1x32x32xf32>
    %334 = vector.shape_cast %333 : vector<1x32x32xf32> to vector<32x32xf32>
    %cst_207 = arith.constant dense<0.000000e+00> : vector<5x32xf32>
    %335 = tpu.matmul %321, %334, %cst_207 {dimension_numbers = #tpu.dot_dimension_numbers<[1], [0], [0], [1], [0, 0, 1, 1], [], []>} : vector<5x32xf32>, vector<32x32xf32>, vector<5x32xf32> -> vector<5x32xf32>
    %cst_208 = arith.constant dense<0.000000e+00> : vector<5x32xf32>
    %336 = tpu.matmul %332, %335, %cst_208 {dimension_numbers = #tpu.dot_dimension_numbers<[1], [0], [0], [1], [0, 0, 1, 1], [], []>} : vector<5x5xf32>, vector<5x32xf32>, vector<5x32xf32> -> vector<5x32xf32>
    %cst_209 = arith.constant dense<0.000000e+00> : vector<5xf32>
    %337 = vector.multi_reduction <add>, %336, %cst_209 [1] : vector<5x32xf32> to vector<5xf32>
    %338 = vector.shape_cast %337 : vector<5xf32> to vector<5x1xf32>
    %cst_210 = arith.constant 3.200000e+01 : f32
    %339 = vector.broadcast %cst_210 : f32 to vector<5x1xf32>
    %340 = arith.divf %338, %339 : vector<5x1xf32>
    %341 = vector.broadcast %340 : vector<5x1xf32> to vector<5x32xf32>
    %342 = arith.subf %336, %341 : vector<5x32xf32>
    %343 = arith.mulf %342, %342 : vector<5x32xf32>
    %cst_211 = arith.constant dense<0.000000e+00> : vector<5xf32>
    %344 = vector.multi_reduction <add>, %343, %cst_211 [1] : vector<5x32xf32> to vector<5xf32>
    %345 = vector.shape_cast %344 : vector<5xf32> to vector<5x1xf32>
    %cst_212 = arith.constant 3.200000e+01 : f32
    %346 = vector.broadcast %cst_212 : f32 to vector<5x1xf32>
    %347 = arith.divf %345, %346 : vector<5x1xf32>
    %cst_213 = arith.constant 9.99999974E-6 : f32
    %348 = vector.broadcast %cst_213 : f32 to vector<5x1xf32>
    %349 = arith.addf %347, %348 : vector<5x1xf32>
    %350 = math.rsqrt %349 : vector<5x1xf32>
    %351 = vector.broadcast %350 : vector<5x1xf32> to vector<5x32xf32>
    %352 = arith.mulf %342, %351 : vector<5x32xf32>
    %c0_214 = arith.constant 0 : index
    %c0_215 = arith.constant 0 : index
    %c0_216 = arith.constant 0 : index
    %353 = vector.load %arg7[%c0_214, %c0_215, %c0_216] : memref<2x1x32xf32, #tpu.memory_space<vmem>>, vector<1x1x32xf32>
    %354 = vector.shape_cast %353 : vector<1x1x32xf32> to vector<1x32xf32>
    %355 = vector.broadcast %354 : vector<1x32xf32> to vector<5x32xf32>
    %356 = arith.mulf %352, %355 : vector<5x32xf32>
    %c0_217 = arith.constant 0 : index
    %c0_218 = arith.constant 0 : index
    %c0_219 = arith.constant 0 : index
    %357 = vector.load %arg8[%c0_217, %c0_218, %c0_219] : memref<2x1x32xf32, #tpu.memory_space<vmem>>, vector<1x1x32xf32>
    %358 = vector.shape_cast %357 : vector<1x1x32xf32> to vector<1x32xf32>
    %359 = vector.broadcast %358 : vector<1x32xf32> to vector<5x32xf32>
    %360 = arith.addf %356, %359 : vector<5x32xf32>
    %cst_220 = arith.constant 0.000000e+00 : f32
    %361 = vector.broadcast %cst_220 : f32 to vector<5x32xf32>
    %362 = arith.maximumf %360, %361 : vector<5x32xf32>
    %c1_221 = arith.constant 1 : index
    %c0_222 = arith.constant 0 : index
    %c0_223 = arith.constant 0 : index
    %363 = vector.load %arg6[%c1_221, %c0_222, %c0_223] : memref<2x32x32xf32, #tpu.memory_space<vmem>>, vector<1x32x32xf32>
    %364 = vector.shape_cast %363 : vector<1x32x32xf32> to vector<32x32xf32>
    %cst_224 = arith.constant dense<0.000000e+00> : vector<5x32xf32>
    %365 = tpu.matmul %362, %364, %cst_224 {dimension_numbers = #tpu.dot_dimension_numbers<[1], [0], [0], [1], [0, 0, 1, 1], [], []>} : vector<5x32xf32>, vector<32x32xf32>, vector<5x32xf32> -> vector<5x32xf32>
    %cst_225 = arith.constant dense<0.000000e+00> : vector<5x32xf32>
    %366 = tpu.matmul %332, %365, %cst_225 {dimension_numbers = #tpu.dot_dimension_numbers<[1], [0], [0], [1], [0, 0, 1, 1], [], []>} : vector<5x5xf32>, vector<5x32xf32>, vector<5x32xf32> -> vector<5x32xf32>
    %cst_226 = arith.constant dense<0.000000e+00> : vector<5xf32>
    %367 = vector.multi_reduction <add>, %366, %cst_226 [1] : vector<5x32xf32> to vector<5xf32>
    %368 = vector.shape_cast %367 : vector<5xf32> to vector<5x1xf32>
    %cst_227 = arith.constant 3.200000e+01 : f32
    %369 = vector.broadcast %cst_227 : f32 to vector<5x1xf32>
    %370 = arith.divf %368, %369 : vector<5x1xf32>
    %371 = vector.broadcast %370 : vector<5x1xf32> to vector<5x32xf32>
    %372 = arith.subf %366, %371 : vector<5x32xf32>
    %373 = arith.mulf %372, %372 : vector<5x32xf32>
    %cst_228 = arith.constant dense<0.000000e+00> : vector<5xf32>
    %374 = vector.multi_reduction <add>, %373, %cst_228 [1] : vector<5x32xf32> to vector<5xf32>
    %375 = vector.shape_cast %374 : vector<5xf32> to vector<5x1xf32>
    %cst_229 = arith.constant 3.200000e+01 : f32
    %376 = vector.broadcast %cst_229 : f32 to vector<5x1xf32>
    %377 = arith.divf %375, %376 : vector<5x1xf32>
    %cst_230 = arith.constant 9.99999974E-6 : f32
    %378 = vector.broadcast %cst_230 : f32 to vector<5x1xf32>
    %379 = arith.addf %377, %378 : vector<5x1xf32>
    %380 = math.rsqrt %379 : vector<5x1xf32>
    %381 = vector.broadcast %380 : vector<5x1xf32> to vector<5x32xf32>
    %382 = arith.mulf %372, %381 : vector<5x32xf32>
    %c1_231 = arith.constant 1 : index
    %c0_232 = arith.constant 0 : index
    %c0_233 = arith.constant 0 : index
    %383 = vector.load %arg7[%c1_231, %c0_232, %c0_233] : memref<2x1x32xf32, #tpu.memory_space<vmem>>, vector<1x1x32xf32>
    %384 = vector.shape_cast %383 : vector<1x1x32xf32> to vector<1x32xf32>
    %385 = vector.broadcast %384 : vector<1x32xf32> to vector<5x32xf32>
    %386 = arith.mulf %382, %385 : vector<5x32xf32>
    %c1_234 = arith.constant 1 : index
    %c0_235 = arith.constant 0 : index
    %c0_236 = arith.constant 0 : index
    %387 = vector.load %arg8[%c1_234, %c0_235, %c0_236] : memref<2x1x32xf32, #tpu.memory_space<vmem>>, vector<1x1x32xf32>
    %388 = vector.shape_cast %387 : vector<1x1x32xf32> to vector<1x32xf32>
    %389 = vector.broadcast %388 : vector<1x32xf32> to vector<5x32xf32>
    %390 = arith.addf %386, %389 : vector<5x32xf32>
    %cst_237 = arith.constant 0.000000e+00 : f32
    %391 = vector.broadcast %cst_237 : f32 to vector<5x32xf32>
    %392 = arith.maximumf %390, %391 : vector<5x32xf32>
    %cst_238 = arith.constant dense<0.000000e+00> : vector<32xf32>
    %393 = vector.multi_reduction <add>, %392, %cst_238 [0] : vector<5x32xf32> to vector<32xf32>
    %394 = vector.shape_cast %393 : vector<32xf32> to vector<1x32xf32>
    %cst_239 = arith.constant 5.000000e+00 : f32
    %395 = vector.broadcast %cst_239 : f32 to vector<1x32xf32>
    %396 = arith.divf %394, %395 : vector<1x32xf32>
    %c4 = arith.constant 4 : index
    %c0_240 = arith.constant 0 : index
    %397 = vector.load %arg24[%c4, %c0_240] : memref<6x32xf32, #tpu.memory_space<vmem>>, vector<1x32xf32>
    tpu.vector_store %arg24[%c4, %c0_240], %396 {strides = array<i32>} : memref<6x32xf32, #tpu.memory_space<vmem>>, vector<1x32xf32>,
    %c25 = arith.constant 25 : index
    %c0_241 = arith.constant 0 : index
    %398 = vector.load %arg0[%c25, %c0_241] : memref<30x32xf32, #tpu.memory_space<vmem>>, vector<5x32xf32>
    %c25_242 = arith.constant 25 : index
    %c0_243 = arith.constant 0 : index
    %399 = vector.load %arg22[%c25_242, %c0_243] : memref<30x32xf32, #tpu.memory_space<vmem>>, vector<5x32xf32>
    %c25_244 = arith.constant 25 : index
    %c0_245 = arith.constant 0 : index
    %400 = vector.load %arg23[%c25_244, %c0_245] : memref<30x32xf32, #tpu.memory_space<vmem>>, vector<5x32xf32>
    %cst_246 = arith.constant dense<0.000000e+00> : vector<5x5xf32>
    %401 = tpu.matmul %399, %400, %cst_246 {dimension_numbers = #tpu.dot_dimension_numbers<[1], [1], [0], [0], [0, 0, 1, 0], [], []>} : vector<5x32xf32>, vector<5x32xf32>, vector<5x5xf32> -> vector<5x5xf32>
    %402 = arith.mulf %401, %401 : vector<5x5xf32>
    %cst_247 = arith.constant dense<0.000000e+00> : vector<5xf32>
    %403 = vector.multi_reduction <add>, %402, %cst_247 [1] : vector<5x5xf32> to vector<5xf32>
    %404 = vector.shape_cast %403 : vector<5xf32> to vector<5x1xf32>
    %cst_248 = arith.constant 9.99999996E-13 : f32
    %405 = vector.broadcast %cst_248 : f32 to vector<5x1xf32>
    %406 = arith.maximumf %404, %405 : vector<5x1xf32>
    %407 = tpu.reciprocal %406 {approx = true} : vector<5x1xf32> -> vector<5x1xf32>
    %408 = vector.broadcast %407 : vector<5x1xf32> to vector<5x5xf32>
    %409 = arith.mulf %402, %408 : vector<5x5xf32>
    %c0_249 = arith.constant 0 : index
    %c0_250 = arith.constant 0 : index
    %c0_251 = arith.constant 0 : index
    %410 = vector.load %arg6[%c0_249, %c0_250, %c0_251] : memref<2x32x32xf32, #tpu.memory_space<vmem>>, vector<1x32x32xf32>
    %411 = vector.shape_cast %410 : vector<1x32x32xf32> to vector<32x32xf32>
    %cst_252 = arith.constant dense<0.000000e+00> : vector<5x32xf32>
    %412 = tpu.matmul %398, %411, %cst_252 {dimension_numbers = #tpu.dot_dimension_numbers<[1], [0], [0], [1], [0, 0, 1, 1], [], []>} : vector<5x32xf32>, vector<32x32xf32>, vector<5x32xf32> -> vector<5x32xf32>
    %cst_253 = arith.constant dense<0.000000e+00> : vector<5x32xf32>
    %413 = tpu.matmul %409, %412, %cst_253 {dimension_numbers = #tpu.dot_dimension_numbers<[1], [0], [0], [1], [0, 0, 1, 1], [], []>} : vector<5x5xf32>, vector<5x32xf32>, vector<5x32xf32> -> vector<5x32xf32>
    %cst_254 = arith.constant dense<0.000000e+00> : vector<5xf32>
    %414 = vector.multi_reduction <add>, %413, %cst_254 [1] : vector<5x32xf32> to vector<5xf32>
    %415 = vector.shape_cast %414 : vector<5xf32> to vector<5x1xf32>
    %cst_255 = arith.constant 3.200000e+01 : f32
    %416 = vector.broadcast %cst_255 : f32 to vector<5x1xf32>
    %417 = arith.divf %415, %416 : vector<5x1xf32>
    %418 = vector.broadcast %417 : vector<5x1xf32> to vector<5x32xf32>
    %419 = arith.subf %413, %418 : vector<5x32xf32>
    %420 = arith.mulf %419, %419 : vector<5x32xf32>
    %cst_256 = arith.constant dense<0.000000e+00> : vector<5xf32>
    %421 = vector.multi_reduction <add>, %420, %cst_256 [1] : vector<5x32xf32> to vector<5xf32>
    %422 = vector.shape_cast %421 : vector<5xf32> to vector<5x1xf32>
    %cst_257 = arith.constant 3.200000e+01 : f32
    %423 = vector.broadcast %cst_257 : f32 to vector<5x1xf32>
    %424 = arith.divf %422, %423 : vector<5x1xf32>
    %cst_258 = arith.constant 9.99999974E-6 : f32
    %425 = vector.broadcast %cst_258 : f32 to vector<5x1xf32>
    %426 = arith.addf %424, %425 : vector<5x1xf32>
    %427 = math.rsqrt %426 : vector<5x1xf32>
    %428 = vector.broadcast %427 : vector<5x1xf32> to vector<5x32xf32>
    %429 = arith.mulf %419, %428 : vector<5x32xf32>
    %c0_259 = arith.constant 0 : index
    %c0_260 = arith.constant 0 : index
    %c0_261 = arith.constant 0 : index
    %430 = vector.load %arg7[%c0_259, %c0_260, %c0_261] : memref<2x1x32xf32, #tpu.memory_space<vmem>>, vector<1x1x32xf32>
    %431 = vector.shape_cast %430 : vector<1x1x32xf32> to vector<1x32xf32>
    %432 = vector.broadcast %431 : vector<1x32xf32> to vector<5x32xf32>
    %433 = arith.mulf %429, %432 : vector<5x32xf32>
    %c0_262 = arith.constant 0 : index
    %c0_263 = arith.constant 0 : index
    %c0_264 = arith.constant 0 : index
    %434 = vector.load %arg8[%c0_262, %c0_263, %c0_264] : memref<2x1x32xf32, #tpu.memory_space<vmem>>, vector<1x1x32xf32>
    %435 = vector.shape_cast %434 : vector<1x1x32xf32> to vector<1x32xf32>
    %436 = vector.broadcast %435 : vector<1x32xf32> to vector<5x32xf32>
    %437 = arith.addf %433, %436 : vector<5x32xf32>
    %cst_265 = arith.constant 0.000000e+00 : f32
    %438 = vector.broadcast %cst_265 : f32 to vector<5x32xf32>
    %439 = arith.maximumf %437, %438 : vector<5x32xf32>
    %c1_266 = arith.constant 1 : index
    %c0_267 = arith.constant 0 : index
    %c0_268 = arith.constant 0 : index
    %440 = vector.load %arg6[%c1_266, %c0_267, %c0_268] : memref<2x32x32xf32, #tpu.memory_space<vmem>>, vector<1x32x32xf32>
    %441 = vector.shape_cast %440 : vector<1x32x32xf32> to vector<32x32xf32>
    %cst_269 = arith.constant dense<0.000000e+00> : vector<5x32xf32>
    %442 = tpu.matmul %439, %441, %cst_269 {dimension_numbers = #tpu.dot_dimension_numbers<[1], [0], [0], [1], [0, 0, 1, 1], [], []>} : vector<5x32xf32>, vector<32x32xf32>, vector<5x32xf32> -> vector<5x32xf32>
    %cst_270 = arith.constant dense<0.000000e+00> : vector<5x32xf32>
    %443 = tpu.matmul %409, %442, %cst_270 {dimension_numbers = #tpu.dot_dimension_numbers<[1], [0], [0], [1], [0, 0, 1, 1], [], []>} : vector<5x5xf32>, vector<5x32xf32>, vector<5x32xf32> -> vector<5x32xf32>
    %cst_271 = arith.constant dense<0.000000e+00> : vector<5xf32>
    %444 = vector.multi_reduction <add>, %443, %cst_271 [1] : vector<5x32xf32> to vector<5xf32>
    %445 = vector.shape_cast %444 : vector<5xf32> to vector<5x1xf32>
    %cst_272 = arith.constant 3.200000e+01 : f32
    %446 = vector.broadcast %cst_272 : f32 to vector<5x1xf32>
    %447 = arith.divf %445, %446 : vector<5x1xf32>
    %448 = vector.broadcast %447 : vector<5x1xf32> to vector<5x32xf32>
    %449 = arith.subf %443, %448 : vector<5x32xf32>
    %450 = arith.mulf %449, %449 : vector<5x32xf32>
    %cst_273 = arith.constant dense<0.000000e+00> : vector<5xf32>
    %451 = vector.multi_reduction <add>, %450, %cst_273 [1] : vector<5x32xf32> to vector<5xf32>
    %452 = vector.shape_cast %451 : vector<5xf32> to vector<5x1xf32>
    %cst_274 = arith.constant 3.200000e+01 : f32
    %453 = vector.broadcast %cst_274 : f32 to vector<5x1xf32>
    %454 = arith.divf %452, %453 : vector<5x1xf32>
    %cst_275 = arith.constant 9.99999974E-6 : f32
    %455 = vector.broadcast %cst_275 : f32 to vector<5x1xf32>
    %456 = arith.addf %454, %455 : vector<5x1xf32>
    %457 = math.rsqrt %456 : vector<5x1xf32>
    %458 = vector.broadcast %457 : vector<5x1xf32> to vector<5x32xf32>
    %459 = arith.mulf %449, %458 : vector<5x32xf32>
    %c1_276 = arith.constant 1 : index
    %c0_277 = arith.constant 0 : index
    %c0_278 = arith.constant 0 : index
    %460 = vector.load %arg7[%c1_276, %c0_277, %c0_278] : memref<2x1x32xf32, #tpu.memory_space<vmem>>, vector<1x1x32xf32>
    %461 = vector.shape_cast %460 : vector<1x1x32xf32> to vector<1x32xf32>
    %462 = vector.broadcast %461 : vector<1x32xf32> to vector<5x32xf32>
    %463 = arith.mulf %459, %462 : vector<5x32xf32>
    %c1_279 = arith.constant 1 : index
    %c0_280 = arith.constant 0 : index
    %c0_281 = arith.constant 0 : index
    %464 = vector.load %arg8[%c1_279, %c0_280, %c0_281] : memref<2x1x32xf32, #tpu.memory_space<vmem>>, vector<1x1x32xf32>
    %465 = vector.shape_cast %464 : vector<1x1x32xf32> to vector<1x32xf32>
    %466 = vector.broadcast %465 : vector<1x32xf32> to vector<5x32xf32>
    %467 = arith.addf %463, %466 : vector<5x32xf32>
    %cst_282 = arith.constant 0.000000e+00 : f32
    %468 = vector.broadcast %cst_282 : f32 to vector<5x32xf32>
    %469 = arith.maximumf %467, %468 : vector<5x32xf32>
    %cst_283 = arith.constant dense<0.000000e+00> : vector<32xf32>
    %470 = vector.multi_reduction <add>, %469, %cst_283 [0] : vector<5x32xf32> to vector<32xf32>
    %471 = vector.shape_cast %470 : vector<32xf32> to vector<1x32xf32>
    %cst_284 = arith.constant 5.000000e+00 : f32
    %472 = vector.broadcast %cst_284 : f32 to vector<1x32xf32>
    %473 = arith.divf %471, %472 : vector<1x32xf32>
    %c5_285 = arith.constant 5 : index
    %c0_286 = arith.constant 0 : index
    %474 = vector.load %arg24[%c5_285, %c0_286] : memref<6x32xf32, #tpu.memory_space<vmem>>, vector<1x32xf32>
    tpu.vector_store %arg24[%c5_285, %c0_286], %473 {strides = array<i32>} : memref<6x32xf32, #tpu.memory_space<vmem>>, vector<1x32xf32>,
    %c0_287 = arith.constant 0 : index
    %c0_288 = arith.constant 0 : index
    %475 = vector.load %arg9[%c0_287, %c0_288] : memref<32x32xf32, #tpu.memory_space<vmem>>, vector<32x32xf32>
    %c0_289 = arith.constant 0 : index
    %c0_290 = arith.constant 0 : index
    %476 = vector.load %arg10[%c0_289, %c0_290] : memref<1x32xf32, #tpu.memory_space<vmem>>, vector<1x32xf32>
    %c0_291 = arith.constant 0 : index
    %c0_292 = arith.constant 0 : index
    %477 = vector.load %arg11[%c0_291, %c0_292] : memref<32x32xf32, #tpu.memory_space<vmem>>, vector<32x32xf32>
    %c0_293 = arith.constant 0 : index
    %c0_294 = arith.constant 0 : index
    %478 = vector.load %arg12[%c0_293, %c0_294] : memref<1x32xf32, #tpu.memory_space<vmem>>, vector<1x32xf32>
    %c0_295 = arith.constant 0 : index
    %c0_296 = arith.constant 0 : index
    %479 = vector.load %arg24[%c0_295, %c0_296] : memref<6x32xf32, #tpu.memory_space<vmem>>, vector<3x32xf32>
    %cst_297 = arith.constant dense<0.000000e+00> : vector<3x32xf32>
    %480 = tpu.matmul %479, %475, %cst_297 {dimension_numbers = #tpu.dot_dimension_numbers<[1], [0], [0], [1], [0, 0, 1, 1], [], []>} : vector<3x32xf32>, vector<32x32xf32>, vector<3x32xf32> -> vector<3x32xf32>
    %481 = vector.broadcast %476 : vector<1x32xf32> to vector<3x32xf32>
    %482 = arith.addf %480, %481 : vector<3x32xf32>
    %cst_298 = arith.constant dense<0.000000e+00> : vector<3x32xf32>
    %483 = tpu.matmul %479, %477, %cst_298 {dimension_numbers = #tpu.dot_dimension_numbers<[1], [0], [0], [1], [0, 0, 1, 1], [], []>} : vector<3x32xf32>, vector<32x32xf32>, vector<3x32xf32> -> vector<3x32xf32>
    %484 = vector.broadcast %478 : vector<1x32xf32> to vector<3x32xf32>
    %485 = arith.addf %483, %484 : vector<3x32xf32>
    %cst_299 = arith.constant dense<0.000000e+00> : vector<3x3xf32>
    %486 = tpu.matmul %482, %485, %cst_299 {dimension_numbers = #tpu.dot_dimension_numbers<[1], [1], [0], [0], [0, 0, 1, 0], [], []>} : vector<3x32xf32>, vector<3x32xf32>, vector<3x3xf32> -> vector<3x3xf32>
    %487 = arith.mulf %486, %486 : vector<3x3xf32>
    %cst_300 = arith.constant dense<0.000000e+00> : vector<3xf32>
    %488 = vector.multi_reduction <add>, %487, %cst_300 [1] : vector<3x3xf32> to vector<3xf32>
    %489 = vector.shape_cast %488 : vector<3xf32> to vector<3x1xf32>
    %cst_301 = arith.constant 9.99999996E-13 : f32
    %490 = vector.broadcast %cst_301 : f32 to vector<3x1xf32>
    %491 = arith.maximumf %489, %490 : vector<3x1xf32>
    %492 = tpu.reciprocal %491 {approx = true} : vector<3x1xf32> -> vector<3x1xf32>
    %493 = vector.broadcast %492 : vector<3x1xf32> to vector<3x3xf32>
    %494 = arith.mulf %487, %493 : vector<3x3xf32>
    %c0_302 = arith.constant 0 : index
    %c0_303 = arith.constant 0 : index
    %c0_304 = arith.constant 0 : index
    %495 = vector.load %arg13[%c0_302, %c0_303, %c0_304] : memref<2x32x32xf32, #tpu.memory_space<vmem>>, vector<1x32x32xf32>
    %496 = vector.shape_cast %495 : vector<1x32x32xf32> to vector<32x32xf32>
    %cst_305 = arith.constant dense<0.000000e+00> : vector<3x32xf32>
    %497 = tpu.matmul %479, %496, %cst_305 {dimension_numbers = #tpu.dot_dimension_numbers<[1], [0], [0], [1], [0, 0, 1, 1], [], []>} : vector<3x32xf32>, vector<32x32xf32>, vector<3x32xf32> -> vector<3x32xf32>
    %cst_306 = arith.constant dense<0.000000e+00> : vector<3x32xf32>
    %498 = tpu.matmul %494, %497, %cst_306 {dimension_numbers = #tpu.dot_dimension_numbers<[1], [0], [0], [1], [0, 0, 1, 1], [], []>} : vector<3x3xf32>, vector<3x32xf32>, vector<3x32xf32> -> vector<3x32xf32>
    %cst_307 = arith.constant dense<0.000000e+00> : vector<3xf32>
    %499 = vector.multi_reduction <add>, %498, %cst_307 [1] : vector<3x32xf32> to vector<3xf32>
    %500 = vector.shape_cast %499 : vector<3xf32> to vector<3x1xf32>
    %cst_308 = arith.constant 3.200000e+01 : f32
    %501 = vector.broadcast %cst_308 : f32 to vector<3x1xf32>
    %502 = arith.divf %500, %501 : vector<3x1xf32>
    %503 = vector.broadcast %502 : vector<3x1xf32> to vector<3x32xf32>
    %504 = arith.subf %498, %503 : vector<3x32xf32>
    %505 = arith.mulf %504, %504 : vector<3x32xf32>
    %cst_309 = arith.constant dense<0.000000e+00> : vector<3xf32>
    %506 = vector.multi_reduction <add>, %505, %cst_309 [1] : vector<3x32xf32> to vector<3xf32>
    %507 = vector.shape_cast %506 : vector<3xf32> to vector<3x1xf32>
    %cst_310 = arith.constant 3.200000e+01 : f32
    %508 = vector.broadcast %cst_310 : f32 to vector<3x1xf32>
    %509 = arith.divf %507, %508 : vector<3x1xf32>
    %cst_311 = arith.constant 9.99999974E-6 : f32
    %510 = vector.broadcast %cst_311 : f32 to vector<3x1xf32>
    %511 = arith.addf %509, %510 : vector<3x1xf32>
    %512 = math.rsqrt %511 : vector<3x1xf32>
    %513 = vector.broadcast %512 : vector<3x1xf32> to vector<3x32xf32>
    %514 = arith.mulf %504, %513 : vector<3x32xf32>
    %c0_312 = arith.constant 0 : index
    %c0_313 = arith.constant 0 : index
    %c0_314 = arith.constant 0 : index
    %515 = vector.load %arg14[%c0_312, %c0_313, %c0_314] : memref<2x1x32xf32, #tpu.memory_space<vmem>>, vector<1x1x32xf32>
    %516 = vector.shape_cast %515 : vector<1x1x32xf32> to vector<1x32xf32>
    %517 = vector.broadcast %516 : vector<1x32xf32> to vector<3x32xf32>
    %518 = arith.mulf %514, %517 : vector<3x32xf32>
    %c0_315 = arith.constant 0 : index
    %c0_316 = arith.constant 0 : index
    %c0_317 = arith.constant 0 : index
    %519 = vector.load %arg15[%c0_315, %c0_316, %c0_317] : memref<2x1x32xf32, #tpu.memory_space<vmem>>, vector<1x1x32xf32>
    %520 = vector.shape_cast %519 : vector<1x1x32xf32> to vector<1x32xf32>
    %521 = vector.broadcast %520 : vector<1x32xf32> to vector<3x32xf32>
    %522 = arith.addf %518, %521 : vector<3x32xf32>
    %cst_318 = arith.constant 0.000000e+00 : f32
    %523 = vector.broadcast %cst_318 : f32 to vector<3x32xf32>
    %524 = arith.maximumf %522, %523 : vector<3x32xf32>
    %c1_319 = arith.constant 1 : index
    %c0_320 = arith.constant 0 : index
    %c0_321 = arith.constant 0 : index
    %525 = vector.load %arg13[%c1_319, %c0_320, %c0_321] : memref<2x32x32xf32, #tpu.memory_space<vmem>>, vector<1x32x32xf32>
    %526 = vector.shape_cast %525 : vector<1x32x32xf32> to vector<32x32xf32>
    %cst_322 = arith.constant dense<0.000000e+00> : vector<3x32xf32>
    %527 = tpu.matmul %524, %526, %cst_322 {dimension_numbers = #tpu.dot_dimension_numbers<[1], [0], [0], [1], [0, 0, 1, 1], [], []>} : vector<3x32xf32>, vector<32x32xf32>, vector<3x32xf32> -> vector<3x32xf32>
    %cst_323 = arith.constant dense<0.000000e+00> : vector<3x32xf32>
    %528 = tpu.matmul %494, %527, %cst_323 {dimension_numbers = #tpu.dot_dimension_numbers<[1], [0], [0], [1], [0, 0, 1, 1], [], []>} : vector<3x3xf32>, vector<3x32xf32>, vector<3x32xf32> -> vector<3x32xf32>
    %cst_324 = arith.constant dense<0.000000e+00> : vector<3xf32>
    %529 = vector.multi_reduction <add>, %528, %cst_324 [1] : vector<3x32xf32> to vector<3xf32>
    %530 = vector.shape_cast %529 : vector<3xf32> to vector<3x1xf32>
    %cst_325 = arith.constant 3.200000e+01 : f32
    %531 = vector.broadcast %cst_325 : f32 to vector<3x1xf32>
    %532 = arith.divf %530, %531 : vector<3x1xf32>
    %533 = vector.broadcast %532 : vector<3x1xf32> to vector<3x32xf32>
    %534 = arith.subf %528, %533 : vector<3x32xf32>
    %535 = arith.mulf %534, %534 : vector<3x32xf32>
    %cst_326 = arith.constant dense<0.000000e+00> : vector<3xf32>
    %536 = vector.multi_reduction <add>, %535, %cst_326 [1] : vector<3x32xf32> to vector<3xf32>
    %537 = vector.shape_cast %536 : vector<3xf32> to vector<3x1xf32>
    %cst_327 = arith.constant 3.200000e+01 : f32
    %538 = vector.broadcast %cst_327 : f32 to vector<3x1xf32>
    %539 = arith.divf %537, %538 : vector<3x1xf32>
    %cst_328 = arith.constant 9.99999974E-6 : f32
    %540 = vector.broadcast %cst_328 : f32 to vector<3x1xf32>
    %541 = arith.addf %539, %540 : vector<3x1xf32>
    %542 = math.rsqrt %541 : vector<3x1xf32>
    %543 = vector.broadcast %542 : vector<3x1xf32> to vector<3x32xf32>
    %544 = arith.mulf %534, %543 : vector<3x32xf32>
    %c1_329 = arith.constant 1 : index
    %c0_330 = arith.constant 0 : index
    %c0_331 = arith.constant 0 : index
    %545 = vector.load %arg14[%c1_329, %c0_330, %c0_331] : memref<2x1x32xf32, #tpu.memory_space<vmem>>, vector<1x1x32xf32>
    %546 = vector.shape_cast %545 : vector<1x1x32xf32> to vector<1x32xf32>
    %547 = vector.broadcast %546 : vector<1x32xf32> to vector<3x32xf32>
    %548 = arith.mulf %544, %547 : vector<3x32xf32>
    %c1_332 = arith.constant 1 : index
    %c0_333 = arith.constant 0 : index
    %c0_334 = arith.constant 0 : index
    %549 = vector.load %arg15[%c1_332, %c0_333, %c0_334] : memref<2x1x32xf32, #tpu.memory_space<vmem>>, vector<1x1x32xf32>
    %550 = vector.shape_cast %549 : vector<1x1x32xf32> to vector<1x32xf32>
    %551 = vector.broadcast %550 : vector<1x32xf32> to vector<3x32xf32>
    %552 = arith.addf %548, %551 : vector<3x32xf32>
    %cst_335 = arith.constant 0.000000e+00 : f32
    %553 = vector.broadcast %cst_335 : f32 to vector<3x32xf32>
    %554 = arith.maximumf %552, %553 : vector<3x32xf32>
    %cst_336 = arith.constant dense<0.000000e+00> : vector<32xf32>
    %555 = vector.multi_reduction <add>, %554, %cst_336 [0] : vector<3x32xf32> to vector<32xf32>
    %556 = vector.shape_cast %555 : vector<32xf32> to vector<1x32xf32>
    %cst_337 = arith.constant 3.000000e+00 : f32
    %557 = vector.broadcast %cst_337 : f32 to vector<1x32xf32>
    %558 = arith.divf %556, %557 : vector<1x32xf32>
    %c0_338 = arith.constant 0 : index
    %c0_339 = arith.constant 0 : index
    %559 = vector.load %arg25[%c0_338, %c0_339] : memref<2x32xf32, #tpu.memory_space<vmem>>, vector<1x32xf32>
    tpu.vector_store %arg25[%c0_338, %c0_339], %558 {strides = array<i32>} : memref<2x32xf32, #tpu.memory_space<vmem>>, vector<1x32xf32>,
    %c0_340 = arith.constant 0 : index
    %c0_341 = arith.constant 0 : index
    %560 = vector.load %arg1[%c0_340, %c0_341] : memref<8x32xf32, #tpu.memory_space<vmem>>, vector<4x32xf32>
    %cst_342 = arith.constant dense<0.000000e+00> : vector<4x32xf32>
    %561 = tpu.matmul %560, %475, %cst_342 {dimension_numbers = #tpu.dot_dimension_numbers<[1], [0], [0], [1], [0, 0, 1, 1], [], []>} : vector<4x32xf32>, vector<32x32xf32>, vector<4x32xf32> -> vector<4x32xf32>
    %562 = vector.broadcast %476 : vector<1x32xf32> to vector<4x32xf32>
    %563 = arith.addf %561, %562 : vector<4x32xf32>
    %cst_343 = arith.constant dense<0.000000e+00> : vector<4x32xf32>
    %564 = tpu.matmul %560, %477, %cst_343 {dimension_numbers = #tpu.dot_dimension_numbers<[1], [0], [0], [1], [0, 0, 1, 1], [], []>} : vector<4x32xf32>, vector<32x32xf32>, vector<4x32xf32> -> vector<4x32xf32>
    %565 = vector.broadcast %478 : vector<1x32xf32> to vector<4x32xf32>
    %566 = arith.addf %564, %565 : vector<4x32xf32>
    %cst_344 = arith.constant dense<0.000000e+00> : vector<4x4xf32>
    %567 = tpu.matmul %563, %566, %cst_344 {dimension_numbers = #tpu.dot_dimension_numbers<[1], [1], [0], [0], [0, 0, 1, 0], [], []>} : vector<4x32xf32>, vector<4x32xf32>, vector<4x4xf32> -> vector<4x4xf32>
    %568 = arith.mulf %567, %567 : vector<4x4xf32>
    %cst_345 = arith.constant dense<0.000000e+00> : vector<4xf32>
    %569 = vector.multi_reduction <add>, %568, %cst_345 [1] : vector<4x4xf32> to vector<4xf32>
    %570 = vector.shape_cast %569 : vector<4xf32> to vector<4x1xf32>
    %cst_346 = arith.constant 9.99999996E-13 : f32
    %571 = vector.broadcast %cst_346 : f32 to vector<4x1xf32>
    %572 = arith.maximumf %570, %571 : vector<4x1xf32>
    %573 = tpu.reciprocal %572 {approx = true} : vector<4x1xf32> -> vector<4x1xf32>
    %574 = vector.broadcast %573 : vector<4x1xf32> to vector<4x4xf32>
    %575 = arith.mulf %568, %574 : vector<4x4xf32>
    %c0_347 = arith.constant 0 : index
    %c0_348 = arith.constant 0 : index
    %c0_349 = arith.constant 0 : index
    %576 = vector.load %arg13[%c0_347, %c0_348, %c0_349] : memref<2x32x32xf32, #tpu.memory_space<vmem>>, vector<1x32x32xf32>
    %577 = vector.shape_cast %576 : vector<1x32x32xf32> to vector<32x32xf32>
    %cst_350 = arith.constant dense<0.000000e+00> : vector<4x32xf32>
    %578 = tpu.matmul %560, %577, %cst_350 {dimension_numbers = #tpu.dot_dimension_numbers<[1], [0], [0], [1], [0, 0, 1, 1], [], []>} : vector<4x32xf32>, vector<32x32xf32>, vector<4x32xf32> -> vector<4x32xf32>
    %cst_351 = arith.constant dense<0.000000e+00> : vector<4x32xf32>
    %579 = tpu.matmul %575, %578, %cst_351 {dimension_numbers = #tpu.dot_dimension_numbers<[1], [0], [0], [1], [0, 0, 1, 1], [], []>} : vector<4x4xf32>, vector<4x32xf32>, vector<4x32xf32> -> vector<4x32xf32>
    %cst_352 = arith.constant dense<0.000000e+00> : vector<4xf32>
    %580 = vector.multi_reduction <add>, %579, %cst_352 [1] : vector<4x32xf32> to vector<4xf32>
    %581 = vector.shape_cast %580 : vector<4xf32> to vector<4x1xf32>
    %cst_353 = arith.constant 3.200000e+01 : f32
    %582 = vector.broadcast %cst_353 : f32 to vector<4x1xf32>
    %583 = arith.divf %581, %582 : vector<4x1xf32>
    %584 = vector.broadcast %583 : vector<4x1xf32> to vector<4x32xf32>
    %585 = arith.subf %579, %584 : vector<4x32xf32>
    %586 = arith.mulf %585, %585 : vector<4x32xf32>
    %cst_354 = arith.constant dense<0.000000e+00> : vector<4xf32>
    %587 = vector.multi_reduction <add>, %586, %cst_354 [1] : vector<4x32xf32> to vector<4xf32>
    %588 = vector.shape_cast %587 : vector<4xf32> to vector<4x1xf32>
    %cst_355 = arith.constant 3.200000e+01 : f32
    %589 = vector.broadcast %cst_355 : f32 to vector<4x1xf32>
    %590 = arith.divf %588, %589 : vector<4x1xf32>
    %cst_356 = arith.constant 9.99999974E-6 : f32
    %591 = vector.broadcast %cst_356 : f32 to vector<4x1xf32>
    %592 = arith.addf %590, %591 : vector<4x1xf32>
    %593 = math.rsqrt %592 : vector<4x1xf32>
    %594 = vector.broadcast %593 : vector<4x1xf32> to vector<4x32xf32>
    %595 = arith.mulf %585, %594 : vector<4x32xf32>
    %c0_357 = arith.constant 0 : index
    %c0_358 = arith.constant 0 : index
    %c0_359 = arith.constant 0 : index
    %596 = vector.load %arg14[%c0_357, %c0_358, %c0_359] : memref<2x1x32xf32, #tpu.memory_space<vmem>>, vector<1x1x32xf32>
    %597 = vector.shape_cast %596 : vector<1x1x32xf32> to vector<1x32xf32>
    %598 = vector.broadcast %597 : vector<1x32xf32> to vector<4x32xf32>
    %599 = arith.mulf %595, %598 : vector<4x32xf32>
    %c0_360 = arith.constant 0 : index
    %c0_361 = arith.constant 0 : index
    %c0_362 = arith.constant 0 : index
    %600 = vector.load %arg15[%c0_360, %c0_361, %c0_362] : memref<2x1x32xf32, #tpu.memory_space<vmem>>, vector<1x1x32xf32>
    %601 = vector.shape_cast %600 : vector<1x1x32xf32> to vector<1x32xf32>
    %602 = vector.broadcast %601 : vector<1x32xf32> to vector<4x32xf32>
    %603 = arith.addf %599, %602 : vector<4x32xf32>
    %cst_363 = arith.constant 0.000000e+00 : f32
    %604 = vector.broadcast %cst_363 : f32 to vector<4x32xf32>
    %605 = arith.maximumf %603, %604 : vector<4x32xf32>
    %c1_364 = arith.constant 1 : index
    %c0_365 = arith.constant 0 : index
    %c0_366 = arith.constant 0 : index
    %606 = vector.load %arg13[%c1_364, %c0_365, %c0_366] : memref<2x32x32xf32, #tpu.memory_space<vmem>>, vector<1x32x32xf32>
    %607 = vector.shape_cast %606 : vector<1x32x32xf32> to vector<32x32xf32>
    %cst_367 = arith.constant dense<0.000000e+00> : vector<4x32xf32>
    %608 = tpu.matmul %605, %607, %cst_367 {dimension_numbers = #tpu.dot_dimension_numbers<[1], [0], [0], [1], [0, 0, 1, 1], [], []>} : vector<4x32xf32>, vector<32x32xf32>, vector<4x32xf32> -> vector<4x32xf32>
    %cst_368 = arith.constant dense<0.000000e+00> : vector<4x32xf32>
    %609 = tpu.matmul %575, %608, %cst_368 {dimension_numbers = #tpu.dot_dimension_numbers<[1], [0], [0], [1], [0, 0, 1, 1], [], []>} : vector<4x4xf32>, vector<4x32xf32>, vector<4x32xf32> -> vector<4x32xf32>
    %cst_369 = arith.constant dense<0.000000e+00> : vector<4xf32>
    %610 = vector.multi_reduction <add>, %609, %cst_369 [1] : vector<4x32xf32> to vector<4xf32>
    %611 = vector.shape_cast %610 : vector<4xf32> to vector<4x1xf32>
    %cst_370 = arith.constant 3.200000e+01 : f32
    %612 = vector.broadcast %cst_370 : f32 to vector<4x1xf32>
    %613 = arith.divf %611, %612 : vector<4x1xf32>
    %614 = vector.broadcast %613 : vector<4x1xf32> to vector<4x32xf32>
    %615 = arith.subf %609, %614 : vector<4x32xf32>
    %616 = arith.mulf %615, %615 : vector<4x32xf32>
    %cst_371 = arith.constant dense<0.000000e+00> : vector<4xf32>
    %617 = vector.multi_reduction <add>, %616, %cst_371 [1] : vector<4x32xf32> to vector<4xf32>
    %618 = vector.shape_cast %617 : vector<4xf32> to vector<4x1xf32>
    %cst_372 = arith.constant 3.200000e+01 : f32
    %619 = vector.broadcast %cst_372 : f32 to vector<4x1xf32>
    %620 = arith.divf %618, %619 : vector<4x1xf32>
    %cst_373 = arith.constant 9.99999974E-6 : f32
    %621 = vector.broadcast %cst_373 : f32 to vector<4x1xf32>
    %622 = arith.addf %620, %621 : vector<4x1xf32>
    %623 = math.rsqrt %622 : vector<4x1xf32>
    %624 = vector.broadcast %623 : vector<4x1xf32> to vector<4x32xf32>
    %625 = arith.mulf %615, %624 : vector<4x32xf32>
    %c1_374 = arith.constant 1 : index
    %c0_375 = arith.constant 0 : index
    %c0_376 = arith.constant 0 : index
    %626 = vector.load %arg14[%c1_374, %c0_375, %c0_376] : memref<2x1x32xf32, #tpu.memory_space<vmem>>, vector<1x1x32xf32>
    %627 = vector.shape_cast %626 : vector<1x1x32xf32> to vector<1x32xf32>
    %628 = vector.broadcast %627 : vector<1x32xf32> to vector<4x32xf32>
    %629 = arith.mulf %625, %628 : vector<4x32xf32>
    %c1_377 = arith.constant 1 : index
    %c0_378 = arith.constant 0 : index
    %c0_379 = arith.constant 0 : index
    %630 = vector.load %arg15[%c1_377, %c0_378, %c0_379] : memref<2x1x32xf32, #tpu.memory_space<vmem>>, vector<1x1x32xf32>
    %631 = vector.shape_cast %630 : vector<1x1x32xf32> to vector<1x32xf32>
    %632 = vector.broadcast %631 : vector<1x32xf32> to vector<4x32xf32>
    %633 = arith.addf %629, %632 : vector<4x32xf32>
    %cst_380 = arith.constant 0.000000e+00 : f32
    %634 = vector.broadcast %cst_380 : f32 to vector<4x32xf32>
    %635 = arith.maximumf %633, %634 : vector<4x32xf32>
    %cst_381 = arith.constant dense<0.000000e+00> : vector<32xf32>
    %636 = vector.multi_reduction <add>, %635, %cst_381 [0] : vector<4x32xf32> to vector<32xf32>
    %637 = vector.shape_cast %636 : vector<32xf32> to vector<1x32xf32>
    %cst_382 = arith.constant 4.000000e+00 : f32
    %638 = vector.broadcast %cst_382 : f32 to vector<1x32xf32>
    %639 = arith.divf %637, %638 : vector<1x32xf32>
    %c0_383 = arith.constant 0 : index
    %c0_384 = arith.constant 0 : index
    %640 = vector.load %arg26[%c0_383, %c0_384] : memref<2x32xf32, #tpu.memory_space<vmem>>, vector<1x32xf32>
    tpu.vector_store %arg26[%c0_383, %c0_384], %639 {strides = array<i32>} : memref<2x32xf32, #tpu.memory_space<vmem>>, vector<1x32xf32>,
    %c3_385 = arith.constant 3 : index
    %c0_386 = arith.constant 0 : index
    %641 = vector.load %arg24[%c3_385, %c0_386] : memref<6x32xf32, #tpu.memory_space<vmem>>, vector<3x32xf32>
    %cst_387 = arith.constant dense<0.000000e+00> : vector<3x32xf32>
    %642 = tpu.matmul %641, %475, %cst_387 {dimension_numbers = #tpu.dot_dimension_numbers<[1], [0], [0], [1], [0, 0, 1, 1], [], []>} : vector<3x32xf32>, vector<32x32xf32>, vector<3x32xf32> -> vector<3x32xf32>
    %643 = vector.broadcast %476 : vector<1x32xf32> to vector<3x32xf32>
    %644 = arith.addf %642, %643 : vector<3x32xf32>
    %cst_388 = arith.constant dense<0.000000e+00> : vector<3x32xf32>
    %645 = tpu.matmul %641, %477, %cst_388 {dimension_numbers = #tpu.dot_dimension_numbers<[1], [0], [0], [1], [0, 0, 1, 1], [], []>} : vector<3x32xf32>, vector<32x32xf32>, vector<3x32xf32> -> vector<3x32xf32>
    %646 = vector.broadcast %478 : vector<1x32xf32> to vector<3x32xf32>
    %647 = arith.addf %645, %646 : vector<3x32xf32>
    %cst_389 = arith.constant dense<0.000000e+00> : vector<3x3xf32>
    %648 = tpu.matmul %644, %647, %cst_389 {dimension_numbers = #tpu.dot_dimension_numbers<[1], [1], [0], [0], [0, 0, 1, 0], [], []>} : vector<3x32xf32>, vector<3x32xf32>, vector<3x3xf32> -> vector<3x3xf32>
    %649 = arith.mulf %648, %648 : vector<3x3xf32>
    %cst_390 = arith.constant dense<0.000000e+00> : vector<3xf32>
    %650 = vector.multi_reduction <add>, %649, %cst_390 [1] : vector<3x3xf32> to vector<3xf32>
    %651 = vector.shape_cast %650 : vector<3xf32> to vector<3x1xf32>
    %cst_391 = arith.constant 9.99999996E-13 : f32
    %652 = vector.broadcast %cst_391 : f32 to vector<3x1xf32>
    %653 = arith.maximumf %651, %652 : vector<3x1xf32>
    %654 = tpu.reciprocal %653 {approx = true} : vector<3x1xf32> -> vector<3x1xf32>
    %655 = vector.broadcast %654 : vector<3x1xf32> to vector<3x3xf32>
    %656 = arith.mulf %649, %655 : vector<3x3xf32>
    %c0_392 = arith.constant 0 : index
    %c0_393 = arith.constant 0 : index
    %c0_394 = arith.constant 0 : index
    %657 = vector.load %arg13[%c0_392, %c0_393, %c0_394] : memref<2x32x32xf32, #tpu.memory_space<vmem>>, vector<1x32x32xf32>
    %658 = vector.shape_cast %657 : vector<1x32x32xf32> to vector<32x32xf32>
    %cst_395 = arith.constant dense<0.000000e+00> : vector<3x32xf32>
    %659 = tpu.matmul %641, %658, %cst_395 {dimension_numbers = #tpu.dot_dimension_numbers<[1], [0], [0], [1], [0, 0, 1, 1], [], []>} : vector<3x32xf32>, vector<32x32xf32>, vector<3x32xf32> -> vector<3x32xf32>
    %cst_396 = arith.constant dense<0.000000e+00> : vector<3x32xf32>
    %660 = tpu.matmul %656, %659, %cst_396 {dimension_numbers = #tpu.dot_dimension_numbers<[1], [0], [0], [1], [0, 0, 1, 1], [], []>} : vector<3x3xf32>, vector<3x32xf32>, vector<3x32xf32> -> vector<3x32xf32>
    %cst_397 = arith.constant dense<0.000000e+00> : vector<3xf32>
    %661 = vector.multi_reduction <add>, %660, %cst_397 [1] : vector<3x32xf32> to vector<3xf32>
    %662 = vector.shape_cast %661 : vector<3xf32> to vector<3x1xf32>
    %cst_398 = arith.constant 3.200000e+01 : f32
    %663 = vector.broadcast %cst_398 : f32 to vector<3x1xf32>
    %664 = arith.divf %662, %663 : vector<3x1xf32>
    %665 = vector.broadcast %664 : vector<3x1xf32> to vector<3x32xf32>
    %666 = arith.subf %660, %665 : vector<3x32xf32>
    %667 = arith.mulf %666, %666 : vector<3x32xf32>
    %cst_399 = arith.constant dense<0.000000e+00> : vector<3xf32>
    %668 = vector.multi_reduction <add>, %667, %cst_399 [1] : vector<3x32xf32> to vector<3xf32>
    %669 = vector.shape_cast %668 : vector<3xf32> to vector<3x1xf32>
    %cst_400 = arith.constant 3.200000e+01 : f32
    %670 = vector.broadcast %cst_400 : f32 to vector<3x1xf32>
    %671 = arith.divf %669, %670 : vector<3x1xf32>
    %cst_401 = arith.constant 9.99999974E-6 : f32
    %672 = vector.broadcast %cst_401 : f32 to vector<3x1xf32>
    %673 = arith.addf %671, %672 : vector<3x1xf32>
    %674 = math.rsqrt %673 : vector<3x1xf32>
    %675 = vector.broadcast %674 : vector<3x1xf32> to vector<3x32xf32>
    %676 = arith.mulf %666, %675 : vector<3x32xf32>
    %c0_402 = arith.constant 0 : index
    %c0_403 = arith.constant 0 : index
    %c0_404 = arith.constant 0 : index
    %677 = vector.load %arg14[%c0_402, %c0_403, %c0_404] : memref<2x1x32xf32, #tpu.memory_space<vmem>>, vector<1x1x32xf32>
    %678 = vector.shape_cast %677 : vector<1x1x32xf32> to vector<1x32xf32>
    %679 = vector.broadcast %678 : vector<1x32xf32> to vector<3x32xf32>
    %680 = arith.mulf %676, %679 : vector<3x32xf32>
    %c0_405 = arith.constant 0 : index
    %c0_406 = arith.constant 0 : index
    %c0_407 = arith.constant 0 : index
    %681 = vector.load %arg15[%c0_405, %c0_406, %c0_407] : memref<2x1x32xf32, #tpu.memory_space<vmem>>, vector<1x1x32xf32>
    %682 = vector.shape_cast %681 : vector<1x1x32xf32> to vector<1x32xf32>
    %683 = vector.broadcast %682 : vector<1x32xf32> to vector<3x32xf32>
    %684 = arith.addf %680, %683 : vector<3x32xf32>
    %cst_408 = arith.constant 0.000000e+00 : f32
    %685 = vector.broadcast %cst_408 : f32 to vector<3x32xf32>
    %686 = arith.maximumf %684, %685 : vector<3x32xf32>
    %c1_409 = arith.constant 1 : index
    %c0_410 = arith.constant 0 : index
    %c0_411 = arith.constant 0 : index
    %687 = vector.load %arg13[%c1_409, %c0_410, %c0_411] : memref<2x32x32xf32, #tpu.memory_space<vmem>>, vector<1x32x32xf32>
    %688 = vector.shape_cast %687 : vector<1x32x32xf32> to vector<32x32xf32>
    %cst_412 = arith.constant dense<0.000000e+00> : vector<3x32xf32>
    %689 = tpu.matmul %686, %688, %cst_412 {dimension_numbers = #tpu.dot_dimension_numbers<[1], [0], [0], [1], [0, 0, 1, 1], [], []>} : vector<3x32xf32>, vector<32x32xf32>, vector<3x32xf32> -> vector<3x32xf32>
    %cst_413 = arith.constant dense<0.000000e+00> : vector<3x32xf32>
    %690 = tpu.matmul %656, %689, %cst_413 {dimension_numbers = #tpu.dot_dimension_numbers<[1], [0], [0], [1], [0, 0, 1, 1], [], []>} : vector<3x3xf32>, vector<3x32xf32>, vector<3x32xf32> -> vector<3x32xf32>
    %cst_414 = arith.constant dense<0.000000e+00> : vector<3xf32>
    %691 = vector.multi_reduction <add>, %690, %cst_414 [1] : vector<3x32xf32> to vector<3xf32>
    %692 = vector.shape_cast %691 : vector<3xf32> to vector<3x1xf32>
    %cst_415 = arith.constant 3.200000e+01 : f32
    %693 = vector.broadcast %cst_415 : f32 to vector<3x1xf32>
    %694 = arith.divf %692, %693 : vector<3x1xf32>
    %695 = vector.broadcast %694 : vector<3x1xf32> to vector<3x32xf32>
    %696 = arith.subf %690, %695 : vector<3x32xf32>
    %697 = arith.mulf %696, %696 : vector<3x32xf32>
    %cst_416 = arith.constant dense<0.000000e+00> : vector<3xf32>
    %698 = vector.multi_reduction <add>, %697, %cst_416 [1] : vector<3x32xf32> to vector<3xf32>
    %699 = vector.shape_cast %698 : vector<3xf32> to vector<3x1xf32>
    %cst_417 = arith.constant 3.200000e+01 : f32
    %700 = vector.broadcast %cst_417 : f32 to vector<3x1xf32>
    %701 = arith.divf %699, %700 : vector<3x1xf32>
    %cst_418 = arith.constant 9.99999974E-6 : f32
    %702 = vector.broadcast %cst_418 : f32 to vector<3x1xf32>
    %703 = arith.addf %701, %702 : vector<3x1xf32>
    %704 = math.rsqrt %703 : vector<3x1xf32>
    %705 = vector.broadcast %704 : vector<3x1xf32> to vector<3x32xf32>
    %706 = arith.mulf %696, %705 : vector<3x32xf32>
    %c1_419 = arith.constant 1 : index
    %c0_420 = arith.constant 0 : index
    %c0_421 = arith.constant 0 : index
    %707 = vector.load %arg14[%c1_419, %c0_420, %c0_421] : memref<2x1x32xf32, #tpu.memory_space<vmem>>, vector<1x1x32xf32>
    %708 = vector.shape_cast %707 : vector<1x1x32xf32> to vector<1x32xf32>
    %709 = vector.broadcast %708 : vector<1x32xf32> to vector<3x32xf32>
    %710 = arith.mulf %706, %709 : vector<3x32xf32>
    %c1_422 = arith.constant 1 : index
    %c0_423 = arith.constant 0 : index
    %c0_424 = arith.constant 0 : index
    %711 = vector.load %arg15[%c1_422, %c0_423, %c0_424] : memref<2x1x32xf32, #tpu.memory_space<vmem>>, vector<1x1x32xf32>
    %712 = vector.shape_cast %711 : vector<1x1x32xf32> to vector<1x32xf32>
    %713 = vector.broadcast %712 : vector<1x32xf32> to vector<3x32xf32>
    %714 = arith.addf %710, %713 : vector<3x32xf32>
    %cst_425 = arith.constant 0.000000e+00 : f32
    %715 = vector.broadcast %cst_425 : f32 to vector<3x32xf32>
    %716 = arith.maximumf %714, %715 : vector<3x32xf32>
    %cst_426 = arith.constant dense<0.000000e+00> : vector<32xf32>
    %717 = vector.multi_reduction <add>, %716, %cst_426 [0] : vector<3x32xf32> to vector<32xf32>
    %718 = vector.shape_cast %717 : vector<32xf32> to vector<1x32xf32>
    %cst_427 = arith.constant 3.000000e+00 : f32
    %719 = vector.broadcast %cst_427 : f32 to vector<1x32xf32>
    %720 = arith.divf %718, %719 : vector<1x32xf32>
    %c1_428 = arith.constant 1 : index
    %c0_429 = arith.constant 0 : index
    %721 = vector.load %arg25[%c1_428, %c0_429] : memref<2x32xf32, #tpu.memory_space<vmem>>, vector<1x32xf32>
    tpu.vector_store %arg25[%c1_428, %c0_429], %720 {strides = array<i32>} : memref<2x32xf32, #tpu.memory_space<vmem>>, vector<1x32xf32>,
    %c4_430 = arith.constant 4 : index
    %c0_431 = arith.constant 0 : index
    %722 = vector.load %arg1[%c4_430, %c0_431] : memref<8x32xf32, #tpu.memory_space<vmem>>, vector<4x32xf32>
    %cst_432 = arith.constant dense<0.000000e+00> : vector<4x32xf32>
    %723 = tpu.matmul %722, %475, %cst_432 {dimension_numbers = #tpu.dot_dimension_numbers<[1], [0], [0], [1], [0, 0, 1, 1], [], []>} : vector<4x32xf32>, vector<32x32xf32>, vector<4x32xf32> -> vector<4x32xf32>
    %724 = vector.broadcast %476 : vector<1x32xf32> to vector<4x32xf32>
    %725 = arith.addf %723, %724 : vector<4x32xf32>
    %cst_433 = arith.constant dense<0.000000e+00> : vector<4x32xf32>
    %726 = tpu.matmul %722, %477, %cst_433 {dimension_numbers = #tpu.dot_dimension_numbers<[1], [0], [0], [1], [0, 0, 1, 1], [], []>} : vector<4x32xf32>, vector<32x32xf32>, vector<4x32xf32> -> vector<4x32xf32>
    %727 = vector.broadcast %478 : vector<1x32xf32> to vector<4x32xf32>
    %728 = arith.addf %726, %727 : vector<4x32xf32>
    %cst_434 = arith.constant dense<0.000000e+00> : vector<4x4xf32>
    %729 = tpu.matmul %725, %728, %cst_434 {dimension_numbers = #tpu.dot_dimension_numbers<[1], [1], [0], [0], [0, 0, 1, 0], [], []>} : vector<4x32xf32>, vector<4x32xf32>, vector<4x4xf32> -> vector<4x4xf32>
    %730 = arith.mulf %729, %729 : vector<4x4xf32>
    %cst_435 = arith.constant dense<0.000000e+00> : vector<4xf32>
    %731 = vector.multi_reduction <add>, %730, %cst_435 [1] : vector<4x4xf32> to vector<4xf32>
    %732 = vector.shape_cast %731 : vector<4xf32> to vector<4x1xf32>
    %cst_436 = arith.constant 9.99999996E-13 : f32
    %733 = vector.broadcast %cst_436 : f32 to vector<4x1xf32>
    %734 = arith.maximumf %732, %733 : vector<4x1xf32>
    %735 = tpu.reciprocal %734 {approx = true} : vector<4x1xf32> -> vector<4x1xf32>
    %736 = vector.broadcast %735 : vector<4x1xf32> to vector<4x4xf32>
    %737 = arith.mulf %730, %736 : vector<4x4xf32>
    %c0_437 = arith.constant 0 : index
    %c0_438 = arith.constant 0 : index
    %c0_439 = arith.constant 0 : index
    %738 = vector.load %arg13[%c0_437, %c0_438, %c0_439] : memref<2x32x32xf32, #tpu.memory_space<vmem>>, vector<1x32x32xf32>
    %739 = vector.shape_cast %738 : vector<1x32x32xf32> to vector<32x32xf32>
    %cst_440 = arith.constant dense<0.000000e+00> : vector<4x32xf32>
    %740 = tpu.matmul %722, %739, %cst_440 {dimension_numbers = #tpu.dot_dimension_numbers<[1], [0], [0], [1], [0, 0, 1, 1], [], []>} : vector<4x32xf32>, vector<32x32xf32>, vector<4x32xf32> -> vector<4x32xf32>
    %cst_441 = arith.constant dense<0.000000e+00> : vector<4x32xf32>
    %741 = tpu.matmul %737, %740, %cst_441 {dimension_numbers = #tpu.dot_dimension_numbers<[1], [0], [0], [1], [0, 0, 1, 1], [], []>} : vector<4x4xf32>, vector<4x32xf32>, vector<4x32xf32> -> vector<4x32xf32>
    %cst_442 = arith.constant dense<0.000000e+00> : vector<4xf32>
    %742 = vector.multi_reduction <add>, %741, %cst_442 [1] : vector<4x32xf32> to vector<4xf32>
    %743 = vector.shape_cast %742 : vector<4xf32> to vector<4x1xf32>
    %cst_443 = arith.constant 3.200000e+01 : f32
    %744 = vector.broadcast %cst_443 : f32 to vector<4x1xf32>
    %745 = arith.divf %743, %744 : vector<4x1xf32>
    %746 = vector.broadcast %745 : vector<4x1xf32> to vector<4x32xf32>
    %747 = arith.subf %741, %746 : vector<4x32xf32>
    %748 = arith.mulf %747, %747 : vector<4x32xf32>
    %cst_444 = arith.constant dense<0.000000e+00> : vector<4xf32>
    %749 = vector.multi_reduction <add>, %748, %cst_444 [1] : vector<4x32xf32> to vector<4xf32>
    %750 = vector.shape_cast %749 : vector<4xf32> to vector<4x1xf32>
    %cst_445 = arith.constant 3.200000e+01 : f32
    %751 = vector.broadcast %cst_445 : f32 to vector<4x1xf32>
    %752 = arith.divf %750, %751 : vector<4x1xf32>
    %cst_446 = arith.constant 9.99999974E-6 : f32
    %753 = vector.broadcast %cst_446 : f32 to vector<4x1xf32>
    %754 = arith.addf %752, %753 : vector<4x1xf32>
    %755 = math.rsqrt %754 : vector<4x1xf32>
    %756 = vector.broadcast %755 : vector<4x1xf32> to vector<4x32xf32>
    %757 = arith.mulf %747, %756 : vector<4x32xf32>
    %c0_447 = arith.constant 0 : index
    %c0_448 = arith.constant 0 : index
    %c0_449 = arith.constant 0 : index
    %758 = vector.load %arg14[%c0_447, %c0_448, %c0_449] : memref<2x1x32xf32, #tpu.memory_space<vmem>>, vector<1x1x32xf32>
    %759 = vector.shape_cast %758 : vector<1x1x32xf32> to vector<1x32xf32>
    %760 = vector.broadcast %759 : vector<1x32xf32> to vector<4x32xf32>
    %761 = arith.mulf %757, %760 : vector<4x32xf32>
    %c0_450 = arith.constant 0 : index
    %c0_451 = arith.constant 0 : index
    %c0_452 = arith.constant 0 : index
    %762 = vector.load %arg15[%c0_450, %c0_451, %c0_452] : memref<2x1x32xf32, #tpu.memory_space<vmem>>, vector<1x1x32xf32>
    %763 = vector.shape_cast %762 : vector<1x1x32xf32> to vector<1x32xf32>
    %764 = vector.broadcast %763 : vector<1x32xf32> to vector<4x32xf32>
    %765 = arith.addf %761, %764 : vector<4x32xf32>
    %cst_453 = arith.constant 0.000000e+00 : f32
    %766 = vector.broadcast %cst_453 : f32 to vector<4x32xf32>
    %767 = arith.maximumf %765, %766 : vector<4x32xf32>
    %c1_454 = arith.constant 1 : index
    %c0_455 = arith.constant 0 : index
    %c0_456 = arith.constant 0 : index
    %768 = vector.load %arg13[%c1_454, %c0_455, %c0_456] : memref<2x32x32xf32, #tpu.memory_space<vmem>>, vector<1x32x32xf32>
    %769 = vector.shape_cast %768 : vector<1x32x32xf32> to vector<32x32xf32>
    %cst_457 = arith.constant dense<0.000000e+00> : vector<4x32xf32>
    %770 = tpu.matmul %767, %769, %cst_457 {dimension_numbers = #tpu.dot_dimension_numbers<[1], [0], [0], [1], [0, 0, 1, 1], [], []>} : vector<4x32xf32>, vector<32x32xf32>, vector<4x32xf32> -> vector<4x32xf32>
    %cst_458 = arith.constant dense<0.000000e+00> : vector<4x32xf32>
    %771 = tpu.matmul %737, %770, %cst_458 {dimension_numbers = #tpu.dot_dimension_numbers<[1], [0], [0], [1], [0, 0, 1, 1], [], []>} : vector<4x4xf32>, vector<4x32xf32>, vector<4x32xf32> -> vector<4x32xf32>
    %cst_459 = arith.constant dense<0.000000e+00> : vector<4xf32>
    %772 = vector.multi_reduction <add>, %771, %cst_459 [1] : vector<4x32xf32> to vector<4xf32>
    %773 = vector.shape_cast %772 : vector<4xf32> to vector<4x1xf32>
    %cst_460 = arith.constant 3.200000e+01 : f32
    %774 = vector.broadcast %cst_460 : f32 to vector<4x1xf32>
    %775 = arith.divf %773, %774 : vector<4x1xf32>
    %776 = vector.broadcast %775 : vector<4x1xf32> to vector<4x32xf32>
    %777 = arith.subf %771, %776 : vector<4x32xf32>
    %778 = arith.mulf %777, %777 : vector<4x32xf32>
    %cst_461 = arith.constant dense<0.000000e+00> : vector<4xf32>
    %779 = vector.multi_reduction <add>, %778, %cst_461 [1] : vector<4x32xf32> to vector<4xf32>
    %780 = vector.shape_cast %779 : vector<4xf32> to vector<4x1xf32>
    %cst_462 = arith.constant 3.200000e+01 : f32
    %781 = vector.broadcast %cst_462 : f32 to vector<4x1xf32>
    %782 = arith.divf %780, %781 : vector<4x1xf32>
    %cst_463 = arith.constant 9.99999974E-6 : f32
    %783 = vector.broadcast %cst_463 : f32 to vector<4x1xf32>
    %784 = arith.addf %782, %783 : vector<4x1xf32>
    %785 = math.rsqrt %784 : vector<4x1xf32>
    %786 = vector.broadcast %785 : vector<4x1xf32> to vector<4x32xf32>
    %787 = arith.mulf %777, %786 : vector<4x32xf32>
    %c1_464 = arith.constant 1 : index
    %c0_465 = arith.constant 0 : index
    %c0_466 = arith.constant 0 : index
    %788 = vector.load %arg14[%c1_464, %c0_465, %c0_466] : memref<2x1x32xf32, #tpu.memory_space<vmem>>, vector<1x1x32xf32>
    %789 = vector.shape_cast %788 : vector<1x1x32xf32> to vector<1x32xf32>
    %790 = vector.broadcast %789 : vector<1x32xf32> to vector<4x32xf32>
    %791 = arith.mulf %787, %790 : vector<4x32xf32>
    %c1_467 = arith.constant 1 : index
    %c0_468 = arith.constant 0 : index
    %c0_469 = arith.constant 0 : index
    %792 = vector.load %arg15[%c1_467, %c0_468, %c0_469] : memref<2x1x32xf32, #tpu.memory_space<vmem>>, vector<1x1x32xf32>
    %793 = vector.shape_cast %792 : vector<1x1x32xf32> to vector<1x32xf32>
    %794 = vector.broadcast %793 : vector<1x32xf32> to vector<4x32xf32>
    %795 = arith.addf %791, %794 : vector<4x32xf32>
    %cst_470 = arith.constant 0.000000e+00 : f32
    %796 = vector.broadcast %cst_470 : f32 to vector<4x32xf32>
    %797 = arith.maximumf %795, %796 : vector<4x32xf32>
    %cst_471 = arith.constant dense<0.000000e+00> : vector<32xf32>
    %798 = vector.multi_reduction <add>, %797, %cst_471 [0] : vector<4x32xf32> to vector<32xf32>
    %799 = vector.shape_cast %798 : vector<32xf32> to vector<1x32xf32>
    %cst_472 = arith.constant 4.000000e+00 : f32
    %800 = vector.broadcast %cst_472 : f32 to vector<1x32xf32>
    %801 = arith.divf %799, %800 : vector<1x32xf32>
    %c1_473 = arith.constant 1 : index
    %c0_474 = arith.constant 0 : index
    %802 = vector.load %arg26[%c1_473, %c0_474] : memref<2x32xf32, #tpu.memory_space<vmem>>, vector<1x32xf32>
    tpu.vector_store %arg26[%c1_473, %c0_474], %801 {strides = array<i32>} : memref<2x32xf32, #tpu.memory_space<vmem>>, vector<1x32xf32>,
    %c0_475 = arith.constant 0 : index
    %c0_476 = arith.constant 0 : index
    %803 = vector.load %arg25[%c0_475, %c0_476] : memref<2x32xf32, #tpu.memory_space<vmem>>, vector<2x32xf32>
    %c0_477 = arith.constant 0 : index
    %c0_478 = arith.constant 0 : index
    %804 = vector.load %arg16[%c0_477, %c0_478] : memref<32x32xf32, #tpu.memory_space<vmem>>, vector<32x32xf32>
    %cst_479 = arith.constant dense<0.000000e+00> : vector<2x32xf32>
    %805 = tpu.matmul %803, %804, %cst_479 {dimension_numbers = #tpu.dot_dimension_numbers<[1], [0], [0], [1], [0, 0, 1, 1], [], []>} : vector<2x32xf32>, vector<32x32xf32>, vector<2x32xf32> -> vector<2x32xf32>
    %c0_480 = arith.constant 0 : index
    %c0_481 = arith.constant 0 : index
    %806 = vector.load %arg26[%c0_480, %c0_481] : memref<2x32xf32, #tpu.memory_space<vmem>>, vector<2x32xf32>
    %c0_482 = arith.constant 0 : index
    %c0_483 = arith.constant 0 : index
    %807 = vector.load %arg17[%c0_482, %c0_483] : memref<32x32xf32, #tpu.memory_space<vmem>>, vector<32x32xf32>
    %cst_484 = arith.constant dense<0.000000e+00> : vector<2x32xf32>
    %808 = tpu.matmul %806, %807, %cst_484 {dimension_numbers = #tpu.dot_dimension_numbers<[1], [0], [0], [1], [0, 0, 1, 1], [], []>} : vector<2x32xf32>, vector<32x32xf32>, vector<2x32xf32> -> vector<2x32xf32>
    %809 = arith.addf %805, %808 : vector<2x32xf32>
    %c0_485 = arith.constant 0 : index
    %c0_486 = arith.constant 0 : index
    %810 = vector.load %arg18[%c0_485, %c0_486] : memref<1x32xf32, #tpu.memory_space<vmem>>, vector<1x32xf32>
    %811 = vector.broadcast %810 : vector<1x32xf32> to vector<2x32xf32>
    %812 = arith.addf %809, %811 : vector<2x32xf32>
    %cst_487 = arith.constant 0.000000e+00 : f32
    %813 = vector.broadcast %cst_487 : f32 to vector<2x32xf32>
    %814 = arith.maximumf %812, %813 : vector<2x32xf32>
    %c0_488 = arith.constant 0 : index
    %c0_489 = arith.constant 0 : index
    %815 = vector.load %arg19[%c0_488, %c0_489] : memref<32x8xf32, #tpu.memory_space<vmem>>, vector<32x8xf32>
    %cst_490 = arith.constant dense<0.000000e+00> : vector<2x8xf32>
    %816 = tpu.matmul %814, %815, %cst_490 {dimension_numbers = #tpu.dot_dimension_numbers<[1], [0], [0], [1], [0, 0, 1, 1], [], []>} : vector<2x32xf32>, vector<32x8xf32>, vector<2x8xf32> -> vector<2x8xf32>
    %c0_491 = arith.constant 0 : index
    %c0_492 = arith.constant 0 : index
    %817 = vector.load %arg20[%c0_491, %c0_492] : memref<1x8xf32, #tpu.memory_space<vmem>>, vector<1x8xf32>
    %818 = vector.broadcast %817 : vector<1x8xf32> to vector<2x8xf32>
    %819 = arith.addf %816, %818 : vector<2x8xf32>
    %c0_493 = arith.constant 0 : index
    %c0_494 = arith.constant 0 : index
    %820 = vector.load %arg21[%c0_493, %c0_494] : memref<2x8xf32, #tpu.memory_space<vmem>>, vector<2x8xf32>
    tpu.vector_store %arg21[%c0_493, %c0_494], %819 {strides = array<i32>} : memref<2x8xf32, #tpu.memory_space<vmem>>, vector<2x8xf32>,
    return
  }
}

</mosaic_0001>

<bundles_post_ra>
// kernel: tokengraph_forward.1
= control target key start
LH: loop header
LB: loop body
LE: loop exit
PB: predicated region body
PF: predicated region fallthrough
CT: control target
= control target key end

     0   :  { %s4271_s0 = inlined_call_operand.vmem [shape: f32[30,32], index: 0, kind: input, shape index: {}]   ;;  %s4272_s1 = inlined_call_operand.vmem [shape: f32[8,32], index: 1, kind: input, shape index: {}]   ;;  %s4273_s2 = inlined_call_operand.vmem [shape: f32[32,32], index: 2, kind: input, shape index: {}]   ;;  %s4274_s3 = inlined_call_operand.hbm [shape: f32[1,32], index: 3, kind: input, shape index: {}]   ;;  %s4275_s4 = inlined_call_operand.vmem [shape: f32[32,32], index: 4, kind: input, shape index: {}]   ;;  %s4276_s5 = inlined_call_operand.hbm [shape: f32[1,32], index: 5, kind: input, shape index: {}]   ;;  %s4277_s6 = inlined_call_operand.vmem [shape: f32[2,32,32], index: 6, kind: input, shape index: {}]   ;;  %s4278_s7 = inlined_call_operand.hbm [shape: f32[2,1,32], index: 7, kind: input, shape index: {}]   ;;  %s4279_s8 = inlined_call_operand.vmem [shape: f32[2,1,32], index: 8, kind: input, shape index: {}]   ;;  %s4280_s9 = inlined_call_operand.hbm [shape: f32[32,32], index: 9, kind: input, shape index: {}]   ;;  %s4281_s10 = inlined_call_operand.hbm [shape: f32[1,32], index: 10, kind: input, shape index: {}]   ;;  %s4282_s11 = inlined_call_operand.hbm [shape: f32[32,32], index: 11, kind: input, shape index: {}]   ;;  %s4283_s12 = inlined_call_operand.hbm [shape: f32[1,32], index: 12, kind: input, shape index: {}]   ;;  %s4284_s13 = inlined_call_operand.vmem [shape: f32[2,32,32], index: 13, kind: input, shape index: {}]   ;;  %s4285_s14 = inlined_call_operand.hbm [shape: f32[2,1,32], index: 14, kind: input, shape index: {}]   ;;  %s4286_s15 = inlined_call_operand.hbm [shape: f32[2,1,32], index: 15, kind: input, shape index: {}]   ;;  %s4287_s16 = inlined_call_operand.hbm [shape: f32[32,32], index: 16, kind: input, shape index: {}]   ;;  %s4288_s17 = inlined_call_operand.hbm [shape: f32[32,32], index: 17, kind: input, shape index: {}]   ;;  %s4289_s18 = inlined_call_operand.vmem [shape: f32[1,32], index: 18, kind: input, shape index: {}]   ;;  %s4290_s19 = inlined_call_operand.vmem [shape: f32[32,8], index: 19, kind: input, shape index: {}]   ;;  %s4291_s20 = inlined_call_operand.vmem [shape: f32[1,8], index: 20, kind: input, shape index: {}]   ;;  %s4292_s21 = inlined_call_operand.hbm [shape: f32[2,8], index: 21, kind: output, shape index: {}]  }
   0x1   :  { %4297 = sst [smem:[#allocation33_spill]] %s4271_s0 }
   0x2   :  { %4298 = sst [smem:[#allocation34_spill]] %s4272_s1 }
   0x3   :  { %4299 = sst [smem:[#allocation35_spill]] %s4273_s2 }
   0x4   :  { %4300 = sst [smem:[#allocation36_spill]] %s4274_s3 }
   0x5   :  { %4301 = sst [smem:[#allocation37_spill]] %s4275_s4 }
   0x6   :  { %4302 = sst [smem:[#allocation38_spill]] %s4276_s5 }
   0x7   :  { %26 = vsyncpa [#allocation8], 0 }
   0x8   :  { %27 = vsyncpa [#allocation11], 0 }
   0x9   :  { %28 = vsyncpa [#allocation14], 0 }
   0xa   :  { %29 = vsyncpa [#allocation17], 0 }
   0xb   :  { %30 = vsyncpa [#allocation20], 0 }
   0xc   :  { %31 = vsyncpa [#allocation23], 0  ;;  %s4303_s26 = sld [smem:[#allocation38_spill]] }
  0x12   :  { %s57_s27 = sshll.u32 %s4303_s26, 4  ;;  %s58_s27 = int_to_ptr.hbm [resolvable:$true] %s57_s27 }
  0x13   :  { %32 = vsyncpa [#allocation9], 0  ;;  %s3385_s3 = smov [#allocation10]   ;;  %s84_s4 = sshll.u32 %s4280_s9, 4  ;;  %s85_s4 = int_to_ptr.hbm [resolvable:$true] %s84_s4 }
  0x14   :  { %s59_s28 = sshll.u32 %s3385_s3, 4  ;;  %s3386_s30 = smov [#allocation13]   ;;  %s60_s28 = int_to_ptr.vmem [resolvable:$true] %s59_s28 }
  0x15   :  { %62 = dma.hbm_to_vmem [thread:$0]  %s58_s27, 16, %s60_s28, [#allocation11]  }
  0x16   :  { %s86_s5 = sshll.u32 %s3386_s30, 4  ;;  %s3387_s22 = smov 128   ;;  %s87_s5 = int_to_ptr.vmem [resolvable:$true] %s86_s5 }
  0x17   :  { %s3388_s23 = smov 8   ;;  %s108_s2 = sshll.u32 %s4282_s11, 4  ;;  %s109_s2 = int_to_ptr.hbm [resolvable:$true] %s108_s2 }
  0x18   :  { %92 = dma.hbm_to_vmem [thread:$0]  %s85_s4, 512, %s87_s5, [#allocation14], %s3387_s22, %s3387_s22, %s3388_s23  }
  0x19   :  { %s3389_s25 = smov [#allocation16]   ;;  %s134_s3 = sshll.u32 %s4285_s14, 4  ;;  %s135_s3 = int_to_ptr.hbm [resolvable:$true] %s134_s3 }
  0x1a   :  { %s110_s26 = sshll.u32 %s3389_s25, 4  ;;  %s3390_s28 = smov [#allocation19]   ;;  %s111_s26 = int_to_ptr.vmem [resolvable:$true] %s110_s26 }
  0x1b   :  { %116 = dma.hbm_to_vmem [thread:$0]  %s109_s2, 512, %s111_s26, [#allocation17], %s3387_s22, %s3387_s22, %s3388_s23  }
  0x1c   :  { %s136_s29 = sshll.u32 %s3390_s28, 4  ;;  %s160_s30 = sshll.u32 %s4287_s16, 4  ;;  %s137_s29 = int_to_ptr.vmem [resolvable:$true] %s136_s29  ;;  %s161_s30 = int_to_ptr.hbm [resolvable:$true] %s160_s30 }
  0x1d   :  { %s3391_s11 = smov 16   ;;  %s3392_s5 = smov 1  }
  0x1e   :  { %142 = dma.hbm_to_vmem [thread:$0]  %s135_s3, 32, %s137_s29, [#allocation20], %s3391_s11, %s3391_s11, %s3392_s5  }
  0x1f   :  { %s4304_s2 = sld [smem:[#allocation36_spill]]  ;;  %s3393_s14 = smov [#allocation22]  }
  0x20   :  { %s162_s26 = sshll.u32 %s3393_s14, 4  ;;  %s3394_s16 = smov [#allocation7]   ;;  %s163_s26 = int_to_ptr.vmem [resolvable:$true] %s162_s26 }
  0x21   :  { %168 = dma.hbm_to_vmem [thread:$0]  %s161_s30, 512, %s163_s26, [#allocation23], %s3387_s22, %s3387_s22, %s3388_s23  }
  0x22   :  { %s46_s9 = sshll.u32 %s3394_s16, 4  ;;  %s69_s0 = sshll.u32 %s4278_s7, 4  ;;  %s47_s9 = int_to_ptr.vmem [resolvable:$true] %s46_s9  ;;  %s70_s0 = int_to_ptr.hbm [resolvable:$true] %s69_s0 }
  0x23   :  { %s98_s4 = sshll.u32 %s4281_s10, 4  ;;  %s3395_s1 = smov [#allocation12]   ;;  %s99_s4 = int_to_ptr.hbm [resolvable:$true] %s98_s4 }
  0x24   :  { %s71_s24 = sshll.u32 %s3395_s1, 4  ;;  %s3396_s30 = smov [#allocation15]   ;;  %s72_s24 = int_to_ptr.vmem [resolvable:$true] %s71_s24 }
  0x25   :  { %s44_s25 = sshll.u32 %s4304_s2, 4  ;;  %s100_s2 = sshll.u32 %s3396_s30, 4  ;;  %s45_s25 = int_to_ptr.hbm [resolvable:$true] %s44_s25  ;;  %s101_s2 = int_to_ptr.vmem [resolvable:$true] %s100_s2 }
  0x26   :  { %49 = dma.hbm_to_vmem [thread:$0]  %s45_s25, 16, %s47_s9, [#allocation8]  }
  0x27   :  { %77 = dma.hbm_to_vmem [thread:$0]  %s70_s0, 32, %s72_s24, [#allocation11], %s3391_s11, %s3391_s11, %s3392_s5  }
  0x28   :  { %s122_s7 = sshll.u32 %s4283_s12, 4  ;;  %s147_s10 = sshll.u32 %s4286_s15, 4  ;;  %s123_s7 = int_to_ptr.hbm [resolvable:$true] %s122_s7  ;;  %s148_s10 = int_to_ptr.hbm [resolvable:$true] %s147_s10 }
  0x29   :  { %103 = dma.hbm_to_vmem [thread:$0]  %s99_s4, 16, %s101_s2, [#allocation14]  }
  0x2a   :  { %s3397_s9 = smov [#allocation18]   ;;  %s3398_s28 = smov [#allocation21]  }
  0x2b   :  { %s124_s27 = sshll.u32 %s3397_s9, 4  ;;  %s149_s0 = sshll.u32 %s3398_s28, 4  ;;  %s125_s27 = int_to_ptr.vmem [resolvable:$true] %s124_s27  ;;  %s150_s0 = int_to_ptr.vmem [resolvable:$true] %s149_s0 }
  0x2c   :  { %127 = dma.hbm_to_vmem [thread:$0]  %s123_s7, 16, %s125_s27, [#allocation17]  }
  0x2d   :  { %s173_s1 = sshll.u32 %s4288_s17, 4  ;;  %s3399_s12 = smov [#allocation24]   ;;  %s174_s1 = int_to_ptr.hbm [resolvable:$true] %s173_s1 }
  0x2e   :  { %155 = dma.hbm_to_vmem [thread:$0]  %s148_s10, 32, %s150_s0, [#allocation20], %s3391_s11, %s3391_s11, %s3392_s5  }
  0x2f   :  { %s175_s4 = sshll.u32 %s3399_s12, 4  ;;  %s176_s4 = int_to_ptr.vmem [resolvable:$true] %s175_s4 }
  0x30   :  { %181 = dma.hbm_to_vmem [thread:$0]  %s174_s1, 512, %s176_s4, [#allocation23], %s3387_s22, %s3387_s22, %s3388_s23  }
  0x31   :  { %3371 = dma.done.wait [#allocation8], 16  }
  0x32   :  { %3372 = vsyncadd [#allocation8], 4294967280 }
  0x33   :  { %3373 = dma.done.wait [#allocation11], 48  }
  0x34   :  { %3374 = vsyncadd [#allocation11], 4294967248 }
  0x35   :  { %3375 = dma.done.wait [#allocation14], 528  }
  0x36   :  { %3376 = vsyncadd [#allocation14], 4294966768 }
  0x37   :  { %3377 = dma.done.wait [#allocation17], 528  }
  0x38   :  { %3378 = vsyncadd [#allocation17], 4294966768 }
  0x39   :  { %3379 = dma.done.wait [#allocation20], 64  }
  0x3a   :  { %3380 = vsyncadd [#allocation20], 4294967232 }
  0x3b   :  { %3381 = dma.done.wait [#allocation23], 1024  }
  0x3c   :  { %3382 = vsyncadd [#allocation23], 4294966272  ;;  %s4305_s11 = sld [smem:[#allocation35_spill]]  ;;  %vm244_vm0 = vcmask 261120   ;;  %v3606_v10 = vld [vmem:[%s4277_s6 + $0x18] sm:$0xff]  ;;  %v3611_v11 = vld [vmem:[%s4277_s6 + $0x10] sm:$0xff] }
  0x3d   :  { %s4306_s30 = sld [smem:[#allocation37_spill]]  ;;  %388 = vmatpush.msra.mxu3 %v3606_v10  ;;  %v3618_v12 = vld [vmem:[%s4277_s6 + $0x8] sm:$0xff]  ;;  %v3624_v13 = vld [vmem:[%s4277_s6] sm:$0xff]  ;;  %v3630_v14 = vld [vmem:[%s4277_s6 + $0x38] sm:$0xff]  ;;  %vm362_vm1 = vcmask 36864   ;;  %vm400_vm2 = vcmask 1044480  }
  0x3e   :  { %s4307_s29 = sld [smem:[#allocation33_spill]]  ;;  %v3636_v15 = vld [vmem:[%s4277_s6 + $0x30] sm:$0xff]  ;;  %v3642_v16 = vld [vmem:[%s4277_s6 + $0x28] sm:$0xff]  ;;  %v3650_v18 = vld [vmem:[%s4277_s6 + $0x20] sm:$0xff]  ;;  %vm396_vm3 = vcmask 39936   ;;  %vm424_vm4 = vcmask 258048  }
  0x3f   :  { %389 = vmatpush.msra.mxu3 %v3611_v11  ;;  %v3655_v19 = vld [vmem:[#allocation7] ss:$0 sm:$0xff]  ;;  %v3657_v20 = vld [vmem:[#allocation10] ss:$0 sm:$0xff]  ;;  %v3400_v42 = vmov 32.0   ;;  %vm289_vm6 = vcmask 259072  }
  0x40   :  { %s4308_s0 = sld [smem:[#allocation34_spill]]  ;;  %s3404_s1 = smov [#allocation25]  }
  0x41   :  { %390 = vmatpush.msra.mxu3 %v3618_v12  ;;  %s2787_s12 = sshll.u32 %s3404_s1, 4  ;;  %s2789_s15 = sshll.u32 %s4292_s21, 4  ;;  %s2788_s12 = int_to_ptr.vmem [resolvable:$true] %s2787_s12  ;;  %s2790_s15 = int_to_ptr.hbm [resolvable:$true] %s2789_s15 }
  0x42   :  { %v239_v0 = vld [vmem:[%s4305_s11 + $0x18] sm:$0xff]  ;;  %v238_v2 = vld [vmem:[%s4305_s11 + $0x10] sm:$0xff]  ;;  %v237_v4 = vld [vmem:[%s4305_s11 + $0x8] sm:$0xff] }
  0x43   :  { %v294_v1 = vld [vmem:[%s4306_s30 + $0x18] sm:$0xff]  ;;  %269 = vmatpush.msra.mxu0 %v239_v0  ;;  %v293_v3 = vld [vmem:[%s4306_s30 + $0x10] sm:$0xff]  ;;  %v292_v5 = vld [vmem:[%s4306_s30 + $0x8] sm:$0xff]  ;;  %391 = vmatpush.msra.mxu3 %v3624_v13 }
  0x44   :  { %311 = vmatpush.msra.mxu1 %v294_v1  ;;  %v236_v6 = vld [vmem:[%s4305_s11] sm:$0xff]  ;;  %v233_v9 = vld [vmem:[%s4307_s29 + $0x8] sm:$0xff]  ;;  %v234_v43 = vld [vmem:[%s4307_s29 + $0x10] sm:$0xff] }
  0x45   :  { %270 = vmatpush.msra.mxu0 %v238_v2  ;;  %v291_v7 = vld [vmem:[%s4306_s30] sm:$0xff]  ;;  %485 = vmatpush.msrb.mxu3 %v3630_v14  ;;  %v235_v47 = vld [vmem:[%s4307_s29 + $0x18] sm:$0x3f] }
  0x46   :  { %312 = vmatpush.msra.mxu1 %v293_v3  ;;  %v232_v8 = vld [vmem:[%s4307_s29] sm:$0xff] }
  0x47   :  { %271 = vmatpush.msra.mxu0 %v237_v4  ;;  %486 = vmatpush.msrb.mxu3 %v3636_v15  ;;  %v332_v17 = vld [vmem:[%s4307_s29] sm:$0x1f] }
  0x48   :  { %313 = vmatpush.msra.mxu1 %v292_v5  ;;  %2814 = vmatmul.msk.f32.vlgmr.msra.gmra.mxu3 %vm244_vm0, %v332_v17 }
  0x49   :  { %272 = vmatpush.msra.mxu0 %v236_v6  ;;  %487 = vmatpush.msrb.mxu3 %v3642_v16 }
  0x4a   :  { %314 = vmatpush.msra.mxu1 %v291_v7  ;;  %2804 = vmatmul.msk.f32.vlgmr.msra.gmra.mxu0 %vm244_vm0, %v232_v8 }
  0x4b   :  { %2808 = vmatmul.msk.f32.vlgmr.msra.gmra.mxu1 %vm244_vm0, %v232_v8  ;;  %488 = vmatpush.msrb.mxu3 %v3650_v18 }
  0x52   :  { %2805 = vmatmul.msk.f32.gmra.mxu0 %vm244_vm0, %v233_v9 }
  0x53   :  { %2809 = vmatmul.msk.f32.gmra.mxu1 %vm244_vm0, %v233_v9 }
  0x5a   :  { %2806 = vmatmul.msk.f32.gmra.mxu0 %vm244_vm0, %v234_v43 }
  0x5b   :  { %2810 = vmatmul.msk.f32.gmra.mxu1 %vm244_vm0, %v234_v43 }
  0x62   :  { %2807 = vmatmul.msk.f32.gmra.mxu0 %vm244_vm0, %v235_v47 }
  0x63   :  { %2811 = vmatmul.msk.f32.gmra.mxu1 %vm244_vm0, %v235_v47 }
  0xc7   :  { %v274_v21 = vpop.f32.mrf.mxu0 }
  0xc8   :  { %v316_v22 = vpop.f32.mrf.mxu1  ;;  %v275_v23 = vadd.f32 %v3655_v19, %v274_v21  ;;  %v2971_v21 = vld [vmem:[#allocation12] ss:$0 sm:$0xff] }
  0xc9   :  { %v317_v24 = vadd.f32 %v3657_v20, %v316_v22 }
  0xca   :  { %286 = vst.msk [vmem:[#allocation2] sm:$0xff] %vm244_vm0, %v275_v23 }
  0xcb   :  { %328 = vst.msk [vmem:[#allocation3] sm:$0xff] %vm244_vm0, %v317_v24  ;;  %v393_v35 = vpop.f32.mrf.mxu3  ;;  %v2972_v24 = vld [vmem:[%s4279_s8] ss:$0 sm:$0xff] }
  0xcf   :  { %v277_v25 = vpop.f32.mrf.mxu0 }
  0xd0   :  { %v319_v26 = vpop.f32.mrf.mxu1  ;;  %v278_v27 = vadd.f32 %v3655_v19, %v277_v25 }
  0xd1   :  { %v320_v28 = vadd.f32 %v3657_v20, %v319_v26  ;;  %v333_v30 = vld [vmem:[#allocation2] sm:$0x1f] }
  0xd2   :  { %287 = vst.msk [vmem:[#allocation2 + $0x8] sm:$0xff] %vm244_vm0, %v278_v27  ;;  %v334_v29 = vld [vmem:[#allocation3] sm:$0x1f] }
  0xd3   :  { %329 = vst.msk [vmem:[#allocation3 + $0x8] sm:$0xff] %vm244_vm0, %v320_v28  ;;  %2812 = vmatpush.xpose.msk.msra.mxu2 %vm244_vm0, %v334_v29 }
  0xd6   :  { %2813 = vmatmul.msk.f32.vlgmr.msra.gmra.mxu2 %vm244_vm0, %v333_v30  ;;  %v568_v30 = vld [vmem:[%s4307_s29 + $0x5] sm:$0x1f] }
  0xd7   :  { %2815 = vmatpush.msk.msrb.mxu2 %vm400_vm2, %v393_v35  ;;  %v280_v60 = vpop.f32.mrf.mxu0 }
  0xd8   :  { %v322_v58 = vpop.f32.mrf.mxu1  ;;  %v281_v63 = vadd.f32 %v3655_v19, %v280_v60 }
  0xd9   :  { %v783_v50 = vld [vmem:[#allocation2 + $0xa] sm:$0x1f]  ;;  %v323_v59 = vadd.f32 %v3657_v20, %v322_v58  ;;  %v569_v28 = vld [vmem:[#allocation2 + $0x5] sm:$0x1f] }
  0xda   :  { %v570_v31 = vld [vmem:[#allocation3 + $0x5] sm:$0x1f]  ;;  %v784_v44 = vld [vmem:[#allocation3 + $0xa] sm:$0x1f]  ;;  %288 = vst.msk [vmem:[#allocation2 + $0x10] sm:$0xff] %vm244_vm0, %v281_v63 }
  0xdb   :  { %2825 = vmatpush.xpose.msk.msra.mxu3 %vm244_vm0, %v570_v31  ;;  %2838 = vmatpush.xpose.msk.msrb.mxu1 %vm244_vm0, %v784_v44  ;;  %330 = vst.msk [vmem:[#allocation3 + $0x10] sm:$0xff] %vm244_vm0, %v323_v59 }
  0xde   :  { %2839 = vmatmul.msk.f32.vlgmr.msrb.gmra.mxu1 %vm244_vm0, %v783_v50 }
  0xdf   :  { %v283_v58 = vpop.f32.mrf.mxu0 }
  0xe0   :  { %v325_v61 = vpop.f32.mrf.mxu1  ;;  %v284_v59 = vadd.f32 %v3655_v19, %v283_v58 }
  0xe1   :  { %v326_v0 = vadd.f32 %v3657_v20, %v325_v61 }
  0xe2   :  { %290 = vst.msk [vmem:[#allocation2 + $0x18] sm:$0x3f] %vm289_vm6, %v284_v59 }
  0xe3   :  { %331 = vst.msk [vmem:[#allocation3 + $0x18] sm:$0x3f] %vm289_vm6, %v326_v0 }
  0xea   :  { %v1426_v59 = vld [vmem:[#allocation3 + $0x19] sm:$0x1f] }
 0x159   :  { %v358_v32 = vpop.f32.mrf.mxu2 }
 0x15a   :  { %v361_v33 = vmul.f32 %v358_v32, %v358_v32 }
 0x15b   :  { %v808_v3 = vpop.f32.mrf.mxu1 }
 0x15c   :  { %v363_v34 = vsel %vm362_vm1, %v361_v33, 0.0  ;;  %v3700_v4 = vmul.f32 %v808_v3, %v808_v3  ;;  %v2973_v3 = vld [vmem:[#allocation12] ss:$0 sm:$0xff] }
 0x15d   :  { %364 = vadd.xlane.f32.xlu0 %v363_v34 }
 0x15e   :  { %v812_v5 = vsel %vm362_vm1, %v3700_v4, 0.0 }
 0x1d0   :  { %v365_v36 = vpop.xlane.xlu0 %364 }
 0x1d1   :  { %v366_v37 = vmax.f32 %v365_v36, 1e-12 }
 0x1d3   :  { %3015 = vrcp.f32 %v366_v37 }
 0x1d4   :  { %3017 = vrcp.f32 %v3400_v42  ;;  %v997_v42 = vld [vmem:[#allocation2 + $0xf] sm:$0x1f] }
 0x1d9   :  { %v3016_v38 = vpop.eup %3015 }
 0x1da   :  { %v3672_v39 = vmul.f32 %v3016_v38, %v361_v33  ;;  %v3018_v45 = vpop.eup %3017 }
 0x1db   :  { %v429_v46 = vmul.f32 32.0, %v3018_v45  ;;  %vm433_vm5 = vweird.f32 %v3018_v45 }
 0x1dc   :  { %2816 = vmatmul.msk.f32.vlgmr.msrb.gmra.mxu2 %vm396_vm3, %v3672_v39 }
 0x1dd   :  { %v430_v48 = vsub.f32 1.0, %v429_v46 }
 0x1df   :  { %v431_v49 = vmul.f32 %v3018_v45, %v430_v48 }
 0x1e1   :  { %v432_v51 = vadd.f32 %v3018_v45, %v431_v49 }
 0x1e3   :  { %v3689_v52 = vsel %vm433_vm5, %v3018_v45, %v432_v51 }
 0x25f   :  { %v421_v40 = vpop.f32.mrf.mxu2 }
 0x260   :  { %v425_v41 = vsel %vm424_vm4, %v421_v40, 0.0 }
 0x261   :  { %426 = vadd.xlane.f32.xlu0 %v425_v41  ;;  %v998_v41 = vld [vmem:[#allocation3 + $0xf] sm:$0x1f] }
 0x269   :  { %813 = vadd.xlane.f32.xlu0 %v812_v5 }
 0x2d4   :  { %v427_v53 = vpop.xlane.xlu0 %426 }
 0x2d5   :  { %v435_v54 = vmul.f32 %v3689_v52, %v427_v53 }
 0x2d7   :  { %v436_v55 = vsub.f32 %v421_v40, %v435_v54  ;;  %v782_v40 = vld [vmem:[%s4307_s29 + $0xa] sm:$0x1f] }
 0x2d9   :  { %v437_v56 = vmul.f32 %v436_v55, %v436_v55 }
 0x2db   :  { %v438_v57 = vsel %vm424_vm4, %v437_v56, 0.0 }
 0x2dc   :  { %439 = vadd.xlane.f32.xlu1 %v438_v57 }
 0x34f   :  { %v440_v62 = vpop.xlane.xlu1 %439 }
 0x350   :  { %v441_v1 = vmul.f32 %v440_v62, %v3689_v52 }
 0x352   :  { %v442_v2 = vadd.f32 1e-05, %v441_v1 }
 0x354   :  { %3019 = vrsqrt.f32 %v442_v2  ;;  %vm449_vm8 = vweird.f32 %v442_v2 }
 0x35a   :  { %v3020_v6 = vpop.eup %3019 }
 0x35b   :  { %v444_v7 = vmul.f32 %v3020_v6, %v442_v2  ;;  %vm450_vm7 = vweird.f32 %v3020_v6  ;;  %v814_v2 = vpop.xlane.xlu0 %813 }
 0x35c   :  { %vm451_vm9 = vmor %vm449_vm8, %vm450_vm7  ;;  %v815_v19 = vmax.f32 %v814_v2, 1e-12 }
 0x35d   :  { %v445_v8 = vmul.f32 %v3020_v6, %v444_v7  ;;  %v2974_v7 = vld [vmem:[%s4279_s8] ss:$0 sm:$0xff] }
 0x35f   :  { %v446_v9 = vmul.f32 0.5, %v445_v8 }
 0x361   :  { %v447_v17 = vsub.f32 1.5, %v446_v9 }
 0x363   :  { %v448_v20 = vmul.f32 %v3020_v6, %v447_v17 }
 0x365   :  { %v452_v22 = vsel %vm451_vm9, %v3020_v6, %v448_v20 }
 0x366   :  { %v453_v23 = vmul.f32 %v452_v22, %v436_v55  ;;  %v1212_v22 = vld [vmem:[#allocation3 + $0x14] sm:$0x1f] }
 0x368   :  { %v458_v25 = vmul.f32 %v2971_v21, %v453_v23  ;;  %v996_v23 = vld [vmem:[%s4307_s29 + $0xf] sm:$0x1f] }
 0x36a   :  { %v463_v26 = vadd.f32 %v2972_v24, %v458_v25  ;;  %v1211_v24 = vld [vmem:[#allocation2 + $0x14] sm:$0x1f] }
 0x36c   :  { %v464_v27 = vmax.f32 %v463_v26, 0.0 }
 0x36e   :  { %2821 = vmatmul.msk.f32.vlgmr.msrb.gmra.mxu3 %vm244_vm0, %v464_v27 }
 0x376   :  { %2826 = vmatmul.msk.f32.vlgmr.msra.gmra.mxu3 %vm244_vm0, %v569_v28 }
 0x3f1   :  { %v490_v29 = vpop.f32.mrf.mxu3 }
 0x3f2   :  { %2822 = vmatpush.msk.msra.mxu2 %vm400_vm2, %v490_v29 }
 0x3f3   :  { %2823 = vmatmul.msk.f32.vlgmr.msra.gmra.mxu2 %vm396_vm3, %v3672_v39 }
 0x3f4   :  { %623 = vmatpush.msrb.mxu2 %v3606_v10 }
 0x3f6   :  { %624 = vmatpush.msrb.mxu2 %v3611_v11 }
 0x3f8   :  { %625 = vmatpush.msrb.mxu2 %v3618_v12 }
 0x3f9   :  { %v594_v31 = vpop.f32.mrf.mxu3 }
 0x3fa   :  { %v597_v32 = vmul.f32 %v594_v31, %v594_v31  ;;  %626 = vmatpush.msrb.mxu2 %v3624_v13 }
 0x3fb   :  { %2827 = vmatmul.msk.f32.vlgmr.msrb.gmra.mxu2 %vm244_vm0, %v568_v30 }
 0x3fc   :  { %v598_v33 = vsel %vm362_vm1, %v597_v32, 0.0  ;;  %709 = vmatpush.msra.mxu2 %v3630_v14 }
 0x3fd   :  { %599 = vadd.xlane.f32.xlu1 %v598_v33 }
 0x3fe   :  { %710 = vmatpush.msra.mxu2 %v3636_v15 }
 0x400   :  { %711 = vmatpush.msra.mxu2 %v3642_v16 }
 0x402   :  { %712 = vmatpush.msra.mxu2 %v3650_v18 }
 0x470   :  { %v600_v34 = vpop.xlane.xlu1 %599 }
 0x471   :  { %v601_v35 = vmax.f32 %v600_v34, 1e-12 }
 0x473   :  { %3021 = vrcp.f32 %v601_v35 }
 0x476   :  { %v3725_v36 = vpop.f32.mrf.mxu2 }
 0x479   :  { %v3022_v37 = vpop.eup %3021 }
 0x47a   :  { %v3727_v38 = vmul.f32 %v3022_v37, %v597_v32 }
 0x47e   :  { %v628_v39 = vpop.f32.mrf.mxu2 }
 0x47f   :  { %2828 = vmatpush.msk.msrb.mxu3 %vm400_vm2, %v628_v39 }
 0x480   :  { %2829 = vmatmul.msk.f32.vlgmr.msrb.gmra.mxu3 %vm396_vm3, %v3727_v38 }
 0x481   :  { %837 = vmatpush.msra.mxu3 %v3606_v10 }
 0x483   :  { %838 = vmatpush.msra.mxu3 %v3611_v11 }
 0x485   :  { %839 = vmatpush.msra.mxu3 %v3618_v12 }
 0x487   :  { %840 = vmatpush.msra.mxu3 %v3624_v13 }
 0x488   :  { %2840 = vmatmul.msk.f32.vlgmr.msra.gmra.mxu3 %vm244_vm0, %v782_v40 }
 0x489   :  { %2851 = vmatpush.xpose.msk.msrb.mxu3 %vm244_vm0, %v998_v41 }
 0x490   :  { %2852 = vmatmul.msk.f32.vlgmr.msrb.gmra.mxu3 %vm244_vm0, %v997_v42 }
 0x503   :  { %v654_v43 = vpop.f32.mrf.mxu3 }
 0x504   :  { %v657_v44 = vsel %vm424_vm4, %v654_v43, 0.0 }
 0x505   :  { %658 = vadd.xlane.f32.xlu2 %v657_v44 }
 0x50b   :  { %v842_v45 = vpop.f32.mrf.mxu3 }
 0x50c   :  { %2841 = vmatpush.msk.msrb.mxu2 %vm400_vm2, %v842_v45 }
 0x513   :  { %v1022_v46 = vpop.f32.mrf.mxu3 }
 0x514   :  { %v3744_v47 = vmul.f32 %v1022_v46, %v1022_v46 }
 0x516   :  { %v1026_v48 = vsel %vm362_vm1, %v3744_v47, 0.0 }
 0x517   :  { %1027 = vadd.xlane.f32.xlu0 %v1026_v48  ;;  %v2975_v48 = vld [vmem:[#allocation12] ss:$0 sm:$0xff] }
 0x578   :  { %v659_v49 = vpop.xlane.xlu2 %658 }
 0x579   :  { %v660_v50 = vmul.f32 %v659_v49, %v3689_v52 }
 0x57b   :  { %v661_v51 = vsub.f32 %v654_v43, %v660_v50 }
 0x57d   :  { %v662_v53 = vmul.f32 %v661_v51, %v661_v51 }
 0x57f   :  { %v663_v54 = vsel %vm424_vm4, %v662_v53, 0.0 }
 0x580   :  { %664 = vadd.xlane.f32.xlu2 %v663_v54 }
 0x58a   :  { %v1028_v46 = vpop.xlane.xlu0 %1027 }
 0x58b   :  { %v1029_v53 = vmax.f32 %v1028_v46, 1e-12 }
 0x5f3   :  { %v665_v55 = vpop.xlane.xlu2 %664 }
 0x5f4   :  { %v666_v56 = vmul.f32 %v665_v55, %v3689_v52 }
 0x5f6   :  { %v667_v57 = vadd.f32 1e-05, %v666_v56 }
 0x5f8   :  { %3023 = vrsqrt.f32 %v667_v57  ;;  %vm674_vm11 = vweird.f32 %v667_v57 }
 0x5f9   :  { %3025 = vrcp.f32 %v815_v19 }
 0x5fe   :  { %v3024_v60 = vpop.eup %3023 }
 0x5ff   :  { %v669_v61 = vmul.f32 %v3024_v60, %v667_v57  ;;  %vm675_vm10 = vweird.f32 %v3024_v60  ;;  %v3026_v20 = vpop.eup %3025 }
 0x600   :  { %vm676_vm12 = vmor %vm674_vm11, %vm675_vm10  ;;  %v3761_v21 = vmul.f32 %v3026_v20, %v3700_v4  ;;  %vm566_vm11 = vcmask 253952  }
 0x601   :  { %v670_v62 = vmul.f32 %v3024_v60, %v669_v61  ;;  %v1425_v61 = vld [vmem:[#allocation2 + $0x19] sm:$0x1f] }
 0x603   :  { %v671_v63 = vmul.f32 0.5, %v670_v62 }
 0x605   :  { %v672_v0 = vsub.f32 1.5, %v671_v63 }
 0x607   :  { %v673_v1 = vmul.f32 %v3024_v60, %v672_v0 }
 0x609   :  { %v677_v5 = vsel %vm676_vm12, %v3024_v60, %v673_v1  ;;  %v1210_v60 = vld [vmem:[%s4307_s29 + $0x14] sm:$0x1f] }
 0x60a   :  { %v678_v6 = vmul.f32 %v677_v5, %v661_v51  ;;  %v2976_v51 = vld [vmem:[%s4279_s8] ss:$0 sm:$0xff] }
 0x60c   :  { %v683_v8 = vmul.f32 %v2973_v3, %v678_v6 }
 0x60e   :  { %v688_v9 = vadd.f32 %v2974_v7, %v683_v8 }
 0x610   :  { %v689_v17 = vmax.f32 %v688_v9, 0.0 }
 0x612   :  { %2834 = vmatmul.msk.f32.vlgmr.msra.gmra.mxu2 %vm244_vm0, %v689_v17 }
 0x613   :  { %1051 = vmatpush.msra.mxu2 %v3606_v10 }
 0x615   :  { %1052 = vmatpush.msra.mxu2 %v3611_v11 }
 0x617   :  { %1053 = vmatpush.msra.mxu2 %v3618_v12 }
 0x619   :  { %1054 = vmatpush.msra.mxu2 %v3624_v13 }
 0x61a   :  { %2842 = vmatmul.msk.f32.vlgmr.msrb.gmra.mxu2 %vm396_vm3, %v3761_v21 }
 0x61b   :  { %2864 = vmatpush.xpose.msk.msrb.mxu2 %vm244_vm0, %v1212_v22 }
 0x622   :  { %2853 = vmatmul.msk.f32.vlgmr.msra.gmra.mxu2 %vm244_vm0, %v996_v23 }
 0x62a   :  { %2865 = vmatmul.msk.f32.vlgmr.msrb.gmra.mxu2 %vm244_vm0, %v1211_v24 }
 0x695   :  { %v714_v25 = vpop.f32.mrf.mxu2 }
 0x696   :  { %2835 = vmatpush.msk.msrb.mxu0 %vm400_vm2, %v714_v25 }
 0x697   :  { %2836 = vmatmul.msk.f32.vlgmr.msrb.gmra.mxu0 %vm396_vm3, %v3727_v38 }
 0x698   :  { %923 = vmatpush.msra.mxu0 %v3630_v14 }
 0x69a   :  { %924 = vmatpush.msra.mxu0 %v3636_v15 }
 0x69c   :  { %925 = vmatpush.msra.mxu0 %v3642_v16 }
 0x69d   :  { %v868_v4 = vpop.f32.mrf.mxu2 }
 0x69e   :  { %v871_v26 = vsel %vm424_vm4, %v868_v4, 0.0  ;;  %926 = vmatpush.msra.mxu0 %v3650_v18 }
 0x69f   :  { %872 = vadd.xlane.f32.xlu1 %v871_v26 }
 0x6a5   :  { %v1056_v27 = vpop.f32.mrf.mxu2 }
 0x6a6   :  { %2854 = vmatpush.msk.msrb.mxu0 %vm400_vm2, %v1056_v27 }
 0x6ad   :  { %v1236_v28 = vpop.f32.mrf.mxu2 }
 0x6ae   :  { %v3781_v29 = vmul.f32 %v1236_v28, %v1236_v28 }
 0x6b0   :  { %v1240_v30 = vsel %vm362_vm1, %v3781_v29, 0.0 }
 0x6b1   :  { %1241 = vadd.xlane.f32.xlu0 %v1240_v30 }
 0x712   :  { %v873_v31 = vpop.xlane.xlu1 %872 }
 0x713   :  { %v874_v32 = vmul.f32 %v873_v31, %v3689_v52 }
 0x714   :  { %v3807_v62 = vpop.f32.mrf.mxu0 }
 0x715   :  { %v875_v33 = vsub.f32 %v868_v4, %v874_v32 }
 0x717   :  { %v876_v34 = vmul.f32 %v875_v33, %v875_v33 }
 0x719   :  { %v877_v35 = vsel %vm424_vm4, %v876_v34, 0.0 }
 0x71a   :  { %878 = vadd.xlane.f32.xlu2 %v877_v35 }
 0x78d   :  { %v879_v37 = vpop.xlane.xlu2 %878 }
 0x78e   :  { %v880_v38 = vmul.f32 %v879_v37, %v3689_v52 }
 0x790   :  { %v881_v39 = vadd.f32 1e-05, %v880_v38  ;;  %v2977_v38 = vld [vmem:[#allocation12] ss:$0 sm:$0xff] }
 0x792   :  { %3027 = vrsqrt.f32 %v881_v39  ;;  %vm888_vm14 = vweird.f32 %v881_v39 }
 0x793   :  { %3029 = vrcp.f32 %v1029_v53 }
 0x798   :  { %v3028_v40 = vpop.eup %3027 }
 0x799   :  { %v883_v41 = vmul.f32 %v3028_v40, %v881_v39  ;;  %vm889_vm13 = vweird.f32 %v3028_v40  ;;  %v3030_v57 = vpop.eup %3029 }
 0x79a   :  { %vm890_vm15 = vmor %vm888_vm14, %vm889_vm13  ;;  %v3796_v58 = vmul.f32 %v3030_v57, %v3744_v47 }
 0x79b   :  { %v884_v42 = vmul.f32 %v3028_v40, %v883_v41  ;;  %v2978_v41 = vld [vmem:[%s4279_s8] ss:$0 sm:$0xff] }
 0x79d   :  { %v885_v43 = vmul.f32 0.5, %v884_v42 }
 0x79f   :  { %v886_v44 = vsub.f32 1.5, %v885_v43 }
 0x7a1   :  { %v887_v45 = vmul.f32 %v3028_v40, %v886_v44 }
 0x7a3   :  { %v891_v49 = vsel %vm890_vm15, %v3028_v40, %v887_v45 }
 0x7a4   :  { %v892_v50 = vmul.f32 %v891_v49, %v875_v33 }
 0x7a6   :  { %v897_v54 = vmul.f32 %v2975_v48, %v892_v50 }
 0x7a8   :  { %v902_v55 = vadd.f32 %v2976_v51, %v897_v54 }
 0x7aa   :  { %v903_v56 = vmax.f32 %v902_v55, 0.0  ;;  %v3401_v55 = vmov 5.0  }
 0x7ac   :  { %2847 = vmatmul.msk.f32.vlgmr.msra.gmra.mxu0 %vm244_vm0, %v903_v56  ;;  %v2979_v56 = vld [vmem:[#allocation12 + $0x1] ss:$0 sm:$0xff] }
 0x7ad   :  { %1265 = vmatpush.msra.mxu0 %v3606_v10 }
 0x7af   :  { %1266 = vmatpush.msra.mxu0 %v3611_v11 }
 0x7b1   :  { %1267 = vmatpush.msra.mxu0 %v3618_v12 }
 0x7b3   :  { %1268 = vmatpush.msra.mxu0 %v3624_v13 }
 0x7b4   :  { %2855 = vmatmul.msk.f32.vlgmr.msrb.gmra.mxu0 %vm396_vm3, %v3796_v58 }
 0x7b5   :  { %2877 = vmatpush.xpose.msk.msrb.mxu0 %vm244_vm0, %v1426_v59  ;;  %v2980_v59 = vld [vmem:[%s4279_s8 + $0x1] ss:$0 sm:$0xff] }
 0x7bc   :  { %2866 = vmatmul.msk.f32.vlgmr.msra.gmra.mxu0 %vm244_vm0, %v1210_v60 }
 0x7c4   :  { %2878 = vmatmul.msk.f32.vlgmr.msrb.gmra.mxu0 %vm244_vm0, %v1425_v61 }
 0x829   :  { %v928_v47 = vpop.f32.mrf.mxu0 }
 0x82a   :  { %2848 = vmatpush.msk.msra.mxu1 %vm400_vm2, %v928_v47 }
 0x82b   :  { %2849 = vmatmul.msk.f32.vlgmr.msra.gmra.mxu1 %vm396_vm3, %v3761_v21  ;;  %v1242_v21 = vpop.xlane.xlu0 %1241 }
 0x82c   :  { %1137 = vmatpush.msrb.mxu1 %v3630_v14  ;;  %v1243_v42 = vmax.f32 %v1242_v21, 1e-12 }
 0x82e   :  { %1138 = vmatpush.msrb.mxu1 %v3636_v15 }
 0x830   :  { %1139 = vmatpush.msrb.mxu1 %v3642_v16 }
 0x831   :  { %v1082_v63 = vpop.f32.mrf.mxu0 }
 0x832   :  { %v1085_v0 = vsel %vm424_vm4, %v1082_v63, 0.0  ;;  %1140 = vmatpush.msrb.mxu1 %v3650_v18 }
 0x833   :  { %1086 = vadd.xlane.f32.xlu1 %v1085_v0 }
 0x839   :  { %v1270_v1 = vpop.f32.mrf.mxu0 }
 0x83a   :  { %2867 = vmatpush.msk.msra.mxu1 %vm400_vm2, %v1270_v1 }
 0x841   :  { %v1450_v2 = vpop.f32.mrf.mxu0 }
 0x842   :  { %v3818_v3 = vmul.f32 %v1450_v2, %v1450_v2 }
 0x844   :  { %v1454_v5 = vsel %vm362_vm1, %v3818_v3, 0.0 }
 0x845   :  { %1455 = vadd.xlane.f32.xlu0 %v1454_v5 }
 0x8a6   :  { %v1087_v6 = vpop.xlane.xlu1 %1086 }
 0x8a7   :  { %v1088_v7 = vmul.f32 %v1087_v6, %v3689_v52 }
 0x8a8   :  { %v951_v19 = vpop.f32.mrf.mxu1 }
 0x8a9   :  { %v1089_v8 = vsub.f32 %v1082_v63, %v1088_v7  ;;  %v954_v9 = vsel %vm424_vm4, %v951_v19, 0.0 }
 0x8aa   :  { %955 = vadd.xlane.f32.xlu0 %v954_v9 }
 0x8ab   :  { %v1090_v17 = vmul.f32 %v1089_v8, %v1089_v8 }
 0x8ad   :  { %v1091_v20 = vsel %vm424_vm4, %v1090_v17, 0.0 }
 0x8ae   :  { %1092 = vadd.xlane.f32.xlu2 %v1091_v20 }
 0x8b8   :  { %v3825_v22 = vpop.xlane.xlu0 %1455 }
 0x91d   :  { %v956_v23 = vpop.xlane.xlu0 %955 }
 0x91e   :  { %v957_v24 = vmul.f32 %v956_v23, %v3689_v52 }
 0x920   :  { %v958_v25 = vsub.f32 %v951_v19, %v957_v24 }
 0x921   :  { %v1093_v4 = vpop.xlane.xlu2 %1092 }
 0x922   :  { %v1094_v26 = vmul.f32 %v1093_v4, %v3689_v52  ;;  %v959_v27 = vmul.f32 %v958_v25, %v958_v25 }
 0x924   :  { %v1095_v28 = vadd.f32 1e-05, %v1094_v26  ;;  %v960_v30 = vsel %vm424_vm4, %v959_v27, 0.0 }
 0x925   :  { %961 = vadd.xlane.f32.xlu0 %v960_v30 }
 0x926   :  { %3031 = vrsqrt.f32 %v1095_v28  ;;  %vm1102_vm5 = vweird.f32 %v1095_v28 }
 0x927   :  { %3033 = vrcp.f32 %v1243_v42 }
 0x92c   :  { %v3032_v31 = vpop.eup %3031 }
 0x92d   :  { %v1097_v32 = vmul.f32 %v3032_v31, %v1095_v28  ;;  %vm1103_vm1 = vweird.f32 %v3032_v31  ;;  %v3034_v46 = vpop.eup %3033 }
 0x92e   :  { %vm1104_vm6 = vmor %vm1102_vm5, %vm1103_vm1  ;;  %v3838_v48 = vmul.f32 %v3034_v46, %v3781_v29 }
 0x92f   :  { %v1098_v33 = vmul.f32 %v3032_v31, %v1097_v32 }
 0x931   :  { %v1099_v34 = vmul.f32 0.5, %v1098_v33  ;;  %v740_v33 = vsel %vm424_vm4, %v3807_v62, 0.0 }
 0x933   :  { %v1100_v35 = vsub.f32 1.5, %v1099_v34 }
 0x935   :  { %v1101_v37 = vmul.f32 %v3032_v31, %v1100_v35 }
 0x937   :  { %v1105_v39 = vsel %vm1104_vm6, %v3032_v31, %v1101_v37 }
 0x938   :  { %v1106_v40 = vmul.f32 %v1105_v39, %v1089_v8 }
 0x93a   :  { %v1111_v43 = vmul.f32 %v2977_v38, %v1106_v40 }
 0x93c   :  { %v1116_v44 = vadd.f32 %v2978_v41, %v1111_v43 }
 0x93e   :  { %v1117_v45 = vmax.f32 %v1116_v44, 0.0 }
 0x940   :  { %2860 = vmatmul.msk.f32.vlgmr.msrb.gmra.mxu1 %vm244_vm0, %v1117_v45 }
 0x941   :  { %1479 = vmatpush.msrb.mxu1 %v3606_v10 }
 0x943   :  { %1480 = vmatpush.msrb.mxu1 %v3611_v11 }
 0x945   :  { %1481 = vmatpush.msrb.mxu1 %v3618_v12 }
 0x947   :  { %1482 = vmatpush.msrb.mxu1 %v3624_v13 }
 0x948   :  { %2868 = vmatmul.msk.f32.vlgmr.msra.gmra.mxu1 %vm396_vm3, %v3838_v48 }
 0x998   :  { %v962_v49 = vpop.xlane.xlu0 %961 }
 0x999   :  { %v963_v50 = vmul.f32 %v962_v49, %v3689_v52 }
 0x99b   :  { %v964_v51 = vadd.f32 1e-05, %v963_v50 }
 0x99d   :  { %3035 = vrsqrt.f32 %v964_v51  ;;  %vm971_vm8 = vweird.f32 %v964_v51 }
 0x99e   :  { %3037 = vrcp.f32 %v3401_v55 }
 0x9a3   :  { %v3036_v53 = vpop.eup %3035 }
 0x9a4   :  { %v966_v10 = vmul.f32 %v3036_v53, %v964_v51  ;;  %vm972_vm7 = vweird.f32 %v3036_v53  ;;  %v3038_v13 = vpop.eup %3037 }
 0x9a5   :  { %vm973_vm9 = vmor %vm971_vm8, %vm972_vm7  ;;  %v559_v61 = vmul.f32 5.0, %v3038_v13  ;;  %vm563_vm10 = vweird.f32 %v3038_v13 }
 0x9a6   :  { %v967_v54 = vmul.f32 %v3036_v53, %v966_v10 }
 0x9a7   :  { %v560_v0 = vsub.f32 1.0, %v559_v61 }
 0x9a8   :  { %v968_v11 = vmul.f32 0.5, %v967_v54 }
 0x9a9   :  { %v561_v6 = vmul.f32 %v3038_v13, %v560_v0  ;;  %v2982_v0 = vld [vmem:[#allocation12 + $0x1] ss:$0 sm:$0xff] }
 0x9aa   :  { %v969_v12 = vsub.f32 1.5, %v968_v11 }
 0x9ab   :  { %v562_v8 = vadd.f32 %v3038_v13, %v561_v6 }
 0x9ac   :  { %v970_v29 = vmul.f32 %v3036_v53, %v969_v12  ;;  %v2981_v12 = vld [vmem:[#allocation12] ss:$0 sm:$0xff] }
 0x9ad   :  { %v3852_v21 = vsel %vm563_vm10, %v3038_v13, %v562_v8  ;;  %v2984_v13 = vld [vmem:[%s4279_s8] ss:$0 sm:$0xff] }
 0x9ae   :  { %v974_v57 = vsel %vm973_vm9, %v3036_v53, %v970_v29 }
 0x9af   :  { %v975_v60 = vmul.f32 %v974_v57, %v958_v25  ;;  %v1457_v57 = vmax.f32 %v3825_v22, 1e-12 }
 0x9b1   :  { %v980_v47 = vmul.f32 %v2979_v56, %v975_v60 }
 0x9b3   :  { %v985_v63 = vadd.f32 %v2980_v59, %v980_v47 }
 0x9b5   :  { %v986_v1 = vmax.f32 %v985_v63, 0.0 }
 0x9b7   :  { %v987_v2 = vsel %vm424_vm4, %v986_v1, 0.0 }
 0x9b8   :  { %v988_v5 = vrot.slane %v987_v2, 4 }
 0x9ba   :  { %v989_v7 = vadd.f32 %v988_v5, %v987_v2  ;;  %v2983_v5 = vld [vmem:[%s4279_s8 + $0x1] ss:$0 sm:$0xff] }
 0x9bc   :  { %v990_v19 = vrot.slane %v989_v7, 2 }
 0x9bd   :  { %v1142_v9 = vpop.f32.mrf.mxu1 }
 0x9be   :  { %v991_v17 = vadd.f32 %v990_v19, %v989_v7  ;;  %2861 = vmatpush.msk.msra.mxu3 %vm400_vm2, %v1142_v9 }
 0x9bf   :  { %2862 = vmatmul.msk.f32.vlgmr.msra.gmra.mxu3 %vm396_vm3, %v3796_v58 }
 0x9c0   :  { %v992_v20 = vrot.slane %v991_v17, 1  ;;  %1351 = vmatpush.msrb.mxu3 %v3630_v14  ;;  %v516_v14 = vsel %vm424_vm4, %v3725_v36, 0.0 }
 0x9c2   :  { %v993_v23 = vadd.f32 %v992_v20, %v991_v17  ;;  %1352 = vmatpush.msrb.mxu3 %v3636_v15  ;;  %v1424_v15 = vld [vmem:[%s4307_s29 + $0x19] sm:$0x1f] }
 0x9c3   :  { %2879 = vmatmul.msk.f32.vlgmr.msrb.gmra.mxu1 %vm244_vm0, %v1424_v15 }
 0x9c4   :  { %v994_v24 = vmul.f32 %v993_v23, %v3852_v21  ;;  %1353 = vmatpush.msrb.mxu3 %v3642_v16 }
 0x9c5   :  { %v1296_v25 = vpop.f32.mrf.mxu1 }
 0x9c6   :  { %995 = vst.msk [vmem:[#allocation4 + $0x2] sm:$0x1] %vm566_vm11, %v994_v24  ;;  %v1299_v4 = vsel %vm424_vm4, %v1296_v25, 0.0  ;;  %1354 = vmatpush.msrb.mxu3 %v3650_v18 }
 0x9c7   :  { %1300 = vadd.xlane.f32.xlu1 %v1299_v4 }
 0x9cf   :  { %517 = vadd.xlane.f32.xlu1 %v516_v14 }
 0xa3a   :  { %v1301_v58 = vpop.xlane.xlu1 %1300 }
 0xa3b   :  { %v1302_v16 = vmul.f32 %v1301_v58, %v3689_v52 }
 0xa3d   :  { %v1303_v26 = vsub.f32 %v1296_v25, %v1302_v16 }
 0xa3f   :  { %v1304_v27 = vmul.f32 %v1303_v26, %v1303_v26 }
 0xa40   :  { %v1484_v39 = vpop.f32.mrf.mxu1 }
 0xa41   :  { %v1305_v28 = vsel %vm424_vm4, %v1304_v27, 0.0  ;;  %2880 = vmatpush.msk.msra.mxu3 %vm400_vm2, %v1484_v39  ;;  %v3918_v39 = vld [vmem:[#allocation16] sm:$0xff] }
 0xa42   :  { %1306 = vadd.xlane.f32.xlu2 %v1305_v28  ;;  %v518_v18 = vpop.xlane.xlu1 %517 }
 0xa43   :  { %v519_v30 = vmul.f32 %v518_v18, %v3689_v52  ;;  %v3900_v18 = vld [vmem:[#allocation13 + $0x18] sm:$0xff] }
 0xa44   :  { %1667 = vmatpush.msra.mxu1 %v3900_v18 }
 0xa45   :  { %v520_v31 = vsub.f32 %v3725_v36, %v519_v30  ;;  %v3902_v30 = vld [vmem:[#allocation16 + $0x18] sm:$0xff] }
 0xa47   :  { %v521_v32 = vmul.f32 %v520_v31, %v520_v31 }
 0xa49   :  { %v522_v34 = vsel %vm424_vm4, %v521_v32, 0.0  ;;  %v3908_v32 = vld [vmem:[#allocation16 + $0x10] sm:$0xff] }
 0xa4a   :  { %741 = vadd.xlane.f32.xlu2 %v740_v33  ;;  %523 = vadd.xlane.f32.xlu1 %v522_v34  ;;  %v3910_v34 = vld [vmem:[#allocation13 + $0x8] sm:$0xff] }
 0xab5   :  { %v1307_v35 = vpop.xlane.xlu2 %1306 }
 0xab6   :  { %v1308_v37 = vmul.f32 %v1307_v35, %v3689_v52  ;;  %v3912_v35 = vld [vmem:[#allocation16 + $0x8] sm:$0xff] }
 0xab8   :  { %v1309_v38 = vadd.f32 1e-05, %v1308_v37 }
 0xaba   :  { %3039 = vrsqrt.f32 %v1309_v38  ;;  %vm1316_vm13 = vweird.f32 %v1309_v38 }
 0xabd   :  { %v742_v40 = vpop.xlane.xlu2 %741  ;;  %v524_v41 = vpop.xlane.xlu1 %523 }
 0xabe   :  { %v743_v36 = vmul.f32 %v742_v40, %v3689_v52  ;;  %v525_v42 = vmul.f32 %v524_v41, %v3689_v52  ;;  %v2985_v41 = vld [vmem:[#allocation12 + $0x1] ss:$0 sm:$0xff] }
 0xac0   :  { %v3040_v43 = vpop.eup %3039  ;;  %v3878_v44 = vsub.f32 %v3807_v62, %v743_v36  ;;  %v526_v45 = vadd.f32 1e-05, %v525_v42  ;;  %v3924_v42 = vpop.f32.mrf.mxu3 }
 0xac1   :  { %v1311_v46 = vmul.f32 %v3040_v43, %v1309_v38  ;;  %vm1317_vm12 = vweird.f32 %v3040_v43  ;;  %v3916_v38 = vld [vmem:[#allocation13] sm:$0xff] }
 0xac2   :  { %3041 = vrsqrt.f32 %v526_v45  ;;  %v745_v49 = vmul.f32 %v3878_v44, %v3878_v44  ;;  %vm1318_vm14 = vmor %vm1316_vm13, %vm1317_vm12  ;;  %vm533_vm1 = vweird.f32 %v526_v45  ;;  %vm1756_vm13 = vcmask 23552  }
 0xac3   :  { %v1312_v50 = vmul.f32 %v3040_v43, %v1311_v46  ;;  %3043 = vrcp.f32 %v1457_v57  ;;  %v2884_v57 = vld [vmem:[%s4277_s6 + $0x30] sm:$0xff] }
 0xac4   :  { %v746_v51 = vsel %vm424_vm4, %v745_v49, 0.0 }
 0xac5   :  { %v1313_v53 = vmul.f32 0.5, %v1312_v50  ;;  %747 = vadd.xlane.f32.xlu2 %v746_v51 }
 0xac7   :  { %v1314_v10 = vsub.f32 1.5, %v1313_v53 }
 0xac8   :  { %v3042_v54 = vpop.eup %3041 }
 0xac9   :  { %v1315_v55 = vmul.f32 %v3040_v43, %v1314_v10  ;;  %v528_v11 = vmul.f32 %v3042_v54, %v526_v45  ;;  %vm534_vm15 = vweird.f32 %v3042_v54  ;;  %v3044_v7 = vpop.eup %3043 }
 0xaca   :  { %vm535_vm5 = vmor %vm533_vm1, %vm534_vm15  ;;  %v3892_v8 = vmul.f32 %v3044_v7, %v3818_v3 }
 0xacb   :  { %v1319_v62 = vsel %vm1318_vm14, %v3040_v43, %v1315_v55  ;;  %v529_v29 = vmul.f32 %v3042_v54, %v528_v11  ;;  %v2986_v43 = vld [vmem:[%s4279_s8 + $0x1] ss:$0 sm:$0xff]  ;;  %vm1784_vm14 = vcmask 256000  }
 0xacc   :  { %v1320_v56 = vmul.f32 %v1319_v62, %v1303_v26 }
 0xacd   :  { %v530_v59 = vmul.f32 0.5, %v529_v29 }
 0xace   :  { %v1325_v60 = vmul.f32 %v2981_v12, %v1320_v56 }
 0xacf   :  { %v531_v61 = vsub.f32 1.5, %v530_v59  ;;  %v2883_v59 = vld [vmem:[%s4277_s6 + $0x28] sm:$0xff] }
 0xad0   :  { %v1330_v47 = vadd.f32 %v2984_v13, %v1325_v60  ;;  %v2882_v60 = vld [vmem:[%s4277_s6 + $0x20] sm:$0xff] }
 0xad1   :  { %v532_v63 = vmul.f32 %v3042_v54, %v531_v61 }
 0xad2   :  { %v1331_v1 = vmax.f32 %v1330_v47, 0.0 }
 0xad3   :  { %v536_v2 = vsel %vm535_vm5, %v3042_v54, %v532_v63 }
 0xad4   :  { %v537_v6 = vmul.f32 %v536_v2, %v520_v31  ;;  %2873 = vmatmul.msk.f32.vlgmr.msrb.gmra.mxu3 %vm244_vm0, %v1331_v1  ;;  %v3904_v31 = vld [vmem:[#allocation13 + $0x10] sm:$0xff]  ;;  %v3953_v2 = vld [vmem:[#allocation18] ss:$0 sm:$0xff] }
 0xad5   :  { %1690 = vmatpush.msrb.mxu3 %v3902_v30  ;;  %1668 = vmatpush.msra.mxu1 %v3904_v31 }
 0xad6   :  { %v543_v22 = vmul.f32 %v2982_v0, %v537_v6 }
 0xad7   :  { %1691 = vmatpush.msrb.mxu3 %v3908_v32  ;;  %1669 = vmatpush.msra.mxu1 %v3910_v34 }
 0xad8   :  { %v549_v19 = vadd.f32 %v2983_v5, %v543_v22 }
 0xad9   :  { %1692 = vmatpush.msrb.mxu3 %v3912_v35  ;;  %1670 = vmatpush.msra.mxu1 %v3916_v38 }
 0xada   :  { %v550_v9 = vmax.f32 %v549_v19, 0.0 }
 0xadb   :  { %1693 = vmatpush.msrb.mxu3 %v3918_v39 }
 0xadc   :  { %v551_v17 = vsel %vm424_vm4, %v550_v9, 0.0  ;;  %2881 = vmatmul.msk.f32.vlgmr.msra.gmra.mxu3 %vm396_vm3, %v3892_v8 }
 0xadd   :  { %v552_v20 = vrot.slane %v551_v17, 4 }
 0xadf   :  { %v553_v23 = vadd.f32 %v552_v20, %v551_v17 }
 0xae1   :  { %v554_v24 = vrot.slane %v553_v23, 2 }
 0xae3   :  { %v555_v25 = vadd.f32 %v554_v24, %v553_v23 }
 0xae5   :  { %v556_v4 = vrot.slane %v555_v25, 1 }
 0xae7   :  { %v557_v14 = vadd.f32 %v556_v4, %v555_v25  ;;  %v2989_v4 = vld [vmem:[#allocation12] ss:$0 sm:$0xff] }
 0xae9   :  { %v565_v15 = vmul.f32 %v3852_v21, %v557_v14 }
 0xaeb   :  { %567 = vst.msk [vmem:[#allocation4] sm:$0x1] %vm566_vm11, %v565_v15 }
 0xb38   :  { %v748_v58 = vpop.xlane.xlu2 %747 }
 0xb39   :  { %v749_v3 = vmul.f32 %v748_v58, %v3689_v52  ;;  %v2990_v58 = vld [vmem:[%s4279_s8] ss:$0 sm:$0xff] }
 0xb3b   :  { %v750_v16 = vadd.f32 1e-05, %v749_v3 }
 0xb3d   :  { %3045 = vrsqrt.f32 %v750_v16  ;;  %vm757_vm7 = vweird.f32 %v750_v16 }
 0xb43   :  { %v3046_v26 = vpop.eup %3045 }
 0xb44   :  { %v752_v27 = vmul.f32 %v3046_v26, %v750_v16  ;;  %vm758_vm6 = vweird.f32 %v3046_v26 }
 0xb45   :  { %vm759_vm8 = vmor %vm757_vm7, %vm758_vm6 }
 0xb46   :  { %v753_v28 = vmul.f32 %v3046_v26, %v752_v27  ;;  %v3962_v27 = vld [vmem:[#allocation15] ss:$0 sm:$0xff] }
 0xb48   :  { %v754_v33 = vmul.f32 0.5, %v753_v28 }
 0xb4a   :  { %v755_v37 = vsub.f32 1.5, %v754_v33 }
 0xb4c   :  { %v756_v40 = vmul.f32 %v3046_v26, %v755_v37 }
 0xb4e   :  { %v760_v36 = vsel %vm759_vm8, %v3046_v26, %v756_v40 }
 0xb4f   :  { %v761_v45 = vmul.f32 %v760_v36, %v3878_v44  ;;  %v3979_v36 = vld [vmem:[%s4284_s13 + $0x10] sm:$0xff] }
 0xb51   :  { %v766_v46 = vmul.f32 %v2985_v41, %v761_v45  ;;  %v3971_v41 = vld [vmem:[%s4284_s13 + $0x18] sm:$0xff]  ;;  %v3991_v45 = vld [vmem:[%s4284_s13] sm:$0xff] }
 0xb53   :  { %v771_v49 = vadd.f32 %v2986_v43, %v766_v46  ;;  %v3985_v43 = vld [vmem:[%s4284_s13 + $0x8] sm:$0xff] }
 0xb55   :  { %v772_v50 = vmax.f32 %v771_v49, 0.0 }
 0xb57   :  { %v773_v51 = vsel %vm424_vm4, %v772_v50, 0.0  ;;  %v1356_v53 = vpop.f32.mrf.mxu3 }
 0xb58   :  { %v774_v10 = vrot.slane %v773_v51, 4  ;;  %2874 = vmatpush.msk.msra.mxu2 %vm400_vm2, %v1356_v53 }
 0xb59   :  { %2875 = vmatmul.msk.f32.vlgmr.msra.gmra.mxu2 %vm396_vm3, %v3838_v48  ;;  %v2885_v48 = vld [vmem:[%s4277_s6 + $0x38] sm:$0xff] }
 0xb5a   :  { %v775_v54 = vadd.f32 %v774_v10, %v773_v51  ;;  %1565 = vmatpush.msrb.mxu2 %v2885_v48 }
 0xb5c   :  { %v776_v55 = vrot.slane %v775_v54, 2  ;;  %1566 = vmatpush.msrb.mxu2 %v2884_v57 }
 0xb5e   :  { %v777_v11 = vadd.f32 %v776_v55, %v775_v54  ;;  %1567 = vmatpush.msrb.mxu2 %v2883_v59 }
 0xb5f   :  { %v1510_v12 = vpop.f32.mrf.mxu3 }
 0xb60   :  { %v778_v62 = vrot.slane %v777_v11, 1  ;;  %v1513_v29 = vsel %vm424_vm4, %v1510_v12, 0.0  ;;  %1568 = vmatpush.msrb.mxu2 %v2882_v60 }
 0xb61   :  { %1514 = vadd.xlane.f32.xlu1 %v1513_v29  ;;  %v4018_v29 = vld [vmem:[%s4308_s0] sm:$0xf] }
 0xb62   :  { %v779_v44 = vadd.f32 %v778_v62, %v777_v11  ;;  %v1168_v62 = vsel %vm424_vm4, %v3924_v42, 0.0 }
 0xb64   :  { %v780_v56 = vmul.f32 %v779_v44, %v3852_v21 }
 0xb66   :  { %781 = vst.msk [vmem:[#allocation4 + $0x1] sm:$0x1] %vm566_vm11, %v780_v56 }
 0xb6d   :  { %v1648_v13 = vld [vmem:[#allocation4] sm:$0x7] }
 0xb6e   :  { %2890 = vmatmul.msk.f32.vlgmr.msra.gmra.mxu1 %vm244_vm0, %v1648_v13  ;;  %2891 = vmatmul.msk.f32.vlgmr.msrb.gmra.mxu3 %vm244_vm0, %v1648_v13 }
 0xbd4   :  { %v1515_v61 = vpop.xlane.xlu1 %1514 }
 0xbd5   :  { %v1516_v47 = vmul.f32 %v1515_v61, %v3689_v52 }
 0xbd7   :  { %v1517_v63 = vsub.f32 %v1510_v12, %v1516_v47 }
 0xbd9   :  { %v1518_v0 = vmul.f32 %v1517_v63, %v1517_v63 }
 0xbdb   :  { %v1519_v1 = vsel %vm424_vm4, %v1518_v0, 0.0 }
 0xbdc   :  { %1520 = vadd.xlane.f32.xlu2 %v1519_v1  ;;  %v3966_v37 = vpop.f32.mrf.mxu2  ;;  %v4038_v1 = vld [vmem:[%s4284_s13 + $0x38] sm:$0xff] }
 0xbdd   :  { %1838 = vmatpush.msra.mxu3 %v4038_v1 }
 0xbeb   :  { %v1672_v28 = vpop.f32.mrf.mxu1 }
 0xbec   :  { %v1673_v33 = vadd.f32 %v3962_v27, %v1672_v28 }
 0xbf1   :  { %v1695_v5 = vpop.f32.mrf.mxu3 }
 0xbf2   :  { %v1696_v6 = vadd.f32 %v3953_v2, %v1695_v5  ;;  %v4052_v5 = vld [vmem:[%s4284_s13 + $0x28] sm:$0xff] }
 0xbf4   :  { %2892 = vmatpush.xpose.msk.msra.mxu2 %vm244_vm0, %v1696_v6  ;;  %v4059_v6 = vld [vmem:[%s4284_s13 + $0x20] sm:$0xff] }
 0xc4f   :  { %v1521_v22 = vpop.xlane.xlu2 %1520 }
 0xc50   :  { %v1522_v7 = vmul.f32 %v1521_v22, %v3689_v52 }
 0xc52   :  { %v1523_v19 = vadd.f32 1e-05, %v1522_v7 }
 0xc54   :  { %3047 = vrsqrt.f32 %v1523_v19  ;;  %vm1530_vm10 = vweird.f32 %v1523_v19 }
 0xc5a   :  { %v3048_v9 = vpop.eup %3047 }
 0xc5b   :  { %v1525_v17 = vmul.f32 %v3048_v9, %v1523_v19  ;;  %vm1531_vm9 = vweird.f32 %v3048_v9 }
 0xc5c   :  { %vm1532_vm12 = vmor %vm1530_vm10, %vm1531_vm9 }
 0xc5d   :  { %v1526_v20 = vmul.f32 %v3048_v9, %v1525_v17 }
 0xc5f   :  { %v1527_v23 = vmul.f32 0.5, %v1526_v20 }
 0xc61   :  { %v1528_v24 = vsub.f32 1.5, %v1527_v23 }
 0xc63   :  { %v1529_v25 = vmul.f32 %v3048_v9, %v1528_v24 }
 0xc65   :  { %v1533_v14 = vsel %vm1532_vm12, %v3048_v9, %v1529_v25 }
 0xc66   :  { %v1534_v15 = vmul.f32 %v1533_v14, %v1517_v63  ;;  %v1382_v63 = vsel %vm424_vm4, %v3966_v37, 0.0 }
 0xc68   :  { %v1539_v3 = vmul.f32 %v2989_v4, %v1534_v15 }
 0xc6a   :  { %v1544_v16 = vadd.f32 %v2990_v58, %v1539_v3 }
 0xc6c   :  { %v1545_v26 = vmax.f32 %v1544_v16, 0.0 }
 0xc6e   :  { %2886 = vmatmul.msk.f32.vlgmr.msrb.gmra.mxu2 %vm244_vm0, %v1545_v26 }
 0xc76   :  { %2893 = vmatmul.msk.f32.vlgmr.msra.gmra.mxu2 %vm244_vm0, %v1673_v33 }
 0xcf1   :  { %v1570_v40 = vpop.f32.mrf.mxu2 }
 0xcf2   :  { %2887 = vmatpush.msk.msra.mxu0 %vm400_vm2, %v1570_v40  ;;  %vm1725_vm2 = vcmask 18432  }
 0xcf3   :  { %2888 = vmatmul.msk.f32.vlgmr.msra.gmra.mxu0 %vm396_vm3, %v3892_v8  ;;  %vm1760_vm3 = vcmask 1042432  }
 0xcf4   :  { %1748 = vmatpush.msrb.mxu0 %v3971_v41 }
 0xcf6   :  { %1749 = vmatpush.msrb.mxu0 %v3979_v36 }
 0xcf8   :  { %1750 = vmatpush.msrb.mxu0 %v3985_v43 }
 0xcf9   :  { %v1721_v8 = vpop.f32.mrf.mxu2 }
 0xcfa   :  { %v1724_v46 = vmul.f32 %v1721_v8, %v1721_v8  ;;  %1751 = vmatpush.msrb.mxu0 %v3991_v45 }
 0xcfb   :  { %2894 = vmatmul.msk.f32.vlgmr.msrb.gmra.mxu0 %vm244_vm0, %v1648_v13 }
 0xcfc   :  { %v1726_v49 = vsel %vm1725_vm2, %v1724_v46, 0.0  ;;  %1936 = vmatpush.msra.mxu0 %v3900_v18 }
 0xcfd   :  { %1727 = vadd.xlane.f32.xlu0 %v1726_v49  ;;  %v2991_v49 = vld [vmem:[#allocation19] ss:$0 sm:$0xff] }
 0xcfe   :  { %1937 = vmatpush.msra.mxu0 %v3904_v31 }
 0xd00   :  { %1938 = vmatpush.msra.mxu0 %v3910_v34 }
 0xd02   :  { %1939 = vmatpush.msra.mxu0 %v3916_v38 }
 0xd03   :  { %2904 = vmatmul.msk.f32.vlgmr.msra.gmra.mxu0 %vm244_vm0, %v4018_v29 }
 0xd70   :  { %v4001_v50 = vpop.f32.mrf.mxu0  ;;  %v1728_v51 = vpop.xlane.xlu0 %1727 }
 0xd71   :  { %v1729_v53 = vmax.f32 %v1728_v51, 1e-12 }
 0xd73   :  { %3049 = vrcp.f32 %v1729_v53 }
 0xd78   :  { %v1753_v10 = vpop.f32.mrf.mxu0 }
 0xd79   :  { %v3050_v54 = vpop.eup %3049  ;;  %2895 = vmatpush.msk.msrb.mxu1 %vm1760_vm3, %v1753_v10  ;;  %v2994_v10 = vld [vmem:[#allocation21] ss:$0 sm:$0xff] }
 0xd7a   :  { %v4004_v55 = vmul.f32 %v3050_v54, %v1724_v46 }
 0xd7b   :  { %1956 = vmatpush.msra.mxu1 %v3902_v30 }
 0xd7c   :  { %2896 = vmatmul.msk.f32.vlgmr.msrb.gmra.mxu1 %vm1756_vm13, %v4004_v55 }
 0xd7d   :  { %1957 = vmatpush.msra.mxu1 %v3908_v32 }
 0xd7f   :  { %1958 = vmatpush.msra.mxu1 %v3912_v35 }
 0xd81   :  { %1959 = vmatpush.msra.mxu1 %v3918_v39 }
 0xd83   :  { %2103 = vmatpush.msrb.mxu1 %v4038_v1 }
 0xd84   :  { %2905 = vmatmul.msk.f32.vlgmr.msra.gmra.mxu1 %vm244_vm0, %v4018_v29 }
 0xdf9   :  { %v1781_v11 = vpop.f32.mrf.mxu1 }
 0xdfa   :  { %v1785_v12 = vsel %vm1784_vm14, %v1781_v11, 0.0 }
 0xdfb   :  { %1786 = vadd.xlane.f32.xlu1 %v1785_v12 }
 0xe01   :  { %v1961_v19 = vpop.f32.mrf.mxu1 }
 0xe02   :  { %v1962_v17 = vadd.f32 %v3953_v2, %v1961_v19 }
 0xe03   :  { %1169 = vadd.xlane.f32.xlu1 %v1168_v62 }
 0xe6e   :  { %v1787_v44 = vpop.xlane.xlu1 %1786 }
 0xe6f   :  { %v1788_v56 = vmul.f32 %v1787_v44, %v3689_v52 }
 0xe71   :  { %v1789_v13 = vsub.f32 %v1781_v11, %v1788_v56  ;;  %v2992_v56 = vld [vmem:[#allocation12 + $0x1] ss:$0 sm:$0xff] }
 0xe73   :  { %v1790_v48 = vmul.f32 %v1789_v13, %v1789_v13 }
 0xe75   :  { %v1791_v57 = vsel %vm1784_vm14, %v1790_v48, 0.0 }
 0xe76   :  { %1792 = vadd.xlane.f32.xlu2 %v1791_v57  ;;  %v1170_v59 = vpop.xlane.xlu1 %1169 }
 0xe77   :  { %v1171_v60 = vmul.f32 %v1170_v59, %v3689_v52  ;;  %v2993_v59 = vld [vmem:[%s4279_s8 + $0x1] ss:$0 sm:$0xff] }
 0xe79   :  { %v4028_v61 = vsub.f32 %v3924_v42, %v1171_v60  ;;  %v4045_v42 = vld [vmem:[%s4284_s13 + $0x30] sm:$0xff] }
 0xe7a   :  { %1839 = vmatpush.msra.mxu3 %v4045_v42  ;;  %2104 = vmatpush.msrb.mxu1 %v4045_v42 }
 0xe7b   :  { %v1173_v47 = vmul.f32 %v4028_v61, %v4028_v61 }
 0xe7c   :  { %1840 = vmatpush.msra.mxu3 %v4052_v5  ;;  %2105 = vmatpush.msrb.mxu1 %v4052_v5 }
 0xe7d   :  { %v1174_v0 = vsel %vm424_vm4, %v1173_v47, 0.0 }
 0xe7e   :  { %1383 = vadd.xlane.f32.xlu2 %v1382_v63  ;;  %1175 = vadd.xlane.f32.xlu1 %v1174_v0 }
 0xe7f   :  { %1841 = vmatpush.msra.mxu3 %v4059_v6  ;;  %2106 = vmatpush.msrb.mxu1 %v4059_v6 }
 0xe81   :  { %2906 = vmatpush.xpose.msk.msrb.mxu3 %vm244_vm0, %v1962_v17 }
 0xee9   :  { %v1793_v22 = vpop.xlane.xlu2 %1792 }
 0xeea   :  { %v1794_v7 = vmul.f32 %v1793_v22, %v3689_v52 }
 0xeec   :  { %v1795_v9 = vadd.f32 1e-05, %v1794_v7 }
 0xeee   :  { %3051 = vrsqrt.f32 %v1795_v9  ;;  %vm1802_vm1 = vweird.f32 %v1795_v9 }
 0xef1   :  { %v1384_v20 = vpop.xlane.xlu2 %1383  ;;  %v1176_v23 = vpop.xlane.xlu1 %1175 }
 0xef2   :  { %v1385_v24 = vmul.f32 %v1384_v20, %v3689_v52  ;;  %v1177_v25 = vmul.f32 %v1176_v23, %v3689_v52 }
 0xef4   :  { %v3052_v4 = vpop.eup %3051  ;;  %v4069_v14 = vsub.f32 %v3966_v37, %v1385_v24  ;;  %v1178_v15 = vadd.f32 1e-05, %v1177_v25 }
 0xef5   :  { %v1797_v58 = vmul.f32 %v3052_v4, %v1795_v9  ;;  %vm1803_vm15 = vweird.f32 %v3052_v4 }
 0xef6   :  { %3053 = vrsqrt.f32 %v1178_v15  ;;  %v1387_v3 = vmul.f32 %v4069_v14, %v4069_v14  ;;  %vm1804_vm5 = vmor %vm1802_vm1, %vm1803_vm15  ;;  %vm1185_vm7 = vweird.f32 %v1178_v15  ;;  %vm1991_vm15 = vcmask 27648  }
 0xef7   :  { %v1798_v16 = vmul.f32 %v3052_v4, %v1797_v58  ;;  %vm2026_vm1 = vcmask 1043456  }
 0xef8   :  { %v1388_v26 = vsel %vm424_vm4, %v1387_v3, 0.0 }
 0xef9   :  { %v1799_v28 = vmul.f32 0.5, %v1798_v16  ;;  %1389 = vadd.xlane.f32.xlu2 %v1388_v26 }
 0xefb   :  { %v1800_v33 = vsub.f32 1.5, %v1799_v28 }
 0xefc   :  { %v3054_v40 = vpop.eup %3053 }
 0xefd   :  { %v1801_v8 = vmul.f32 %v3052_v4, %v1800_v33  ;;  %v1180_v46 = vmul.f32 %v3054_v40, %v1178_v15  ;;  %vm1186_vm6 = vweird.f32 %v3054_v40 }
 0xefe   :  { %vm1187_vm8 = vmor %vm1185_vm7, %vm1186_vm6  ;;  %vm2050_vm6 = vcmask 257024  }
 0xeff   :  { %v1805_v37 = vsel %vm1804_vm5, %v3052_v4, %v1801_v8  ;;  %v1181_v51 = vmul.f32 %v3054_v40, %v1180_v46  ;;  %v2996_v46 = vld [vmem:[%s4279_s8 + $0x1] ss:$0 sm:$0xff]  ;;  %vm2022_vm5 = vcmask 31744  }
 0xf00   :  { %v1806_v53 = vmul.f32 %v1805_v37, %v1789_v13  ;;  %v1941_v13 = vpop.f32.mrf.mxu0 }
 0xf01   :  { %v1182_v54 = vmul.f32 0.5, %v1181_v51  ;;  %v1942_v0 = vadd.f32 %v3962_v27, %v1941_v13 }
 0xf02   :  { %v1811_v11 = vmul.f32 %v2991_v49, %v1806_v53 }
 0xf03   :  { %v1183_v12 = vsub.f32 1.5, %v1182_v54 }
 0xf04   :  { %v1816_v62 = vadd.f32 %v2994_v10, %v1811_v11 }
 0xf05   :  { %v1184_v44 = vmul.f32 %v3054_v40, %v1183_v12 }
 0xf06   :  { %v1817_v48 = vmax.f32 %v1816_v62, 0.0 }
 0xf07   :  { %v1188_v57 = vsel %vm1187_vm8, %v3054_v40, %v1184_v44  ;;  %v2995_v40 = vld [vmem:[#allocation12 + $0x1] ss:$0 sm:$0xff] }
 0xf08   :  { %v1189_v60 = vmul.f32 %v1188_v57, %v4028_v61  ;;  %2901 = vmatmul.msk.f32.vlgmr.msra.gmra.mxu3 %vm244_vm0, %v1817_v48 }
 0xf0a   :  { %v1194_v47 = vmul.f32 %v2992_v56, %v1189_v60  ;;  %v1596_v60 = vsel %vm424_vm4, %v4001_v50, 0.0 }
 0xf0c   :  { %v1199_v63 = vadd.f32 %v2993_v59, %v1194_v47 }
 0xf0e   :  { %v1200_v22 = vmax.f32 %v1199_v63, 0.0 }
 0xf10   :  { %v1201_v7 = vsel %vm424_vm4, %v1200_v22, 0.0  ;;  %2907 = vmatmul.msk.f32.vlgmr.msrb.gmra.mxu3 %vm244_vm0, %v1942_v0 }
 0xf11   :  { %v1202_v19 = vrot.slane %v1201_v7, 4 }
 0xf13   :  { %v1203_v9 = vadd.f32 %v1202_v19, %v1201_v7 }
 0xf15   :  { %v1204_v17 = vrot.slane %v1203_v9, 2 }
 0xf17   :  { %v1205_v20 = vadd.f32 %v1204_v17, %v1203_v9 }
 0xf19   :  { %v1206_v23 = vrot.slane %v1205_v20, 1 }
 0xf1b   :  { %v1207_v24 = vadd.f32 %v1206_v23, %v1205_v20 }
 0xf1d   :  { %v1208_v61 = vmul.f32 %v1207_v24, %v3852_v21 }
 0xf1f   :  { %1209 = vst.msk [vmem:[#allocation4 + $0x3] sm:$0x1] %vm566_vm11, %v1208_v61 }
 0xf6c   :  { %v1390_v25 = vpop.xlane.xlu2 %1389 }
 0xf6d   :  { %v1391_v4 = vmul.f32 %v1390_v25, %v3689_v52 }
 0xf6f   :  { %v1392_v15 = vadd.f32 1e-05, %v1391_v4 }
 0xf71   :  { %3055 = vrsqrt.f32 %v1392_v15  ;;  %vm1399_vm10 = vweird.f32 %v1392_v15 }
 0xf77   :  { %v3056_v58 = vpop.eup %3055 }
 0xf78   :  { %v1394_v3 = vmul.f32 %v3056_v58, %v1392_v15  ;;  %vm1400_vm9 = vweird.f32 %v3056_v58 }
 0xf79   :  { %vm1401_vm12 = vmor %vm1399_vm10, %vm1400_vm9 }
 0xf7a   :  { %v1395_v16 = vmul.f32 %v3056_v58, %v1394_v3 }
 0xf7c   :  { %v1396_v26 = vmul.f32 0.5, %v1395_v16 }
 0xf7e   :  { %v1397_v28 = vsub.f32 1.5, %v1396_v26 }
 0xf80   :  { %v1398_v33 = vmul.f32 %v3056_v58, %v1397_v28  ;;  %v2997_v28 = vld [vmem:[#allocation12 + $0x1] ss:$0 sm:$0xff] }
 0xf82   :  { %v1402_v8 = vsel %vm1401_vm12, %v3056_v58, %v1398_v33 }
 0xf83   :  { %v1403_v49 = vmul.f32 %v1402_v8, %v4069_v14 }
 0xf85   :  { %v1408_v37 = vmul.f32 %v2995_v40, %v1403_v49  ;;  %v2998_v40 = vld [vmem:[%s4279_s8 + $0x1] ss:$0 sm:$0xff] }
 0xf87   :  { %v1413_v51 = vadd.f32 %v2996_v46, %v1408_v37 }
 0xf89   :  { %v1414_v53 = vmax.f32 %v1413_v51, 0.0 }
 0xf8b   :  { %v1415_v10 = vsel %vm424_vm4, %v1414_v53, 0.0  ;;  %v1843_v54 = vpop.f32.mrf.mxu3 }
 0xf8c   :  { %v1416_v11 = vrot.slane %v1415_v10, 4  ;;  %2902 = vmatpush.msk.msrb.mxu2 %vm1760_vm3, %v1843_v54 }
 0xf8d   :  { %2903 = vmatmul.msk.f32.vlgmr.msrb.gmra.mxu2 %vm1756_vm13, %v4004_v55 }
 0xf8e   :  { %v1417_v12 = vadd.f32 %v1416_v11, %v1415_v10  ;;  %2014 = vmatpush.msra.mxu2 %v3971_v41 }
 0xf90   :  { %v1418_v62 = vrot.slane %v1417_v12, 2  ;;  %2015 = vmatpush.msra.mxu2 %v3979_v36 }
 0xf92   :  { %v1419_v44 = vadd.f32 %v1418_v62, %v1417_v12  ;;  %2016 = vmatpush.msra.mxu2 %v3985_v43 }
 0xf93   :  { %v1987_v14 = vpop.f32.mrf.mxu3 }
 0xf94   :  { %v1420_v56 = vrot.slane %v1419_v44, 1  ;;  %v1990_v48 = vmul.f32 %v1987_v14, %v1987_v14  ;;  %2017 = vmatpush.msra.mxu2 %v3991_v45 }
 0xf95   :  { %2908 = vmatmul.msk.f32.vlgmr.msra.gmra.mxu2 %vm244_vm0, %v4018_v29 }
 0xf96   :  { %v1421_v57 = vadd.f32 %v1420_v56, %v1419_v44  ;;  %v1992_v55 = vsel %vm1991_vm15, %v1990_v48, 0.0  ;;  %2199 = vmatpush.msrb.mxu2 %v3900_v18 }
 0xf97   :  { %1993 = vadd.xlane.f32.xlu0 %v1992_v55 }
 0xf98   :  { %v1422_v59 = vmul.f32 %v1421_v57, %v3852_v21  ;;  %2200 = vmatpush.msrb.mxu2 %v3904_v31 }
 0xf9a   :  { %1423 = vst.msk [vmem:[#allocation4 + $0x4] sm:$0x1] %vm566_vm11, %v1422_v59  ;;  %2201 = vmatpush.msrb.mxu2 %v3910_v34 }
 0xf9c   :  { %2202 = vmatpush.msrb.mxu2 %v3916_v38 }
 0xf9f   :  { %1597 = vadd.xlane.f32.xlu0 %v1596_v60 }
0x100a   :  { %v1994_v29 = vpop.xlane.xlu0 %1993 }
0x100b   :  { %v1995_v13 = vmax.f32 %v1994_v29, 1e-12 }
0x100d   :  { %3057 = vrcp.f32 %v1995_v13 }
0x1010   :  { %v4108_v47 = vpop.f32.mrf.mxu2 }
0x1012   :  { %v1598_v63 = vpop.xlane.xlu0 %1597 }
0x1013   :  { %v1599_v0 = vmul.f32 %v1598_v63, %v3689_v52  ;;  %v3058_v22 = vpop.eup %3057 }
0x1014   :  { %v4112_v9 = vmul.f32 %v3058_v22, %v1990_v48 }
0x1015   :  { %v1600_v7 = vsub.f32 %v4001_v50, %v1599_v0 }
0x1017   :  { %v1601_v19 = vmul.f32 %v1600_v7, %v1600_v7 }
0x1018   :  { %v2019_v17 = vpop.f32.mrf.mxu2 }
0x1019   :  { %2909 = vmatpush.msk.msrb.mxu0 %vm2026_vm1, %v2019_v17  ;;  %v1602_v20 = vsel %vm424_vm4, %v1601_v19, 0.0 }
0x101a   :  { %1603 = vadd.xlane.f32.xlu0 %v1602_v20  ;;  %2910 = vmatmul.msk.f32.vlgmr.msrb.gmra.mxu0 %vm2022_vm5, %v4112_v9 }
0x101b   :  { %2219 = vmatpush.msra.mxu0 %v3902_v30 }
0x101d   :  { %2220 = vmatpush.msra.mxu0 %v3908_v32 }
0x101f   :  { %2221 = vmatpush.msra.mxu0 %v3912_v35 }
0x1021   :  { %2222 = vmatpush.msra.mxu0 %v3918_v39 }
0x1023   :  { %2362 = vmatpush.msrb.mxu0 %v4038_v1 }
0x1025   :  { %2363 = vmatpush.msrb.mxu0 %v4045_v42 }
0x1027   :  { %2364 = vmatpush.msrb.mxu0 %v4052_v5 }
0x1029   :  { %2365 = vmatpush.msrb.mxu0 %v4059_v6 }
0x108d   :  { %v1604_v50 = vpop.xlane.xlu0 %1603 }
0x108e   :  { %v1605_v23 = vmul.f32 %v1604_v50, %v3689_v52  ;;  %v2999_v50 = vld [vmem:[#allocation19] ss:$0 sm:$0xff] }
0x1090   :  { %v1606_v24 = vadd.f32 1e-05, %v1605_v23 }
0x1092   :  { %3059 = vrsqrt.f32 %v1606_v24  ;;  %vm1613_vm8 = vweird.f32 %v1606_v24 }
0x1097   :  { %v2047_v61 = vpop.f32.mrf.mxu0 }
0x1098   :  { %v3060_v25 = vpop.eup %3059  ;;  %v2051_v4 = vsel %vm2050_vm6, %v2047_v61, 0.0 }
0x1099   :  { %v1608_v15 = vmul.f32 %v3060_v25, %v1606_v24  ;;  %2052 = vadd.xlane.f32.xlu1 %v2051_v4  ;;  %vm1614_vm7 = vweird.f32 %v3060_v25 }
0x109a   :  { %vm1615_vm9 = vmor %vm1613_vm8, %vm1614_vm7 }
0x109b   :  { %v1609_v58 = vmul.f32 %v3060_v25, %v1608_v15 }
0x109d   :  { %v1610_v3 = vmul.f32 0.5, %v1609_v58 }
0x109f   :  { %v1611_v16 = vsub.f32 1.5, %v1610_v3 }
0x10a1   :  { %v1612_v26 = vmul.f32 %v3060_v25, %v1611_v16 }
0x10a3   :  { %v1616_v33 = vsel %vm1615_vm9, %v3060_v25, %v1612_v26 }
0x10a4   :  { %v1617_v8 = vmul.f32 %v1616_v33, %v1600_v7 }
0x10a6   :  { %v1622_v46 = vmul.f32 %v2997_v28, %v1617_v8 }
0x10a8   :  { %v1627_v49 = vadd.f32 %v2998_v40, %v1622_v46 }
0x10aa   :  { %v1628_v37 = vmax.f32 %v1627_v49, 0.0 }
0x10ac   :  { %v1629_v51 = vsel %vm424_vm4, %v1628_v37, 0.0 }
0x10ad   :  { %v1630_v53 = vrot.slane %v1629_v51, 4 }
0x10af   :  { %v1631_v10 = vadd.f32 %v1630_v53, %v1629_v51 }
0x10b1   :  { %v1632_v54 = vrot.slane %v1631_v10, 2 }
0x10b3   :  { %v1633_v11 = vadd.f32 %v1632_v54, %v1631_v10 }
0x10b5   :  { %v1634_v12 = vrot.slane %v1633_v11, 1 }
0x10b7   :  { %v1635_v62 = vadd.f32 %v1634_v12, %v1633_v11 }
0x10b9   :  { %v1636_v44 = vmul.f32 %v1635_v62, %v3852_v21 }
0x10bb   :  { %1637 = vst.msk [vmem:[#allocation4 + $0x5] sm:$0x1] %vm566_vm11, %v1636_v44  ;;  %v3001_v44 = vld [vmem:[#allocation19] ss:$0 sm:$0xff] }
0x10c2   :  { %v2183_v14 = vld [vmem:[#allocation4 + $0x3] sm:$0x7] }
0x10c3   :  { %2918 = vmatmul.msk.f32.vlgmr.msrb.gmra.mxu2 %vm244_vm0, %v2183_v14  ;;  %2919 = vmatmul.msk.f32.vlgmr.msra.gmra.mxu0 %vm244_vm0, %v2183_v14 }
0x110c   :  { %v2053_v56 = vpop.xlane.xlu1 %2052 }
0x110d   :  { %v2054_v48 = vmul.f32 %v2053_v56, %v3689_v52 }
0x110f   :  { %v2055_v57 = vsub.f32 %v2047_v61, %v2054_v48  ;;  %v3000_v61 = vld [vmem:[#allocation21] ss:$0 sm:$0xff] }
0x1110   :  { %v3002_v48 = vld [vmem:[#allocation21] ss:$0 sm:$0xff] }
0x1111   :  { %v2056_v55 = vmul.f32 %v2055_v57, %v2055_v57 }
0x1113   :  { %v2057_v59 = vsel %vm2050_vm6, %v2056_v55, 0.0 }
0x1114   :  { %2058 = vadd.xlane.f32.xlu2 %v2057_v59 }
0x1140   :  { %v2224_v60 = vpop.f32.mrf.mxu0 }
0x1141   :  { %v2225_v29 = vadd.f32 %v3953_v2, %v2224_v60 }
0x1143   :  { %2920 = vmatpush.xpose.msk.msra.mxu1 %vm244_vm0, %v2225_v29 }
0x1146   :  { %v2204_v58 = vpop.f32.mrf.mxu2 }
0x1147   :  { %v2205_v3 = vadd.f32 %v3962_v27, %v2204_v58 }
0x1187   :  { %v2059_v21 = vpop.xlane.xlu2 %2058 }
0x1188   :  { %v2060_v13 = vmul.f32 %v2059_v21, %v3689_v52 }
0x118a   :  { %v2061_v63 = vadd.f32 1e-05, %v2060_v13 }
0x118c   :  { %3061 = vrsqrt.f32 %v2061_v63  ;;  %vm2068_vm10 = vweird.f32 %v2061_v63 }
0x1192   :  { %v3062_v0 = vpop.eup %3061 }
0x1193   :  { %v2063_v22 = vmul.f32 %v3062_v0, %v2061_v63  ;;  %vm2069_vm4 = vweird.f32 %v3062_v0  ;;  %v1869_v63 = vsel %vm1784_vm14, %v4108_v47, 0.0 }
0x1194   :  { %vm2070_vm12 = vmor %vm2068_vm10, %vm2069_vm4 }
0x1195   :  { %v2064_v7 = vmul.f32 %v3062_v0, %v2063_v22 }
0x1197   :  { %v2065_v19 = vmul.f32 0.5, %v2064_v7 }
0x1199   :  { %v2066_v17 = vsub.f32 1.5, %v2065_v19 }
0x119b   :  { %v2067_v20 = vmul.f32 %v3062_v0, %v2066_v17 }
0x119d   :  { %v2071_v23 = vsel %vm2070_vm12, %v3062_v0, %v2067_v20 }
0x119e   :  { %v2072_v24 = vmul.f32 %v2071_v23, %v2055_v57 }
0x11a0   :  { %v2077_v25 = vmul.f32 %v2999_v50, %v2072_v24 }
0x11a2   :  { %v2082_v4 = vadd.f32 %v3000_v61, %v2077_v25 }
0x11a4   :  { %v2083_v15 = vmax.f32 %v2082_v4, 0.0 }
0x11a6   :  { %2915 = vmatmul.msk.f32.vlgmr.msrb.gmra.mxu1 %vm244_vm0, %v2083_v15 }
0x11ae   :  { %2921 = vmatmul.msk.f32.vlgmr.msra.gmra.mxu1 %vm244_vm0, %v2205_v3 }
0x1223   :  { %v2108_v16 = vpop.f32.mrf.mxu1 }
0x1224   :  { %2916 = vmatpush.msk.msra.mxu3 %vm2026_vm1, %v2108_v16 }
0x1225   :  { %2917 = vmatmul.msk.f32.vlgmr.msra.gmra.mxu3 %vm2022_vm5, %v4112_v9 }
0x1226   :  { %2276 = vmatpush.msrb.mxu3 %v3971_v41 }
0x1228   :  { %2277 = vmatpush.msrb.mxu3 %v3979_v36 }
0x122a   :  { %2278 = vmatpush.msrb.mxu3 %v3985_v43 }
0x122b   :  { %v2250_v26 = vpop.f32.mrf.mxu1 }
0x122c   :  { %v2253_v28 = vmul.f32 %v2250_v26, %v2250_v26  ;;  %2279 = vmatpush.msrb.mxu3 %v3991_v45 }
0x122d   :  { %2922 = vmatmul.msk.f32.vlgmr.msrb.gmra.mxu3 %vm244_vm0, %v2183_v14 }
0x122e   :  { %v2254_v33 = vsel %vm1725_vm2, %v2253_v28, 0.0  ;;  %2451 = vmatpush.msra.mxu3 %v3900_v18 }
0x122f   :  { %2255 = vadd.xlane.f32.xlu0 %v2254_v33 }
0x1230   :  { %2452 = vmatpush.msra.mxu3 %v3904_v31 }
0x1232   :  { %2453 = vmatpush.msra.mxu3 %v3910_v34 }
0x1234   :  { %2454 = vmatpush.msra.mxu3 %v3916_v38 }
0x12a2   :  { %v2256_v9 = vpop.xlane.xlu0 %2255 }
0x12a3   :  { %v2257_v40 = vmax.f32 %v2256_v9, 1e-12 }
0x12a5   :  { %3063 = vrcp.f32 %v2257_v40 }
0x12a8   :  { %v4157_v8 = vpop.f32.mrf.mxu3 }
0x12ab   :  { %v3064_v46 = vpop.eup %3063 }
0x12ac   :  { %v2259_v49 = vmul.f32 %v3064_v46, %v2253_v28  ;;  %v2134_v28 = vsel %vm2050_vm6, %v4157_v8, 0.0 }
0x12b0   :  { %v2281_v37 = vpop.f32.mrf.mxu3 }
0x12b1   :  { %2923 = vmatpush.msk.msra.mxu2 %vm1760_vm3, %v2281_v37 }
0x12b2   :  { %2924 = vmatmul.msk.f32.vlgmr.msra.gmra.mxu2 %vm1756_vm13, %v2259_v49 }
0x12b3   :  { %2471 = vmatpush.msrb.mxu2 %v3902_v30  ;;  %v2435_v30 = vld [vmem:[%s4308_s0 + $0x4] sm:$0xf] }
0x12b4   :  { %2932 = vmatmul.msk.f32.vlgmr.msra.gmra.mxu3 %vm244_vm0, %v2435_v30 }
0x12b5   :  { %2472 = vmatpush.msrb.mxu2 %v3908_v32 }
0x12b7   :  { %2473 = vmatpush.msrb.mxu2 %v3912_v35 }
0x12b9   :  { %2474 = vmatpush.msrb.mxu2 %v3918_v39 }
0x12ba   :  { %2933 = vmatmul.msk.f32.vlgmr.msrb.gmra.mxu2 %vm244_vm0, %v2435_v30 }
0x12bb   :  { %2614 = vmatpush.msra.mxu2 %v4038_v1 }
0x12bd   :  { %2615 = vmatpush.msra.mxu2 %v4045_v42 }
0x12bf   :  { %2616 = vmatpush.msra.mxu2 %v4052_v5 }
0x12c1   :  { %2617 = vmatpush.msra.mxu2 %v4059_v6 }
0x1335   :  { %v2307_v18 = vpop.f32.mrf.mxu2 }
0x1336   :  { %v2310_v31 = vsel %vm1784_vm14, %v2307_v18, 0.0 }
0x1337   :  { %2311 = vadd.xlane.f32.xlu1 %v2310_v31  ;;  %v2456_v59 = vpop.f32.mrf.mxu3 }
0x1338   :  { %v2457_v60 = vadd.f32 %v3962_v27, %v2456_v59 }
0x133d   :  { %v2476_v1 = vpop.f32.mrf.mxu2 }
0x133e   :  { %v2477_v5 = vadd.f32 %v3953_v2, %v2476_v1 }
0x1340   :  { %2934 = vmatpush.xpose.msk.msra.mxu0 %vm244_vm0, %v2477_v5 }
0x13aa   :  { %v2312_v32 = vpop.xlane.xlu1 %2311 }
0x13ab   :  { %v2313_v34 = vmul.f32 %v2312_v32, %v3689_v52 }
0x13ad   :  { %v2314_v35 = vsub.f32 %v2307_v18, %v2313_v34 }
0x13af   :  { %v2315_v38 = vmul.f32 %v2314_v35, %v2314_v35 }
0x13b1   :  { %v2316_v39 = vsel %vm1784_vm14, %v2315_v38, 0.0  ;;  %v3003_v38 = vld [vmem:[#allocation19 + $0x1] ss:$0 sm:$0xff] }
0x13b2   :  { %2317 = vadd.xlane.f32.xlu2 %v2316_v39 }
0x1425   :  { %v2318_v42 = vpop.xlane.xlu2 %2317 }
0x1426   :  { %v2319_v6 = vmul.f32 %v2318_v42, %v3689_v52  ;;  %v3004_v42 = vld [vmem:[#allocation21 + $0x1] ss:$0 sm:$0xff] }
0x1428   :  { %v2320_v51 = vadd.f32 1e-05, %v2319_v6 }
0x142a   :  { %3065 = vrsqrt.f32 %v2320_v51  ;;  %vm2327_vm7 = vweird.f32 %v2320_v51 }
0x1430   :  { %v3066_v53 = vpop.eup %3065 }
0x1431   :  { %v2322_v10 = vmul.f32 %v3066_v53, %v2320_v51  ;;  %vm2328_vm2 = vweird.f32 %v3066_v53 }
0x1432   :  { %vm2329_vm8 = vmor %vm2327_vm7, %vm2328_vm2 }
0x1433   :  { %v2323_v54 = vmul.f32 %v3066_v53, %v2322_v10 }
0x1435   :  { %v2324_v11 = vmul.f32 0.5, %v2323_v54 }
0x1437   :  { %v2325_v12 = vsub.f32 1.5, %v2324_v11 }
0x1439   :  { %v2326_v62 = vmul.f32 %v3066_v53, %v2325_v12 }
0x143b   :  { %v2330_v14 = vsel %vm2329_vm8, %v3066_v53, %v2326_v62 }
0x143c   :  { %v2331_v56 = vmul.f32 %v2330_v14, %v2314_v35 }
0x143e   :  { %v2336_v2 = vmul.f32 %v3001_v44, %v2331_v56 }
0x1440   :  { %v2341_v57 = vadd.f32 %v3002_v48, %v2336_v2 }
0x1442   :  { %v2342_v55 = vmax.f32 %v2341_v57, 0.0 }
0x1444   :  { %2929 = vmatmul.msk.f32.vlgmr.msrb.gmra.mxu0 %vm244_vm0, %v2342_v55 }
0x144c   :  { %2935 = vmatmul.msk.f32.vlgmr.msra.gmra.mxu0 %vm244_vm0, %v2457_v60 }
0x14c1   :  { %v2367_v29 = vpop.f32.mrf.mxu0 }
0x14c2   :  { %2930 = vmatpush.msk.msrb.mxu1 %vm1760_vm3, %v2367_v29 }
0x14c3   :  { %2931 = vmatmul.msk.f32.vlgmr.msrb.gmra.mxu1 %vm1756_vm13, %v2259_v49 }
0x14c4   :  { %2528 = vmatpush.msra.mxu1 %v3971_v41 }
0x14c6   :  { %2529 = vmatpush.msra.mxu1 %v3979_v36 }
0x14c8   :  { %2530 = vmatpush.msra.mxu1 %v3985_v43 }
0x14c9   :  { %v2502_v21 = vpop.f32.mrf.mxu0 }
0x14ca   :  { %v2505_v13 = vmul.f32 %v2502_v21, %v2502_v21  ;;  %2531 = vmatpush.msra.mxu1 %v3991_v45 }
0x14cb   :  { %2936 = vmatmul.msk.f32.vlgmr.msra.gmra.mxu1 %vm244_vm0, %v2435_v30  ;;  %v3402_v30 = vmov 3.0  }
0x14cc   :  { %v2506_v27 = vsel %vm1991_vm15, %v2505_v13, 0.0 }
0x14cd   :  { %2507 = vadd.xlane.f32.xlu0 %v2506_v27 }
0x14d5   :  { %1870 = vadd.xlane.f32.xlu0 %v1869_v63 }
0x1540   :  { %v2508_v0 = vpop.xlane.xlu0 %2507  ;;  %v2390_v22 = vpop.f32.mrf.mxu1 }
0x1541   :  { %v2509_v41 = vmax.f32 %v2508_v0, 1e-12  ;;  %v2393_v23 = vsel %vm1784_vm14, %v2390_v22, 0.0 }
0x1543   :  { %3067 = vrcp.f32 %v2509_v41 }
0x1548   :  { %v2533_v36 = vpop.f32.mrf.mxu1  ;;  %v1871_v17 = vpop.xlane.xlu0 %1870 }
0x1549   :  { %v3068_v7 = vpop.eup %3067  ;;  %2937 = vmatpush.msk.msrb.mxu3 %vm2026_vm1, %v2533_v36  ;;  %v1872_v20 = vmul.f32 %v1871_v17, %v3689_v52  ;;  %v3005_v17 = vld [vmem:[#allocation19] ss:$0 sm:$0xff] }
0x154a   :  { %v4194_v43 = vmul.f32 %v3068_v7, %v2505_v13 }
0x154b   :  { %v1873_v50 = vsub.f32 %v4108_v47, %v1872_v20 }
0x154c   :  { %2938 = vmatmul.msk.f32.vlgmr.msrb.gmra.mxu3 %vm2022_vm5, %v4194_v43 }
0x154d   :  { %v1874_v24 = vmul.f32 %v1873_v50, %v1873_v50 }
0x154f   :  { %v1875_v61 = vsel %vm1784_vm14, %v1874_v24, 0.0 }
0x15cf   :  { %v2559_v45 = vpop.f32.mrf.mxu3 }
0x15d0   :  { %v2562_v19 = vsel %vm2050_vm6, %v2559_v45, 0.0 }
0x15d1   :  { %2563 = vadd.xlane.f32.xlu1 %v2562_v19 }
0x15d9   :  { %2394 = vadd.xlane.f32.xlu1 %v2393_v23  ;;  %v3008_v23 = vld [vmem:[#allocation21] ss:$0 sm:$0xff] }
0x15e1   :  { %1876 = vadd.xlane.f32.xlu1 %v1875_v61 }
0x1644   :  { %v2564_v25 = vpop.xlane.xlu1 %2563 }
0x1645   :  { %v2565_v4 = vmul.f32 %v2564_v25, %v3689_v52 }
0x1647   :  { %v4204_v15 = vsub.f32 %v2559_v45, %v2565_v4 }
0x1649   :  { %v2567_v58 = vmul.f32 %v4204_v15, %v4204_v15 }
0x164b   :  { %v2568_v3 = vsel %vm2050_vm6, %v2567_v58, 0.0 }
0x164c   :  { %2569 = vadd.xlane.f32.xlu2 %v2568_v3  ;;  %v2395_v16 = vpop.xlane.xlu1 %2394 }
0x164d   :  { %v2396_v47 = vmul.f32 %v2395_v16, %v3689_v52  ;;  %v2691_v16 = vld [vmem:[#allocation22 + $0x18] sm:$0xff] }
0x164e   :  { %2735 = vmatpush.msra.mxu3 %v2691_v16 }
0x164f   :  { %v4210_v26 = vsub.f32 %v2390_v22, %v2396_v47  ;;  %v2690_v47 = vld [vmem:[#allocation22 + $0x10] sm:$0xff] }
0x1650   :  { %2736 = vmatpush.msra.mxu3 %v2690_v47 }
0x1651   :  { %v2398_v46 = vmul.f32 %v4210_v26, %v4210_v26 }
0x1653   :  { %v2399_v49 = vsel %vm1784_vm14, %v2398_v46, 0.0  ;;  %v3006_v46 = vld [vmem:[#allocation19 + $0x1] ss:$0 sm:$0xff] }
0x1654   :  { %v1877_v33 = vpop.xlane.xlu1 %1876  ;;  %2135 = vadd.xlane.f32.xlu2 %v2134_v28 }
0x1655   :  { %v1878_v9 = vmul.f32 %v1877_v33, %v3689_v52  ;;  %v2689_v33 = vld [vmem:[#allocation22 + $0x8] sm:$0xff] }
0x1656   :  { %2737 = vmatpush.msra.mxu3 %v2689_v33 }
0x1657   :  { %v1879_v40 = vadd.f32 1e-05, %v1878_v9 }
0x1659   :  { %3069 = vrsqrt.f32 %v1879_v40  ;;  %vm1886_vm13 = vweird.f32 %v1879_v40 }
0x165a   :  { %3071 = vrcp.f32 %v3402_v30 }
0x165c   :  { %2400 = vadd.xlane.f32.xlu2 %v2399_v49 }
0x165f   :  { %v3070_v37 = vpop.eup %3069 }
0x1660   :  { %v1881_v18 = vmul.f32 %v3070_v37, %v1879_v40  ;;  %vm1887_vm3 = vweird.f32 %v3070_v37  ;;  %v3072_v39 = vpop.eup %3071  ;;  %v2688_v40 = vld [vmem:[#allocation22] sm:$0xff] }
0x1661   :  { %vm1888_vm15 = vmor %vm1886_vm13, %vm1887_vm3  ;;  %v1912_v6 = vmul.f32 3.0, %v3072_v39  ;;  %vm1916_vm9 = vweird.f32 %v3072_v39  ;;  %2738 = vmatpush.msra.mxu3 %v2688_v40 }
0x1662   :  { %v1882_v31 = vmul.f32 %v3070_v37, %v1881_v18 }
0x1663   :  { %v1913_v10 = vsub.f32 1.0, %v1912_v6 }
0x1664   :  { %v1883_v32 = vmul.f32 0.5, %v1882_v31 }
0x1665   :  { %v1914_v62 = vmul.f32 %v3072_v39, %v1913_v10 }
0x1666   :  { %v1884_v34 = vsub.f32 1.5, %v1883_v32 }
0x1667   :  { %v1915_v56 = vadd.f32 %v3072_v39, %v1914_v62 }
0x1668   :  { %v1885_v35 = vmul.f32 %v3070_v37, %v1884_v34 }
0x1669   :  { %v1917_v57 = vsel %vm1916_vm9, %v3072_v39, %v1915_v56 }
0x166a   :  { %v1889_v1 = vsel %vm1888_vm15, %v3070_v37, %v1885_v35  ;;  %v3007_v37 = vld [vmem:[#allocation21 + $0x1] ss:$0 sm:$0xff] }
0x166b   :  { %v1890_v5 = vmul.f32 %v1889_v1, %v1873_v50 }
0x166d   :  { %v1896_v51 = vmul.f32 %v3003_v38, %v1890_v5 }
0x166f   :  { %v1902_v53 = vadd.f32 %v3004_v42, %v1896_v51 }
0x1671   :  { %v1903_v54 = vmax.f32 %v1902_v53, 0.0 }
0x1673   :  { %v1904_v11 = vsel %vm1784_vm14, %v1903_v54, 0.0 }
0x1674   :  { %v1905_v12 = vrot.slane %v1904_v11, 4 }
0x1676   :  { %v1906_v44 = vadd.f32 %v1905_v12, %v1904_v11 }
0x1678   :  { %v1907_v14 = vrot.slane %v1906_v44, 2 }
0x167a   :  { %v1908_v48 = vadd.f32 %v1907_v14, %v1906_v44 }
0x167c   :  { %v1909_v2 = vrot.slane %v1908_v48, 1 }
0x167e   :  { %v1910_v55 = vadd.f32 %v1909_v2, %v1908_v48 }
0x1680   :  { %v1918_v59 = vmul.f32 %v1917_v57, %v1910_v55 }
0x1682   :  { %1919 = vst.msk [vmem:[#allocation5] sm:$0x1] %vm566_vm11, %v1918_v59 }
0x16bf   :  { %v2570_v60 = vpop.xlane.xlu2 %2569 }
0x16c0   :  { %v2571_v29 = vmul.f32 %v2570_v60, %v3689_v52 }
0x16c2   :  { %v2572_v21 = vadd.f32 1e-05, %v2571_v29  ;;  %v3403_v29 = vmov 4.0  }
0x16c4   :  { %3073 = vrsqrt.f32 %v2572_v21  ;;  %vm2579_vm10 = vweird.f32 %v2572_v21 }
0x16c7   :  { %v2136_v13 = vpop.xlane.xlu2 %2135 }
0x16ca   :  { %v3074_v27 = vpop.eup %3073 }
0x16cb   :  { %v2574_v63 = vmul.f32 %v3074_v27, %v2572_v21  ;;  %vm2580_vm4 = vweird.f32 %v3074_v27 }
0x16cc   :  { %vm2581_vm12 = vmor %vm2579_vm10, %vm2580_vm4 }
0x16cd   :  { %v2575_v0 = vmul.f32 %v3074_v27, %v2574_v63  ;;  %v3009_v63 = vld [vmem:[#allocation19 + $0x1] ss:$0 sm:$0xff] }
0x16cf   :  { %v2576_v22 = vmul.f32 0.5, %v2575_v0  ;;  %v2401_v41 = vpop.xlane.xlu2 %2400 }
0x16d0   :  { %v2402_v36 = vmul.f32 %v2401_v41, %v3689_v52  ;;  %v3010_v41 = vld [vmem:[#allocation21 + $0x1] ss:$0 sm:$0xff] }
0x16d1   :  { %v2577_v7 = vsub.f32 1.5, %v2576_v22 }
0x16d2   :  { %v2403_v45 = vadd.f32 1e-05, %v2402_v36 }
0x16d3   :  { %v2578_v19 = vmul.f32 %v3074_v27, %v2577_v7 }
0x16d4   :  { %3075 = vrsqrt.f32 %v2403_v45  ;;  %vm2410_vm7 = vweird.f32 %v2403_v45 }
0x16d5   :  { %v2582_v20 = vsel %vm2581_vm12, %v3074_v27, %v2578_v19 }
0x16d6   :  { %v2583_v50 = vmul.f32 %v2582_v20, %v4204_v15 }
0x16d8   :  { %v2588_v24 = vmul.f32 %v3005_v17, %v2583_v50 }
0x16da   :  { %v3076_v61 = vpop.eup %3075  ;;  %v2593_v25 = vadd.f32 %v3008_v23, %v2588_v24 }
0x16db   :  { %v2405_v4 = vmul.f32 %v3076_v61, %v2403_v45  ;;  %vm2411_vm2 = vweird.f32 %v3076_v61 }
0x16dc   :  { %v2594_v58 = vmax.f32 %v2593_v25, 0.0  ;;  %vm2412_vm8 = vmor %vm2410_vm7, %vm2411_vm2 }
0x16dd   :  { %v2406_v3 = vmul.f32 %v3076_v61, %v2405_v4 }
0x16de   :  { %2943 = vmatmul.msk.f32.vlgmr.msra.gmra.mxu2 %vm244_vm0, %v2594_v58 }
0x16df   :  { %v2407_v28 = vmul.f32 0.5, %v2406_v3 }
0x16e1   :  { %v2408_v9 = vsub.f32 1.5, %v2407_v28 }
0x16e3   :  { %v2409_v15 = vmul.f32 %v3076_v61, %v2408_v9 }
0x16e5   :  { %v2413_v49 = vsel %vm2412_vm8, %v3076_v61, %v2409_v15 }
0x16e6   :  { %v2414_v18 = vmul.f32 %v2413_v49, %v4210_v26  ;;  %v2137_v26 = vmul.f32 %v2136_v13, %v3689_v52 }
0x16e8   :  { %v2419_v31 = vmul.f32 %v3006_v46, %v2414_v18  ;;  %v2138_v54 = vsub.f32 %v4157_v8, %v2137_v26  ;;  %v2695_v18 = vld [vmem:[#allocation24 + $0x10] sm:$0xff] }
0x16ea   :  { %v2424_v30 = vadd.f32 %v3007_v37, %v2419_v31  ;;  %v2139_v12 = vmul.f32 %v2138_v54, %v2138_v54  ;;  %v2696_v37 = vld [vmem:[#allocation24 + $0x18] sm:$0xff] }
0x16eb   :  { %2712 = vmatpush.msrb.mxu1 %v2696_v37 }
0x16ec   :  { %v2425_v32 = vmax.f32 %v2424_v30, 0.0  ;;  %v2140_v62 = vsel %vm2050_vm6, %v2139_v12, 0.0  ;;  %v2694_v30 = vld [vmem:[#allocation24 + $0x8] sm:$0xff] }
0x16ed   :  { %2713 = vmatpush.msrb.mxu1 %v2695_v18 }
0x16ee   :  { %v2426_v34 = vsel %vm1784_vm14, %v2425_v32, 0.0 }
0x16ef   :  { %v2427_v35 = vrot.slane %v2426_v34, 4  ;;  %2714 = vmatpush.msrb.mxu1 %v2694_v30 }
0x16f1   :  { %v2428_v38 = vadd.f32 %v2427_v35, %v2426_v34  ;;  %v2693_v34 = vld [vmem:[#allocation24] sm:$0xff] }
0x16f2   :  { %2715 = vmatpush.msrb.mxu1 %v2693_v34 }
0x16f3   :  { %v2429_v39 = vrot.slane %v2428_v38, 2 }
0x16f5   :  { %v2430_v1 = vadd.f32 %v2429_v39, %v2428_v38  ;;  %v3011_v38 = vld [vmem:[#allocation19 + $0x1] ss:$0 sm:$0xff]  ;;  %v3012_v39 = vld [vmem:[#allocation21 + $0x1] ss:$0 sm:$0xff] }
0x16f7   :  { %v2431_v42 = vrot.slane %v2430_v1, 1 }
0x16f9   :  { %v2432_v5 = vadd.f32 %v2431_v42, %v2430_v1 }
0x16fb   :  { %v2433_v6 = vmul.f32 %v2432_v5, %v1917_v57 }
0x16fd   :  { %2434 = vst.msk [vmem:[#allocation5 + $0x1] sm:$0x1] %vm566_vm11, %v2433_v6 }
0x1704   :  { %v2687_v51 = vld [vmem:[#allocation5] sm:$0x3] }
0x1705   :  { %2947 = vmatmul.msk.f32.vlgmr.msra.gmra.mxu3 %vm244_vm0, %v2687_v51 }
0x1761   :  { %v2619_v53 = vpop.f32.mrf.mxu2 }
0x1762   :  { %2944 = vmatpush.msk.msrb.mxu0 %vm2026_vm1, %v2619_v53 }
0x1763   :  { %2945 = vmatmul.msk.f32.vlgmr.msrb.gmra.mxu0 %vm2022_vm5, %v4194_v43 }
0x17e0   :  { %v2642_v10 = vpop.f32.mrf.mxu0 }
0x17e1   :  { %v2645_v11 = vsel %vm2050_vm6, %v2642_v10, 0.0 }
0x17e2   :  { %2646 = vadd.xlane.f32.xlu0 %v2645_v11 }
0x17ea   :  { %2141 = vadd.xlane.f32.xlu0 %v2140_v62 }
0x1855   :  { %v2647_v44 = vpop.xlane.xlu0 %2646 }
0x1856   :  { %v2648_v14 = vmul.f32 %v2647_v44, %v3689_v52 }
0x1858   :  { %v4236_v56 = vsub.f32 %v2642_v10, %v2648_v14  ;;  %v2752_v14 = vld [vmem:[%s4290_s19 + $0x18] sm:$0xff] }
0x1859   :  { %2772 = vmatpush.msrb.mxu2 %v2752_v14 }
0x185a   :  { %v2650_v43 = vmul.f32 %v4236_v56, %v4236_v56 }
0x185c   :  { %v2651_v48 = vsel %vm2050_vm6, %v2650_v43, 0.0  ;;  %v2750_v43 = vld [vmem:[%s4290_s19 + $0x8] sm:$0xff] }
0x185d   :  { %2652 = vadd.xlane.f32.xlu1 %v2651_v48  ;;  %v2142_v2 = vpop.xlane.xlu0 %2141  ;;  %v2749_v48 = vld [vmem:[%s4290_s19] sm:$0xff] }
0x185e   :  { %v2143_v8 = vmul.f32 %v2142_v2, %v3689_v52  ;;  %v3013_v2 = vld [vmem:[%s4289_s18] ss:$0 sm:$0xff] }
0x1860   :  { %v2144_v57 = vadd.f32 1e-05, %v2143_v8  ;;  %v2740_v8 = vpop.f32.mrf.mxu3 }
0x1862   :  { %3077 = vrsqrt.f32 %v2144_v57  ;;  %vm2151_vm1 = vweird.f32 %v2144_v57 }
0x1863   :  { %3079 = vrcp.f32 %v3403_v29  ;;  %v3014_v29 = vld [vmem:[%s4291_s20] ss:$0 sm:$0xff] }
0x1868   :  { %v3078_v55 = vpop.eup %3077 }
0x1869   :  { %v2146_v59 = vmul.f32 %v3078_v55, %v2144_v57  ;;  %vm2152_vm14 = vweird.f32 %v3078_v55  ;;  %v3080_v0 = vpop.eup %3079 }
0x186a   :  { %vm2153_vm5 = vmor %vm2151_vm1, %vm2152_vm14  ;;  %v2175_v7 = vmul.f32 4.0, %v3080_v0  ;;  %vm2179_vm3 = vweird.f32 %v3080_v0 }
0x186b   :  { %v2147_v60 = vmul.f32 %v3078_v55, %v2146_v59 }
0x186c   :  { %v2176_v17 = vsub.f32 1.0, %v2175_v7 }
0x186d   :  { %v2148_v21 = vmul.f32 0.5, %v2147_v60 }
0x186e   :  { %v2177_v24 = vmul.f32 %v3080_v0, %v2176_v17 }
0x186f   :  { %v2149_v13 = vsub.f32 1.5, %v2148_v21 }
0x1870   :  { %v2178_v4 = vadd.f32 %v3080_v0, %v2177_v24 }
0x1871   :  { %v2150_v27 = vmul.f32 %v3078_v55, %v2149_v13 }
0x1872   :  { %v2180_v16 = vsel %vm2179_vm3, %v3080_v0, %v2178_v4 }
0x1873   :  { %v2154_v22 = vsel %vm2153_vm5, %v3078_v55, %v2150_v27 }
0x1874   :  { %v2155_v36 = vmul.f32 %v2154_v22, %v2138_v54 }
0x1876   :  { %v2160_v45 = vmul.f32 %v3009_v63, %v2155_v36 }
0x1878   :  { %v2165_v19 = vadd.f32 %v3010_v41, %v2160_v45 }
0x187a   :  { %v2166_v20 = vmax.f32 %v2165_v19, 0.0 }
0x187c   :  { %v2167_v50 = vsel %vm2050_vm6, %v2166_v20, 0.0 }
0x187d   :  { %v2168_v23 = vrot.slane %v2167_v50, 4 }
0x187f   :  { %v2169_v61 = vadd.f32 %v2168_v23, %v2167_v50 }
0x1881   :  { %v2170_v25 = vrot.slane %v2169_v61, 2 }
0x1883   :  { %v2171_v58 = vadd.f32 %v2170_v25, %v2169_v61 }
0x1885   :  { %v2172_v3 = vrot.slane %v2171_v58, 1 }
0x1887   :  { %v2173_v47 = vadd.f32 %v2172_v3, %v2171_v58 }
0x1889   :  { %v2181_v28 = vmul.f32 %v2180_v16, %v2173_v47 }
0x188b   :  { %2182 = vst.msk [vmem:[#allocation6] sm:$0x1] %vm566_vm11, %v2181_v28 }
0x18d0   :  { %v2653_v33 = vpop.xlane.xlu1 %2652 }
0x18d1   :  { %v2654_v9 = vmul.f32 %v2653_v33, %v3689_v52 }
0x18d3   :  { %v2655_v40 = vadd.f32 1e-05, %v2654_v9 }
0x18d5   :  { %3081 = vrsqrt.f32 %v2655_v40  ;;  %vm2662_vm15 = vweird.f32 %v2655_v40 }
0x18db   :  { %v3082_v15 = vpop.eup %3081 }
0x18dc   :  { %v2657_v46 = vmul.f32 %v3082_v15, %v2655_v40  ;;  %vm2663_vm13 = vweird.f32 %v3082_v15 }
0x18dd   :  { %vm2664_vm9 = vmor %vm2662_vm15, %vm2663_vm13 }
0x18de   :  { %v2658_v49 = vmul.f32 %v3082_v15, %v2657_v46 }
0x18e0   :  { %v2659_v31 = vmul.f32 0.5, %v2658_v49 }
0x18e2   :  { %v2660_v32 = vsub.f32 1.5, %v2659_v31 }
0x18e4   :  { %v2661_v35 = vmul.f32 %v3082_v15, %v2660_v32 }
0x18e6   :  { %v2665_v52 = vsel %vm2664_vm9, %v3082_v15, %v2661_v35 }
0x18e7   :  { %v2666_v1 = vmul.f32 %v2665_v52, %v4236_v56  ;;  %v2751_v56 = vld [vmem:[%s4290_s19 + $0x10] sm:$0xff] }
0x18e8   :  { %2773 = vmatpush.msrb.mxu2 %v2751_v56 }
0x18e9   :  { %v2671_v42 = vmul.f32 %v3011_v38, %v2666_v1 }
0x18ea   :  { %2774 = vmatpush.msrb.mxu2 %v2750_v43 }
0x18eb   :  { %v2676_v5 = vadd.f32 %v3012_v39, %v2671_v42 }
0x18ec   :  { %2775 = vmatpush.msrb.mxu2 %v2749_v48 }
0x18ed   :  { %v2677_v6 = vmax.f32 %v2676_v5, 0.0 }
0x18ef   :  { %v2678_v51 = vsel %vm2050_vm6, %v2677_v6, 0.0 }
0x18f0   :  { %v2679_v53 = vrot.slane %v2678_v51, 4 }
0x18f2   :  { %v2680_v26 = vadd.f32 %v2679_v53, %v2678_v51 }
0x18f4   :  { %v2681_v10 = vrot.slane %v2680_v26, 2 }
0x18f6   :  { %v2682_v54 = vadd.f32 %v2681_v10, %v2680_v26 }
0x18f8   :  { %v2683_v11 = vrot.slane %v2682_v54, 1 }
0x18fa   :  { %v2684_v12 = vadd.f32 %v2683_v11, %v2682_v54 }
0x18fc   :  { %v2685_v62 = vmul.f32 %v2684_v12, %v2180_v16 }
0x18fe   :  { %2686 = vst.msk [vmem:[#allocation6 + $0x1] sm:$0x1] %vm566_vm11, %v2685_v62  ;;  %vm2780_vm11 = vcmask 58368  }
0x1905   :  { %v2692_v44 = vld [vmem:[#allocation6] sm:$0x3] }
0x1906   :  { %2946 = vmatmul.msk.f32.vlgmr.msrb.gmra.mxu1 %vm244_vm0, %v2692_v44 }
0x1983   :  { %v2717_v57 = vpop.f32.mrf.mxu1 }
0x1984   :  { %v2741_v55 = vadd.f32 %v2740_v8, %v2717_v57 }
0x1986   :  { %v2747_v59 = vadd.f32 %v3013_v2, %v2741_v55 }
0x1988   :  { %v2748_v60 = vmax.f32 %v2747_v59, 0.0 }
0x198a   :  { %2948 = vmatmul.msk.f32.vlgmr.msrb.gmra.mxu2 %vm244_vm0, %v2748_v60 }
0x1a0d   :  { %v2777_v21 = vpop.f32.mrf.mxu2 }
0x1a0e   :  { %v2778_v13 = vadd.f32 %v3014_v29, %v2777_v21 }
0x1a10   :  { %2781 = vst.msk [vmem:[#allocation25] sm:$0x3] %vm2780_vm11, %v2778_v13 }
0x1a11   :  { %2792 = dma.vmem_to_hbm [thread:$0]  %s2788_s12, 32, %s2790_s15, [#allocation9]  }
0x1a12   :  { %3383 = dma.done.wait [#allocation9], 32  }
0x1a13   :  { %3384 = vsyncadd [#allocation9], 4294967264 }
0x1a14   :  { %2797 = vsyncpa [#allocation8], 1 }
0x1a15   :  { %2798 = vsyncpa [#allocation11], 1 }
0x1a16   :  { %2799 = vsyncpa [#allocation14], 1 }
0x1a17   :  { %2800 = vsyncpa [#allocation17], 1 }
0x1a18   :  { %2801 = vsyncpa [#allocation20], 1 }
0x1a19   :  { %2802 = vsyncpa [#allocation23], 1 }
0x1a1a   :  { %2803 = vsyncpa [#allocation9], 1 }

</bundles_post_ra>
